<compile_context>
chip_gen: v7x
topology: tpu7x:2x2x1
jax: 0.10.0
libtpu: 0.0.40
codegen_flags: <defaults>
</compile_context>

<pallas_src>
import numpy as np

import jax
import jax.numpy as jnp
from jax import lax
from jax.experimental import pallas as pl
from jax.experimental.pallas import tpu as pltpu


_VMEM_LIMIT = 40 * 1024 * 1024     # leaves headroom on v7x (64 MiB / TC)
_TARGET_ROWS = 512                 # target M rows of the merged deconv matmul


# ---------------------------------------------------------------------------
# ConvTranspose2d(k=4, s=2, p=1) tap algebra
#
#   out[y, x, co] = sum_{ki,kj,ci} x[i, j, ci] * w[ki, kj, ci, co],
#   y = 2*i - 1 + ki,  x = 2*j - 1 + kj.
#
# The output is split into 2x2 phases (r, s) = (y % 2, x % 2) and the 16 taps
# are merged into ONE wide bf16 MXU matmul (Bb*H*W, Cin) @ (Cin, 16*Cout) with
# f32 accumulation.  Lanes of the packed weight are ordered
# [group g = 2*ro + co][phase p = 2*r + s]; the tap feeding phase (r, s) from
# group (ro, co) is (ki, kj) = (2*ro + 1 - r, 2*co + 1 - s).  The group-(ro,
# co) result at input pixel (i, j) lands at padded-accumulator pixel
# (i + ro, j + co), and phase (r, s) reads window [r : r + H, s : s + W].
# ---------------------------------------------------------------------------
def _pack_deconv_weight(w_pt):
    """(Cin, Cout, 4, 4) PyTorch ConvTranspose2d weight -> (Cin, 16*Cout) bf16."""
    w44 = jnp.transpose(w_pt, (2, 3, 0, 1))          # (4, 4, Cin, Cout)
    blocks = []
    for ro in range(2):
        for co in range(2):
            for r in range(2):
                for s in range(2):
                    blocks.append(w44[2 * ro + 1 - r, 2 * co + 1 - s])
    return jnp.concatenate(blocks, axis=1).astype(jnp.bfloat16)


# ---------------------------------------------------------------------------
# Kernel factory
# ---------------------------------------------------------------------------
def _make_deconv_kernel(bb, H, W, Cout, nk, mode):
    """Kernel body builder.

    mode: "mid"   deconv + BN(eval) + ReLU
          "first" same, plus the fused depth-feature dot (x already in VMEM)
          "xy"    same, plus the fused 1x1-conv / softmax / soft-argmax head
    """
    HW = H * W
    GC = 4 * Cout        # lanes per (ro, co) group (one block per output phase)

    def tap_matmul(x_ref, w_ref):
        x = x_ref[...]                                           # (bb, HW, tk)
        return jnp.dot(x.reshape(bb * HW, x.shape[-1]), w_ref[...],
                       preferred_element_type=jnp.float32)       # (bb*HW, 16*Cout)

    def fill_pad(pad_ref, bigb):
        """One-shot shifted accumulation of the 4 tap groups (epilogue only)."""
        # Only the pad boundary (row H / col W) needs explicit zeroing: the
        # interior is initialised by the group-(0, 0) assignment.
        pad_ref[H:H + 1, :, :] = jnp.zeros((1, W + 1, GC), jnp.float32)
        pad_ref[:, W:W + 1, :] = jnp.zeros((H + 1, 1, GC), jnp.float32)
        pad_ref[0:H, 0:W, :] = bigb[:, :, 0:GC]                  # group (0, 0)
        for g, ro, co in ((1, 0, 1), (2, 1, 0), (3, 1, 1)):
            pad_ref[ro:ro + H, co:co + W, :] += bigb[:, :, g * GC:(g + 1) * GC]

    def phase_value(pad_ref, r, s, scale, bias):
        """Post-BN/ReLU value of output phase (r, s): (H, W, Cout) f32."""
        p = 2 * r + s
        v = pad_ref[r:r + H, s:s + W, p * Cout:(p + 1) * Cout]
        return jnp.maximum(v * scale + bias, 0.0)

    def write_mid(big, scale_ref, bias_ref, o_ref, pad_ref):
        scale = scale_ref[...].reshape(1, 1, Cout)
        bias = bias_ref[...].reshape(1, 1, Cout)
        for bi in range(bb):
            bigb = big[bi * HW:(bi + 1) * HW].reshape(H, W, 4 * GC)
            fill_pad(pad_ref, bigb)
            for r in range(2):
                for s in range(2):
                    y = phase_value(pad_ref, r, s, scale, bias)
                    # o layout (bb, H, 2, W, 2*Cout) == interleaved
                    # (bb, 2H, 2W, Cout) under a free contiguous reshape.
                    o_ref[bi, :, r, :, s * Cout:(s + 1) * Cout] = (
                        y.astype(o_ref.dtype))

    def write_xy(big, scale_ref, bias_ref, wxy_ref, bxy_ref, oxy_ref, pad_ref):
        scale = scale_ref[...].reshape(1, 1, Cout)
        bias = bias_ref[...].reshape(1, 1, Cout)
        wxy = wxy_ref[...].reshape(1, 1, Cout)
        bxy = bxy_ref[...]                                       # (1, 1)
        # Coordinate planes hoisted out of the phase / batch loops: phase
        # (r, s) pixel (q, p) is output pixel (2q + r, 2p + s).
        ip2 = 2.0 * lax.broadcasted_iota(jnp.float32, (H, W), 1)
        iq2 = 2.0 * lax.broadcasted_iota(jnp.float32, (H, W), 0)
        for bi in range(bb):
            bigb = big[bi * HW:(bi + 1) * HW].reshape(H, W, 4 * GC)
            fill_pad(pad_ref, bigb)
            logits = []
            for r in range(2):
                for s in range(2):
                    y = phase_value(pad_ref, r, s, scale, bias)
                    logits.append(jnp.sum(y * wxy, axis=-1) + bxy)     # (H, W)
            m = jnp.maximum(jnp.maximum(logits[0], logits[1]),
                            jnp.maximum(logits[2], logits[3]))
            m = jnp.max(m, axis=(0, 1), keepdims=True)                  # (1, 1)
            z = jnp.zeros((1, 1), jnp.float32)
            sx = jnp.zeros((1, 1), jnp.float32)
            sy = jnp.zeros((1, 1), jnp.float32)
            for r in range(2):
                for s in range(2):
                    e = jnp.exp(logits[2 * r + s] - m)                  # (H, W)
                    z = z + jnp.sum(e, axis=(0, 1), keepdims=True)
                    sx = sx + jnp.sum(e * (ip2 + float(s)),
                                      axis=(0, 1), keepdims=True)
                    sy = sy + jnp.sum(e * (iq2 + float(r)),
                                      axis=(0, 1), keepdims=True)
            inv = 1.0 / z
            oxy_ref[bi] = jnp.concatenate([sx * inv, sy * inv], axis=1)  # (1, 2)

    def depth_partial(x_ref, wd_ref):
        """Fused depth-head partial: sum_{hw, c_tile} x * w_d  per batch elem."""
        xb = x_ref[...]
        parts = []
        for bi in range(bb):
            xf = xb[bi].astype(jnp.float32)                      # (HW, tk)
            parts.append(jnp.sum(xf * wd_ref[...], axis=(0, 1),
                                 keepdims=True).reshape(1, 1, 1))
        return jnp.concatenate(parts, axis=0)                    # (bb, 1, 1)

    def reduce_k(big, acc_ref, finalize):
        k = pl.program_id(1)

        @pl.when(k == 0)
        def _():
            acc_ref[...] = big                                   # no zero-init

        @pl.when(k > 0)
        def _():
            acc_ref[...] += big

        @pl.when(k == nk - 1)
        def _():
            finalize(acc_ref[...])

    if mode == "mid":
        def kernel(x_ref, w_ref, scale_ref, bias_ref, o_ref, *scratch):
            big = tap_matmul(x_ref, w_ref)
            if nk == 1:
                pad_ref, = scratch
                write_mid(big, scale_ref, bias_ref, o_ref, pad_ref)
            else:
                acc_ref, pad_ref = scratch
                reduce_k(big, acc_ref,
                         lambda acc: write_mid(acc, scale_ref, bias_ref,
                                               o_ref, pad_ref))
        return kernel

    if mode == "first":
        def kernel(x_ref, w_ref, scale_ref, bias_ref, wd_ref,
                   o_ref, od_ref, *scratch):
            big = tap_matmul(x_ref, w_ref)
            part = depth_partial(x_ref, wd_ref)
            if nk == 1:
                pad_ref, = scratch
                od_ref[...] = part
                write_mid(big, scale_ref, bias_ref, o_ref, pad_ref)
            else:
                acc_ref, pad_ref = scratch
                k = pl.program_id(1)

                @pl.when(k == 0)
                def _():
                    acc_ref[...] = big
                    od_ref[...] = part

                @pl.when(k > 0)
                def _():
                    acc_ref[...] += big
                    od_ref[...] += part

                @pl.when(k == nk - 1)
                def _():
                    write_mid(acc_ref[...], scale_ref, bias_ref, o_ref, pad_ref)
        return kernel

    # mode == "xy"
    def kernel(x_ref, w_ref, scale_ref, bias_ref, wxy_ref, bxy_ref,
               oxy_ref, *scratch):
        big = tap_matmul(x_ref, w_ref)
        if nk == 1:
            pad_ref, = scratch
            write_xy(big, scale_ref, bias_ref, wxy_ref, bxy_ref,
                     oxy_ref, pad_ref)
        else:
            acc_ref, pad_ref = scratch
            reduce_k(big, acc_ref,
                     lambda acc: write_xy(acc, scale_ref, bias_ref, wxy_ref,
                                          bxy_ref, oxy_ref, pad_ref))
    return kernel


# ---------------------------------------------------------------------------
# Wrappers
# ---------------------------------------------------------------------------
def _choose_tk(cin, max_tk):
    """Largest Cin tile <= max_tk that divides Cin and is lane-tile friendly.

    On v5e/v6e (128 MiB VMEM) `max_tk=Cin` makes the layer-1 weight fully
    resident (fetched once per pallas_call); keep max_tk <= 512 on v7x.
    """
    if cin <= max_tk:
        return cin
    tk = (max_tk // 128) * 128
    while tk > 128 and cin % tk:
        tk -= 128
    if tk <= 0 or cin % tk:
        return cin
    return tk


def _choose_bb(batch, hw, target_rows):
    """Batch elements per grid step so the merged-matmul M dim ~ target_rows."""
    bb = max(1, min(batch, target_rows // max(hw, 1)))
    while batch % bb:
        bb -= 1
    return bb


def deconv_bn_relu(x, H, W, w_all, scale, bias, *, w_depth=None,
                   max_tk=512, target_rows=_TARGET_ROWS):
    """One deconv(k=4, s=2, p=1) + BN(eval, folded) + ReLU layer.

    x: (B, H*W, Cin) bf16 flattened NHWC activations.
    w_all: (Cin, 16*Cout) bf16 phase-packed deconv weight.
    scale / bias: (1, Cout) f32 folded BatchNorm.
    Returns (B, 4*H*W, Cout) bf16 (flattened (2H, 2W) NHWC).  If `w_depth`
    ((1, Cin) f32) is given, additionally returns the fused depth-head dot
    sum_{h,w,c} x * w_depth as (B, 1, 1) f32.
    """
    B, HW, Cin = x.shape
    assert HW == H * W
    Cout = w_all.shape[1] // 16
    tk = _choose_tk(Cin, max_tk)
    nk = Cin // tk
    bb = _choose_bb(B, HW, target_rows)
    nb = B // bb
    mode = "first" if w_depth is not None else "mid"
    kernel = _make_deconv_kernel(bb, H, W, Cout, nk, mode)

    if nk > 1:
        grid = (nb, nk)
        dims = ("parallel", "arbitrary")
        x_map = lambda b, k: (b, 0, k)
        w_map = lambda b, k: (k, 0)
        c_map = lambda b, k: (0, 0)
        wd_map = lambda b, k: (0, k)
        o_map = lambda b, k: (b, 0, 0, 0, 0)
        od_map = lambda b, k: (b, 0, 0)
        scratch = [pltpu.VMEM((bb * HW, 16 * Cout), jnp.float32),
                   pltpu.VMEM((H + 1, W + 1, 4 * Cout), jnp.float32)]
    else:
        grid = (nb,)
        dims = ("parallel",)
        x_map = lambda b: (b, 0, 0)
        w_map = lambda b: (0, 0)          # constant index -> weight fetched once
        c_map = lambda b: (0, 0)
        wd_map = lambda b: (0, 0)
        o_map = lambda b: (b, 0, 0, 0, 0)
        od_map = lambda b: (b, 0, 0)
        scratch = [pltpu.VMEM((H + 1, W + 1, 4 * Cout), jnp.float32)]

    in_specs = [pl.BlockSpec((bb, HW, tk), x_map),
                pl.BlockSpec((tk, 16 * Cout), w_map),
                pl.BlockSpec((1, Cout), c_map),
                pl.BlockSpec((1, Cout), c_map)]
    inputs = [x, w_all, scale, bias]
    out_shape = [jax.ShapeDtypeStruct((B, H, 2, W, 2 * Cout), jnp.bfloat16)]
    out_specs = [pl.BlockSpec((bb, H, 2, W, 2 * Cout), o_map)]
    if mode == "first":
        in_specs.append(pl.BlockSpec((1, tk), wd_map))
        inputs.append(w_depth)
        out_shape.append(jax.ShapeDtypeStruct((B, 1, 1), jnp.float32))
        out_specs.append(pl.BlockSpec((bb, 1, 1), od_map))

    outs = pl.pallas_call(
        kernel,
        out_shape=tuple(out_shape),
        grid_spec=pltpu.PrefetchScalarGridSpec(
            num_scalar_prefetch=0, grid=grid,
            in_specs=in_specs, out_specs=tuple(out_specs),
            scratch_shapes=scratch),
        compiler_params=pltpu.CompilerParams(
            dimension_semantics=dims, vmem_limit_bytes=_VMEM_LIMIT),
    )(*inputs)
    # (B, H, 2, W, 2*Cout) and (B, 2H*2W, Cout) share the same linear element
    # order, so this reshape is a free metadata change (no HBM round trip).
    y = outs[0].reshape(B, 4 * HW, Cout)
    if mode == "first":
        return y, outs[1]
    return y


def deconv_bn_relu_xy(x, H, W, w_all, scale, bias, w_xy, b_xy, *,
                      max_tk=512, target_rows=_TARGET_ROWS):
    """Last deconv layer fused with the xy head (1x1 conv -> softmax over the
    full (2H, 2W) map -> soft-argmax).  The largest feature map never leaves
    VMEM.  Returns (B, 1, 2) f32 (coord_x, coord_y)."""
    B, HW, Cin = x.shape
    assert HW == H * W
    Cout = w_all.shape[1] // 16
    tk = _choose_tk(Cin, max_tk)
    nk = Cin // tk
    bb = _choose_bb(B, HW, target_rows)
    nb = B // bb
    kernel = _make_deconv_kernel(bb, H, W, Cout, nk, "xy")

    if nk > 1:
        grid = (nb, nk)
        dims = ("parallel", "arbitrary")
        x_map = lambda b, k: (b, 0, k)
        w_map = lambda b, k: (k, 0)
        c_map = lambda b, k: (0, 0)
        o_map = lambda b, k: (b, 0, 0)
        scratch = [pltpu.VMEM((bb * HW, 16 * Cout), jnp.float32),
                   pltpu.VMEM((H + 1, W + 1, 4 * Cout), jnp.float32)]
    else:
        grid = (nb,)
        dims = ("parallel",)
        x_map = lambda b: (b, 0, 0)
        w_map = lambda b: (0, 0)
        c_map = lambda b: (0, 0)
        o_map = lambda b: (b, 0, 0)
        scratch = [pltpu.VMEM((H + 1, W + 1, 4 * Cout), jnp.float32)]

    return pl.pallas_call(
        kernel,
        out_shape=jax.ShapeDtypeStruct((B, 1, 2), jnp.float32),
        grid_spec=pltpu.PrefetchScalarGridSpec(
            num_scalar_prefetch=0, grid=grid,
            in_specs=[pl.BlockSpec((bb, HW, tk), x_map),
                      pl.BlockSpec((tk, 16 * Cout), w_map),
                      pl.BlockSpec((1, Cout), c_map),
                      pl.BlockSpec((1, Cout), c_map),
                      pl.BlockSpec((1, Cout), c_map),
                      pl.BlockSpec((1, 1), c_map)],
            out_specs=pl.BlockSpec((bb, 1, 2), o_map),
            scratch_shapes=scratch),
        compiler_params=pltpu.CompilerParams(
            dimension_semantics=dims, vmem_limit_bytes=_VMEM_LIMIT),
    )(x, w_all, scale, bias, w_xy, b_xy)


# ---------------------------------------------------------------------------
# Parameter init (deterministic, in-script) and full forward
# ---------------------------------------------------------------------------
def init_params(key, inplanes, outplanes):
    keys = jax.random.split(key, 5)
    eps = 1e-5
    deconv = []
    cin = inplanes
    for i in range(3):
        # PyTorch ConvTranspose2d weight layout: (Cin, Cout, kH, kW)
        w_pt = jax.random.normal(keys[i], (cin, outplanes, 4, 4), jnp.float32) * 0.02
        # BatchNorm2d (eval mode, default init): weight=1, bias=0, mean=0, var=1
        gamma = jnp.ones((outplanes,), jnp.float32)
        beta = jnp.zeros((outplanes,), jnp.float32)
        mean = jnp.zeros((outplanes,), jnp.float32)
        var = jnp.ones((outplanes,), jnp.float32)
        scale = gamma / jnp.sqrt(var + eps)
        bias = beta - mean * scale
        deconv.append(dict(
            w_pt=w_pt,
            w_packed=_pack_deconv_weight(w_pt),      # (Cin, 16*Cout) bf16
            scale=scale.reshape(1, -1),
            bias=bias.reshape(1, -1),
        ))
        cin = outplanes
    # xy_layer: Conv2d(outplanes, 1, k=1)  weight (1, outplanes, 1, 1), bias (1,)
    xy_w = jax.random.normal(keys[3], (1, outplanes, 1, 1), jnp.float32) * 0.02
    xy_b = jnp.zeros((1,), jnp.float32)
    # depth_layer: Conv2d(inplanes, 1, k=1)
    d_w = jax.random.normal(keys[4], (1, inplanes, 1, 1), jnp.float32) * 0.02
    d_b = jnp.zeros((1,), jnp.float32)
    return dict(
        deconv=deconv,
        xy_w=xy_w.reshape(1, outplanes), xy_b=xy_b.reshape(1, 1),
        d_w=d_w.reshape(1, inplanes), d_b=d_b.reshape(1, 1),
    )


def rootnet3d_forward(fm_nchw, k_value, params, *, max_tk=512,
                      target_rows=_TARGET_ROWS):
    """Eval-mode forward of RootNet3D (backbone = identity).  Returns (B, 3)."""
    B, Cin, h0, w0 = fm_nchw.shape
    x = jnp.transpose(fm_nchw, (0, 2, 3, 1)).reshape(B, h0 * w0, Cin)
    x = x.astype(jnp.bfloat16)
    layers = params["deconv"]

    # Layer 1 (+ fused depth-feature dot; x is never re-read for the depth head).
    y, d_dot = deconv_bn_relu(x, h0, w0, layers[0]["w_packed"],
                              layers[0]["scale"], layers[0]["bias"],
                              w_depth=params["d_w"], max_tk=max_tk,
                              target_rows=target_rows)
    H, W = 2 * h0, 2 * w0

    # Layer 2.
    y = deconv_bn_relu(y, H, W, layers[1]["w_packed"],
                       layers[1]["scale"], layers[1]["bias"],
                       max_tk=max_tk, target_rows=target_rows)
    H, W = 2 * H, 2 * W

    # Layer 3 fused with the xy soft-argmax head.
    xy = deconv_bn_relu_xy(y, H, W, layers[2]["w_packed"],
                           layers[2]["scale"], layers[2]["bias"],
                           params["xy_w"], params["xy_b"],
                           max_tk=max_tk, target_rows=target_rows)   # (B, 1, 2)

    gamma = d_dot[:, 0, 0] * (1.0 / (h0 * w0)) + params["d_b"][0, 0]  # (B,)
    depth = gamma * k_value.astype(jnp.float32)
    return jnp.concatenate([xy[:, 0, :], depth[:, None]], axis=1)     # (B, 3)


# ---------------------------------------------------------------------------
# Pure-JAX (XLA, f32) reference of the PyTorch module for validation
# ---------------------------------------------------------------------------
def _conv_transpose_ref(x_nchw, w_pt):
    """PyTorch ConvTranspose2d(k=4, s=2, p=1, bias=False), NCHW, f32."""
    w = jnp.flip(w_pt, axis=(2, 3))                  # flip spatial taps
    w = jnp.transpose(w, (1, 0, 2, 3))               # (Cout, Cin, kH, kW)
    return lax.conv_general_dilated(
        x_nchw, w, window_strides=(1, 1), padding=[(2, 2), (2, 2)],
        lhs_dilation=(2, 2), rhs_dilation=(1, 1),
        dimension_numbers=("NCHW", "OIHW", "NCHW"))


def rootnet3d_reference(fm_nchw, k_value, params):
    x = fm_nchw.astype(jnp.float32)
    y = x
    for layer in params["deconv"]:
        y = _conv_transpose_ref(y, layer["w_pt"])
        scale = layer["scale"].reshape(1, -1, 1, 1)
        bias = layer["bias"].reshape(1, -1, 1, 1)
        y = jnp.maximum(y * scale + bias, 0.0)
    B, C, Ho, Wo = y.shape
    logits = jnp.einsum("bchw,c->bhw", y, params["xy_w"][0]) + params["xy_b"][0, 0]
    p = jax.nn.softmax(logits.reshape(B, Ho * Wo), axis=1).reshape(B, Ho, Wo)
    coord_x = jnp.sum(p * jnp.arange(Wo, dtype=jnp.float32)[None, None, :], axis=(1, 2))
    coord_y = jnp.sum(p * jnp.arange(Ho, dtype=jnp.float32)[None, :, None], axis=(1, 2))
    feat = jnp.mean(x.reshape(B, x.shape[1], -1), axis=2)            # (B, Cin)
    gamma = feat @ params["d_w"][0] + params["d_b"][0, 0]            # (B,)
    depth = gamma * k_value
    return jnp.stack([coord_x, coord_y, depth], axis=1)


if __name__ == "__main__":
    key = jax.random.PRNGKey(0)
    # Small stand-ins for RootNet (real: inplanes=2048, outplanes=256, fm 8x8):
    # inplanes=256 / outplanes=128 keep the channel lanes 128-aligned, and
    # max_tk=128 exercises the Cin-reduction grid axis (nk=2) on layer 1 while
    # layers 2/3 exercise the nk==1 (scratch-free accumulation) path.
    B, INPLANES, OUTPLANES, h, w = 2, 256, 128, 4, 4
    kp, kx, kk = jax.random.split(key, 3)
    params = init_params(kp, INPLANES, OUTPLANES)
    fm = jax.random.normal(kx, (B, INPLANES, h, w), jnp.float32)     # backbone fm (NCHW)
    k_value = jax.random.uniform(kk, (B,), jnp.float32, 1.0, 2.0)

    coord = rootnet3d_forward(fm, k_value, params, max_tk=128)
    coord = jax.block_until_ready(coord)
    assert coord.shape == (B, 3) and coord.dtype == jnp.float32

    ref = jax.block_until_ready(rootnet3d_reference(fm, k_value, params))
    np.testing.assert_allclose(np.asarray(coord), np.asarray(ref),
                               rtol=2e-2, atol=2e-2)
    print("KERNEL_OK")
</pallas_src>

<mosaic_0001>
module attributes {stable_mosaic.version = 11 : i64} {
  func.func @kernel(%arg0: i32, %arg1: i32, %arg2: memref<2x16x128xbf16, #tpu.memory_space<vmem>>, %arg3: memref<128x2048xbf16, #tpu.memory_space<vmem>>, %arg4: memref<1x128xf32, #tpu.memory_space<vmem>>, %arg5: memref<1x128xf32, #tpu.memory_space<vmem>>, %arg6: memref<1x128xf32, #tpu.memory_space<vmem>>, %arg7: memref<2x4x2x4x256xbf16, #tpu.memory_space<vmem>>, %arg8: memref<2x1x1xf32, #tpu.memory_space<vmem>>, %arg9: memref<32x2048xf32, #tpu.memory_space<vmem>>, %arg10: memref<5x5x512xf32, #tpu.memory_space<vmem>>) attributes {dimension_semantics = [#tpu.dimension_semantics<parallel>, #tpu.dimension_semantics<arbitrary>], iteration_bounds = array<i64: 1, 2>, scalar_prefetch = 0 : i64, scratch_operands = 2 : i64, tpu.core_type = #tpu.core_type<tc>, window_params = [{transform_indices = @transform_0, window_bounds = array<i64: 2, 16, 128>}, {transform_indices = @transform_1, window_bounds = array<i64: 128, 2048>}, {pipeline_mode = #tpu.pipeline_mode<synchronous>, transform_indices = @transform_2, window_bounds = array<i64: 1, 128>}, {pipeline_mode = #tpu.pipeline_mode<synchronous>, transform_indices = @transform_3, window_bounds = array<i64: 1, 128>}, {transform_indices = @transform_4, window_bounds = array<i64: 1, 128>}, {transform_indices = @transform_5, window_bounds = array<i64: 2, 4, 2, 4, 256>}, {transform_indices = @transform_6, window_bounds = array<i64: 2, 1, 1>}]} {
    %c0 = arith.constant 0 : index
    %c0_0 = arith.constant 0 : index
    %c0_1 = arith.constant 0 : index
    %0 = vector.load %arg2[%c0, %c0_0, %c0_1] : memref<2x16x128xbf16, #tpu.memory_space<vmem>>, vector<2x16x128xbf16>
    %1 = vector.shape_cast %0 : vector<2x16x128xbf16> to vector<32x128xbf16>
    %c0_2 = arith.constant 0 : index
    %c0_3 = arith.constant 0 : index
    %2 = vector.load %arg3[%c0_2, %c0_3] : memref<128x2048xbf16, #tpu.memory_space<vmem>>, vector<128x2048xbf16>
    %cst = arith.constant dense<0.000000e+00> : vector<32x2048xf32>
    %3 = tpu.matmul %1, %2, %cst {dimension_numbers = #tpu.dot_dimension_numbers<[1], [0], [0], [1], [0, 0, 1, 1], [], []>} : vector<32x128xbf16>, vector<128x2048xbf16>, vector<32x2048xf32> -> vector<32x2048xf32>
    %c0_4 = arith.constant 0 : index
    %c0_5 = arith.constant 0 : index
    %c0_6 = arith.constant 0 : index
    %4 = vector.load %arg2[%c0_4, %c0_5, %c0_6] : memref<2x16x128xbf16, #tpu.memory_space<vmem>>, vector<2x16x128xbf16>
    %5 = vector.extract_strided_slice %4 {offsets = [0, 0, 0], sizes = [1, 16, 128], strides = [1, 1, 1]} : vector<2x16x128xbf16> to vector<1x16x128xbf16>
    %6 = vector.shape_cast %5 : vector<1x16x128xbf16> to vector<16x128xbf16>
    %7 = arith.extf %6 : vector<16x128xbf16> to vector<16x128xf32>
    %c0_7 = arith.constant 0 : index
    %c0_8 = arith.constant 0 : index
    %8 = vector.load %arg6[%c0_7, %c0_8] : memref<1x128xf32, #tpu.memory_space<vmem>>, vector<1x128xf32>
    %9 = vector.broadcast %8 : vector<1x128xf32> to vector<16x128xf32>
    %10 = arith.mulf %7, %9 : vector<16x128xf32>
    %11 = vector.shape_cast %10 : vector<16x128xf32> to vector<1x16x128xf32>
    %cst_9 = arith.constant dense<0.000000e+00> : vector<1xf32>
    %12 = vector.multi_reduction <add>, %11, %cst_9 [1, 2] : vector<1x16x128xf32> to vector<1xf32>
    %13 = vector.shape_cast %12 : vector<1xf32> to vector<1x1x1xf32>
    %14 = vector.extract %13[0, 0, 0] : f32 from vector<1x1x1xf32>
    %15 = vector.broadcast %14 : f32 to vector<1x1xf32>
    %16 = vector.shape_cast %15 : vector<1x1xf32> to vector<1x1x1xf32>
    %17 = vector.extract_strided_slice %4 {offsets = [1, 0, 0], sizes = [1, 16, 128], strides = [1, 1, 1]} : vector<2x16x128xbf16> to vector<1x16x128xbf16>
    %18 = vector.shape_cast %17 : vector<1x16x128xbf16> to vector<16x128xbf16>
    %19 = arith.extf %18 : vector<16x128xbf16> to vector<16x128xf32>
    %c0_10 = arith.constant 0 : index
    %c0_11 = arith.constant 0 : index
    %20 = vector.load %arg6[%c0_10, %c0_11] : memref<1x128xf32, #tpu.memory_space<vmem>>, vector<1x128xf32>
    %21 = vector.broadcast %20 : vector<1x128xf32> to vector<16x128xf32>
    %22 = arith.mulf %19, %21 : vector<16x128xf32>
    %23 = vector.shape_cast %22 : vector<16x128xf32> to vector<1x16x128xf32>
    %cst_12 = arith.constant dense<0.000000e+00> : vector<1xf32>
    %24 = vector.multi_reduction <add>, %23, %cst_12 [1, 2] : vector<1x16x128xf32> to vector<1xf32>
    %25 = vector.shape_cast %24 : vector<1xf32> to vector<1x1x1xf32>
    %26 = vector.extract %25[0, 0, 0] : f32 from vector<1x1x1xf32>
    %27 = vector.broadcast %26 : f32 to vector<1x1xf32>
    %28 = vector.shape_cast %27 : vector<1x1xf32> to vector<1x1x1xf32>
    %29 = tpu.concatenate %16, %28 in 0 : vector<1x1x1xf32>, vector<1x1x1xf32> -> vector<2x1x1xf32>
    %c0_i32 = arith.constant 0 : i32
    %30 = arith.cmpi eq, %arg1, %c0_i32 : i32
    %31 = arith.extui %30 : i1 to i32
    %c0_i32_13 = arith.constant 0 : i32
    %32 = arith.cmpi ne, %31, %c0_i32_13 : i32
    scf.if %32 {
      %c0_17 = arith.constant 0 : index
      %c0_18 = arith.constant 0 : index
      %39 = vector.load %arg9[%c0_17, %c0_18] : memref<32x2048xf32, #tpu.memory_space<vmem>>, vector<32x2048xf32>
      tpu.vector_store %arg9[%c0_17, %c0_18], %3 {strides = array<i32>} : memref<32x2048xf32, #tpu.memory_space<vmem>>, vector<32x2048xf32>,
      %c0_19 = arith.constant 0 : index
      %c0_20 = arith.constant 0 : index
      %c0_21 = arith.constant 0 : index
      %40 = vector.load %arg8[%c0_19, %c0_20, %c0_21] : memref<2x1x1xf32, #tpu.memory_space<vmem>>, vector<2x1x1xf32>
      tpu.vector_store %arg8[%c0_19, %c0_20, %c0_21], %29 {strides = array<i32>} : memref<2x1x1xf32, #tpu.memory_space<vmem>>, vector<2x1x1xf32>,
    } else {
    }
    %c0_i32_14 = arith.constant 0 : i32
    %33 = arith.cmpi sgt, %arg1, %c0_i32_14 : i32
    %34 = arith.extui %33 : i1 to i32
    %c0_i32_15 = arith.constant 0 : i32
    %35 = arith.cmpi ne, %34, %c0_i32_15 : i32
    scf.if %35 {
      %c0_17 = arith.constant 0 : index
      %c0_18 = arith.constant 0 : index
      %39 = vector.load %arg9[%c0_17, %c0_18] : memref<32x2048xf32, #tpu.memory_space<vmem>>, vector<32x2048xf32>
      %40 = arith.addf %39, %3 : vector<32x2048xf32>
      %c0_19 = arith.constant 0 : index
      %c0_20 = arith.constant 0 : index
      %41 = vector.load %arg9[%c0_19, %c0_20] : memref<32x2048xf32, #tpu.memory_space<vmem>>, vector<32x2048xf32>
      tpu.vector_store %arg9[%c0_19, %c0_20], %40 {strides = array<i32>} : memref<32x2048xf32, #tpu.memory_space<vmem>>, vector<32x2048xf32>,
      %c0_21 = arith.constant 0 : index
      %c0_22 = arith.constant 0 : index
      %c0_23 = arith.constant 0 : index
      %42 = vector.load %arg8[%c0_21, %c0_22, %c0_23] : memref<2x1x1xf32, #tpu.memory_space<vmem>>, vector<2x1x1xf32>
      %43 = arith.addf %42, %29 : vector<2x1x1xf32>
      %c0_24 = arith.constant 0 : index
      %c0_25 = arith.constant 0 : index
      %c0_26 = arith.constant 0 : index
      %44 = vector.load %arg8[%c0_24, %c0_25, %c0_26] : memref<2x1x1xf32, #tpu.memory_space<vmem>>, vector<2x1x1xf32>
      tpu.vector_store %arg8[%c0_24, %c0_25, %c0_26], %43 {strides = array<i32>} : memref<2x1x1xf32, #tpu.memory_space<vmem>>, vector<2x1x1xf32>,
    } else {
    }
    %c1_i32 = arith.constant 1 : i32
    %36 = arith.cmpi eq, %arg1, %c1_i32 : i32
    %37 = arith.extui %36 : i1 to i32
    %c0_i32_16 = arith.constant 0 : i32
    %38 = arith.cmpi ne, %37, %c0_i32_16 : i32
    scf.if %38 {
      %c0_17 = arith.constant 0 : index
      %c0_18 = arith.constant 0 : index
      %39 = vector.load %arg9[%c0_17, %c0_18] : memref<32x2048xf32, #tpu.memory_space<vmem>>, vector<32x2048xf32>
      %c0_19 = arith.constant 0 : index
      %c0_20 = arith.constant 0 : index
      %40 = vector.load %arg4[%c0_19, %c0_20] : memref<1x128xf32, #tpu.memory_space<vmem>>, vector<1x128xf32>
      %41 = vector.shape_cast %40 : vector<1x128xf32> to vector<1x1x128xf32>
      %c0_21 = arith.constant 0 : index
      %c0_22 = arith.constant 0 : index
      %42 = vector.load %arg5[%c0_21, %c0_22] : memref<1x128xf32, #tpu.memory_space<vmem>>, vector<1x128xf32>
      %43 = vector.shape_cast %42 : vector<1x128xf32> to vector<1x1x128xf32>
      %44 = vector.extract_strided_slice %39 {offsets = [0, 0], sizes = [16, 2048], strides = [1, 1]} : vector<32x2048xf32> to vector<16x2048xf32>
      %45 = vector.shape_cast %44 : vector<16x2048xf32> to vector<4x4x2048xf32>
      %cst_23 = arith.constant 0.000000e+00 : f32
      %46 = vector.broadcast %cst_23 : f32 to vector<1x5x512xf32>
      %c4 = arith.constant 4 : index
      %c0_24 = arith.constant 0 : index
      %c0_25 = arith.constant 0 : index
      %47 = vector.load %arg10[%c4, %c0_24, %c0_25] : memref<5x5x512xf32, #tpu.memory_space<vmem>>, vector<1x5x512xf32>
      tpu.vector_store %arg10[%c4, %c0_24, %c0_25], %46 {strides = array<i32>} : memref<5x5x512xf32, #tpu.memory_space<vmem>>, vector<1x5x512xf32>,
      %cst_26 = arith.constant 0.000000e+00 : f32
      %48 = vector.broadcast %cst_26 : f32 to vector<5x1x512xf32>
      %c0_27 = arith.constant 0 : index
      %c4_28 = arith.constant 4 : index
      %c0_29 = arith.constant 0 : index
      %49 = vector.load %arg10[%c0_27, %c4_28, %c0_29] : memref<5x5x512xf32, #tpu.memory_space<vmem>>, vector<5x1x512xf32>
      tpu.vector_store %arg10[%c0_27, %c4_28, %c0_29], %48 {strides = array<i32>} : memref<5x5x512xf32, #tpu.memory_space<vmem>>, vector<5x1x512xf32>,
      %50 = vector.extract_strided_slice %45 {offsets = [0, 0, 0], sizes = [4, 4, 512], strides = [1, 1, 1]} : vector<4x4x2048xf32> to vector<4x4x512xf32>
      %c0_30 = arith.constant 0 : index
      %c0_31 = arith.constant 0 : index
      %c0_32 = arith.constant 0 : index
      %51 = vector.load %arg10[%c0_30, %c0_31, %c0_32] : memref<5x5x512xf32, #tpu.memory_space<vmem>>, vector<4x4x512xf32>
      tpu.vector_store %arg10[%c0_30, %c0_31, %c0_32], %50 {strides = array<i32>} : memref<5x5x512xf32, #tpu.memory_space<vmem>>, vector<4x4x512xf32>,
      %c0_33 = arith.constant 0 : index
      %c1 = arith.constant 1 : index
      %c0_34 = arith.constant 0 : index
      %52 = vector.load %arg10[%c0_33, %c1, %c0_34] : memref<5x5x512xf32, #tpu.memory_space<vmem>>, vector<4x4x512xf32>
      %53 = vector.extract_strided_slice %45 {offsets = [0, 0, 512], sizes = [4, 4, 512], strides = [1, 1, 1]} : vector<4x4x2048xf32> to vector<4x4x512xf32>
      %54 = arith.addf %52, %53 : vector<4x4x512xf32>
      %c0_35 = arith.constant 0 : index
      %c1_36 = arith.constant 1 : index
      %c0_37 = arith.constant 0 : index
      %55 = vector.load %arg10[%c0_35, %c1_36, %c0_37] : memref<5x5x512xf32, #tpu.memory_space<vmem>>, vector<4x4x512xf32>
      tpu.vector_store %arg10[%c0_35, %c1_36, %c0_37], %54 {strides = array<i32>} : memref<5x5x512xf32, #tpu.memory_space<vmem>>, vector<4x4x512xf32>,
      %c1_38 = arith.constant 1 : index
      %c0_39 = arith.constant 0 : index
      %c0_40 = arith.constant 0 : index
      %56 = vector.load %arg10[%c1_38, %c0_39, %c0_40] : memref<5x5x512xf32, #tpu.memory_space<vmem>>, vector<4x4x512xf32>
      %57 = vector.extract_strided_slice %45 {offsets = [0, 0, 1024], sizes = [4, 4, 512], strides = [1, 1, 1]} : vector<4x4x2048xf32> to vector<4x4x512xf32>
      %58 = arith.addf %56, %57 : vector<4x4x512xf32>
      %c1_41 = arith.constant 1 : index
      %c0_42 = arith.constant 0 : index
      %c0_43 = arith.constant 0 : index
      %59 = vector.load %arg10[%c1_41, %c0_42, %c0_43] : memref<5x5x512xf32, #tpu.memory_space<vmem>>, vector<4x4x512xf32>
      tpu.vector_store %arg10[%c1_41, %c0_42, %c0_43], %58 {strides = array<i32>} : memref<5x5x512xf32, #tpu.memory_space<vmem>>, vector<4x4x512xf32>,
      %c1_44 = arith.constant 1 : index
      %c1_45 = arith.constant 1 : index
      %c0_46 = arith.constant 0 : index
      %60 = vector.load %arg10[%c1_44, %c1_45, %c0_46] : memref<5x5x512xf32, #tpu.memory_space<vmem>>, vector<4x4x512xf32>
      %61 = vector.extract_strided_slice %45 {offsets = [0, 0, 1536], sizes = [4, 4, 512], strides = [1, 1, 1]} : vector<4x4x2048xf32> to vector<4x4x512xf32>
      %62 = arith.addf %60, %61 : vector<4x4x512xf32>
      %c1_47 = arith.constant 1 : index
      %c1_48 = arith.constant 1 : index
      %c0_49 = arith.constant 0 : index
      %63 = vector.load %arg10[%c1_47, %c1_48, %c0_49] : memref<5x5x512xf32, #tpu.memory_space<vmem>>, vector<4x4x512xf32>
      tpu.vector_store %arg10[%c1_47, %c1_48, %c0_49], %62 {strides = array<i32>} : memref<5x5x512xf32, #tpu.memory_space<vmem>>, vector<4x4x512xf32>,
      %c0_50 = arith.constant 0 : index
      %c0_51 = arith.constant 0 : index
      %c0_52 = arith.constant 0 : index
      %64 = vector.load %arg10[%c0_50, %c0_51, %c0_52] : memref<5x5x512xf32, #tpu.memory_space<vmem>>, vector<4x4x128xf32>
      %65 = vector.broadcast %41 : vector<1x1x128xf32> to vector<4x4x128xf32>
      %66 = arith.mulf %64, %65 : vector<4x4x128xf32>
      %67 = vector.broadcast %43 : vector<1x1x128xf32> to vector<4x4x128xf32>
      %68 = arith.addf %66, %67 : vector<4x4x128xf32>
      %cst_53 = arith.constant 0.000000e+00 : f32
      %69 = vector.broadcast %cst_53 : f32 to vector<4x4x128xf32>
      %70 = arith.maximumf %68, %69 : vector<4x4x128xf32>
      %71 = arith.truncf %70 : vector<4x4x128xf32> to vector<4x4x128xbf16>
      %c0_54 = arith.constant 0 : index
      %c0_55 = arith.constant 0 : index
      %c0_56 = arith.constant 0 : index
      %c0_57 = arith.constant 0 : index
      %c0_58 = arith.constant 0 : index
      %72 = vector.load %arg7[%c0_54, %c0_55, %c0_56, %c0_57, %c0_58] : memref<2x4x2x4x256xbf16, #tpu.memory_space<vmem>>, vector<1x4x1x4x128xbf16>
      %73 = vector.shape_cast %72 : vector<1x4x1x4x128xbf16> to vector<4x4x128xbf16>
      %74 = vector.shape_cast %71 : vector<4x4x128xbf16> to vector<1x4x1x4x128xbf16>
      tpu.vector_store %arg7[%c0_54, %c0_55, %c0_56, %c0_57, %c0_58], %74 {strides = array<i32>} : memref<2x4x2x4x256xbf16, #tpu.memory_space<vmem>>, vector<1x4x1x4x128xbf16>,
      %c0_59 = arith.constant 0 : index
      %c1_60 = arith.constant 1 : index
      %c128 = arith.constant 128 : index
      %75 = vector.load %arg10[%c0_59, %c1_60, %c128] : memref<5x5x512xf32, #tpu.memory_space<vmem>>, vector<4x4x128xf32>
      %76 = vector.broadcast %41 : vector<1x1x128xf32> to vector<4x4x128xf32>
      %77 = arith.mulf %75, %76 : vector<4x4x128xf32>
      %78 = vector.broadcast %43 : vector<1x1x128xf32> to vector<4x4x128xf32>
      %79 = arith.addf %77, %78 : vector<4x4x128xf32>
      %cst_61 = arith.constant 0.000000e+00 : f32
      %80 = vector.broadcast %cst_61 : f32 to vector<4x4x128xf32>
      %81 = arith.maximumf %79, %80 : vector<4x4x128xf32>
      %82 = arith.truncf %81 : vector<4x4x128xf32> to vector<4x4x128xbf16>
      %c0_62 = arith.constant 0 : index
      %c0_63 = arith.constant 0 : index
      %c0_64 = arith.constant 0 : index
      %c0_65 = arith.constant 0 : index
      %c128_66 = arith.constant 128 : index
      %83 = vector.load %arg7[%c0_62, %c0_63, %c0_64, %c0_65, %c128_66] : memref<2x4x2x4x256xbf16, #tpu.memory_space<vmem>>, vector<1x4x1x4x128xbf16>
      %84 = vector.shape_cast %83 : vector<1x4x1x4x128xbf16> to vector<4x4x128xbf16>
      %85 = vector.shape_cast %82 : vector<4x4x128xbf16> to vector<1x4x1x4x128xbf16>
      tpu.vector_store %arg7[%c0_62, %c0_63, %c0_64, %c0_65, %c128_66], %85 {strides = array<i32>} : memref<2x4x2x4x256xbf16, #tpu.memory_space<vmem>>, vector<1x4x1x4x128xbf16>,
      %c1_67 = arith.constant 1 : index
      %c0_68 = arith.constant 0 : index
      %c256 = arith.constant 256 : index
      %86 = vector.load %arg10[%c1_67, %c0_68, %c256] : memref<5x5x512xf32, #tpu.memory_space<vmem>>, vector<4x4x128xf32>
      %87 = vector.broadcast %41 : vector<1x1x128xf32> to vector<4x4x128xf32>
      %88 = arith.mulf %86, %87 : vector<4x4x128xf32>
      %89 = vector.broadcast %43 : vector<1x1x128xf32> to vector<4x4x128xf32>
      %90 = arith.addf %88, %89 : vector<4x4x128xf32>
      %cst_69 = arith.constant 0.000000e+00 : f32
      %91 = vector.broadcast %cst_69 : f32 to vector<4x4x128xf32>
      %92 = arith.maximumf %90, %91 : vector<4x4x128xf32>
      %93 = arith.truncf %92 : vector<4x4x128xf32> to vector<4x4x128xbf16>
      %c0_70 = arith.constant 0 : index
      %c0_71 = arith.constant 0 : index
      %c1_72 = arith.constant 1 : index
      %c0_73 = arith.constant 0 : index
      %c0_74 = arith.constant 0 : index
      %94 = vector.load %arg7[%c0_70, %c0_71, %c1_72, %c0_73, %c0_74] : memref<2x4x2x4x256xbf16, #tpu.memory_space<vmem>>, vector<1x4x1x4x128xbf16>
      %95 = vector.shape_cast %94 : vector<1x4x1x4x128xbf16> to vector<4x4x128xbf16>
      %96 = vector.shape_cast %93 : vector<4x4x128xbf16> to vector<1x4x1x4x128xbf16>
      tpu.vector_store %arg7[%c0_70, %c0_71, %c1_72, %c0_73, %c0_74], %96 {strides = array<i32>} : memref<2x4x2x4x256xbf16, #tpu.memory_space<vmem>>, vector<1x4x1x4x128xbf16>,
      %c1_75 = arith.constant 1 : index
      %c1_76 = arith.constant 1 : index
      %c384 = arith.constant 384 : index
      %97 = vector.load %arg10[%c1_75, %c1_76, %c384] : memref<5x5x512xf32, #tpu.memory_space<vmem>>, vector<4x4x128xf32>
      %98 = vector.broadcast %41 : vector<1x1x128xf32> to vector<4x4x128xf32>
      %99 = arith.mulf %97, %98 : vector<4x4x128xf32>
      %100 = vector.broadcast %43 : vector<1x1x128xf32> to vector<4x4x128xf32>
      %101 = arith.addf %99, %100 : vector<4x4x128xf32>
      %cst_77 = arith.constant 0.000000e+00 : f32
      %102 = vector.broadcast %cst_77 : f32 to vector<4x4x128xf32>
      %103 = arith.maximumf %101, %102 : vector<4x4x128xf32>
      %104 = arith.truncf %103 : vector<4x4x128xf32> to vector<4x4x128xbf16>
      %c0_78 = arith.constant 0 : index
      %c0_79 = arith.constant 0 : index
      %c1_80 = arith.constant 1 : index
      %c0_81 = arith.constant 0 : index
      %c128_82 = arith.constant 128 : index
      %105 = vector.load %arg7[%c0_78, %c0_79, %c1_80, %c0_81, %c128_82] : memref<2x4x2x4x256xbf16, #tpu.memory_space<vmem>>, vector<1x4x1x4x128xbf16>
      %106 = vector.shape_cast %105 : vector<1x4x1x4x128xbf16> to vector<4x4x128xbf16>
      %107 = vector.shape_cast %104 : vector<4x4x128xbf16> to vector<1x4x1x4x128xbf16>
      tpu.vector_store %arg7[%c0_78, %c0_79, %c1_80, %c0_81, %c128_82], %107 {strides = array<i32>} : memref<2x4x2x4x256xbf16, #tpu.memory_space<vmem>>, vector<1x4x1x4x128xbf16>,
      %108 = vector.extract_strided_slice %39 {offsets = [16, 0], sizes = [16, 2048], strides = [1, 1]} : vector<32x2048xf32> to vector<16x2048xf32>
      %109 = vector.shape_cast %108 : vector<16x2048xf32> to vector<4x4x2048xf32>
      %cst_83 = arith.constant 0.000000e+00 : f32
      %110 = vector.broadcast %cst_83 : f32 to vector<1x5x512xf32>
      %c4_84 = arith.constant 4 : index
      %c0_85 = arith.constant 0 : index
      %c0_86 = arith.constant 0 : index
      %111 = vector.load %arg10[%c4_84, %c0_85, %c0_86] : memref<5x5x512xf32, #tpu.memory_space<vmem>>, vector<1x5x512xf32>
      tpu.vector_store %arg10[%c4_84, %c0_85, %c0_86], %110 {strides = array<i32>} : memref<5x5x512xf32, #tpu.memory_space<vmem>>, vector<1x5x512xf32>,
      %cst_87 = arith.constant 0.000000e+00 : f32
      %112 = vector.broadcast %cst_87 : f32 to vector<5x1x512xf32>
      %c0_88 = arith.constant 0 : index
      %c4_89 = arith.constant 4 : index
      %c0_90 = arith.constant 0 : index
      %113 = vector.load %arg10[%c0_88, %c4_89, %c0_90] : memref<5x5x512xf32, #tpu.memory_space<vmem>>, vector<5x1x512xf32>
      tpu.vector_store %arg10[%c0_88, %c4_89, %c0_90], %112 {strides = array<i32>} : memref<5x5x512xf32, #tpu.memory_space<vmem>>, vector<5x1x512xf32>,
      %114 = vector.extract_strided_slice %109 {offsets = [0, 0, 0], sizes = [4, 4, 512], strides = [1, 1, 1]} : vector<4x4x2048xf32> to vector<4x4x512xf32>
      %c0_91 = arith.constant 0 : index
      %c0_92 = arith.constant 0 : index
      %c0_93 = arith.constant 0 : index
      %115 = vector.load %arg10[%c0_91, %c0_92, %c0_93] : memref<5x5x512xf32, #tpu.memory_space<vmem>>, vector<4x4x512xf32>
      tpu.vector_store %arg10[%c0_91, %c0_92, %c0_93], %114 {strides = array<i32>} : memref<5x5x512xf32, #tpu.memory_space<vmem>>, vector<4x4x512xf32>,
      %c0_94 = arith.constant 0 : index
      %c1_95 = arith.constant 1 : index
      %c0_96 = arith.constant 0 : index
      %116 = vector.load %arg10[%c0_94, %c1_95, %c0_96] : memref<5x5x512xf32, #tpu.memory_space<vmem>>, vector<4x4x512xf32>
      %117 = vector.extract_strided_slice %109 {offsets = [0, 0, 512], sizes = [4, 4, 512], strides = [1, 1, 1]} : vector<4x4x2048xf32> to vector<4x4x512xf32>
      %118 = arith.addf %116, %117 : vector<4x4x512xf32>
      %c0_97 = arith.constant 0 : index
      %c1_98 = arith.constant 1 : index
      %c0_99 = arith.constant 0 : index
      %119 = vector.load %arg10[%c0_97, %c1_98, %c0_99] : memref<5x5x512xf32, #tpu.memory_space<vmem>>, vector<4x4x512xf32>
      tpu.vector_store %arg10[%c0_97, %c1_98, %c0_99], %118 {strides = array<i32>} : memref<5x5x512xf32, #tpu.memory_space<vmem>>, vector<4x4x512xf32>,
      %c1_100 = arith.constant 1 : index
      %c0_101 = arith.constant 0 : index
      %c0_102 = arith.constant 0 : index
      %120 = vector.load %arg10[%c1_100, %c0_101, %c0_102] : memref<5x5x512xf32, #tpu.memory_space<vmem>>, vector<4x4x512xf32>
      %121 = vector.extract_strided_slice %109 {offsets = [0, 0, 1024], sizes = [4, 4, 512], strides = [1, 1, 1]} : vector<4x4x2048xf32> to vector<4x4x512xf32>
      %122 = arith.addf %120, %121 : vector<4x4x512xf32>
      %c1_103 = arith.constant 1 : index
      %c0_104 = arith.constant 0 : index
      %c0_105 = arith.constant 0 : index
      %123 = vector.load %arg10[%c1_103, %c0_104, %c0_105] : memref<5x5x512xf32, #tpu.memory_space<vmem>>, vector<4x4x512xf32>
      tpu.vector_store %arg10[%c1_103, %c0_104, %c0_105], %122 {strides = array<i32>} : memref<5x5x512xf32, #tpu.memory_space<vmem>>, vector<4x4x512xf32>,
      %c1_106 = arith.constant 1 : index
      %c1_107 = arith.constant 1 : index
      %c0_108 = arith.constant 0 : index
      %124 = vector.load %arg10[%c1_106, %c1_107, %c0_108] : memref<5x5x512xf32, #tpu.memory_space<vmem>>, vector<4x4x512xf32>
      %125 = vector.extract_strided_slice %109 {offsets = [0, 0, 1536], sizes = [4, 4, 512], strides = [1, 1, 1]} : vector<4x4x2048xf32> to vector<4x4x512xf32>
      %126 = arith.addf %124, %125 : vector<4x4x512xf32>
      %c1_109 = arith.constant 1 : index
      %c1_110 = arith.constant 1 : index
      %c0_111 = arith.constant 0 : index
      %127 = vector.load %arg10[%c1_109, %c1_110, %c0_111] : memref<5x5x512xf32, #tpu.memory_space<vmem>>, vector<4x4x512xf32>
      tpu.vector_store %arg10[%c1_109, %c1_110, %c0_111], %126 {strides = array<i32>} : memref<5x5x512xf32, #tpu.memory_space<vmem>>, vector<4x4x512xf32>,
      %c0_112 = arith.constant 0 : index
      %c0_113 = arith.constant 0 : index
      %c0_114 = arith.constant 0 : index
      %128 = vector.load %arg10[%c0_112, %c0_113, %c0_114] : memref<5x5x512xf32, #tpu.memory_space<vmem>>, vector<4x4x128xf32>
      %129 = vector.broadcast %41 : vector<1x1x128xf32> to vector<4x4x128xf32>
      %130 = arith.mulf %128, %129 : vector<4x4x128xf32>
      %131 = vector.broadcast %43 : vector<1x1x128xf32> to vector<4x4x128xf32>
      %132 = arith.addf %130, %131 : vector<4x4x128xf32>
      %cst_115 = arith.constant 0.000000e+00 : f32
      %133 = vector.broadcast %cst_115 : f32 to vector<4x4x128xf32>
      %134 = arith.maximumf %132, %133 : vector<4x4x128xf32>
      %135 = arith.truncf %134 : vector<4x4x128xf32> to vector<4x4x128xbf16>
      %c1_116 = arith.constant 1 : index
      %c0_117 = arith.constant 0 : index
      %c0_118 = arith.constant 0 : index
      %c0_119 = arith.constant 0 : index
      %c0_120 = arith.constant 0 : index
      %136 = vector.load %arg7[%c1_116, %c0_117, %c0_118, %c0_119, %c0_120] : memref<2x4x2x4x256xbf16, #tpu.memory_space<vmem>>, vector<1x4x1x4x128xbf16>
      %137 = vector.shape_cast %136 : vector<1x4x1x4x128xbf16> to vector<4x4x128xbf16>
      %138 = vector.shape_cast %135 : vector<4x4x128xbf16> to vector<1x4x1x4x128xbf16>
      tpu.vector_store %arg7[%c1_116, %c0_117, %c0_118, %c0_119, %c0_120], %138 {strides = array<i32>} : memref<2x4x2x4x256xbf16, #tpu.memory_space<vmem>>, vector<1x4x1x4x128xbf16>,
      %c0_121 = arith.constant 0 : index
      %c1_122 = arith.constant 1 : index
      %c128_123 = arith.constant 128 : index
      %139 = vector.load %arg10[%c0_121, %c1_122, %c128_123] : memref<5x5x512xf32, #tpu.memory_space<vmem>>, vector<4x4x128xf32>
      %140 = vector.broadcast %41 : vector<1x1x128xf32> to vector<4x4x128xf32>
      %141 = arith.mulf %139, %140 : vector<4x4x128xf32>
      %142 = vector.broadcast %43 : vector<1x1x128xf32> to vector<4x4x128xf32>
      %143 = arith.addf %141, %142 : vector<4x4x128xf32>
      %cst_124 = arith.constant 0.000000e+00 : f32
      %144 = vector.broadcast %cst_124 : f32 to vector<4x4x128xf32>
      %145 = arith.maximumf %143, %144 : vector<4x4x128xf32>
      %146 = arith.truncf %145 : vector<4x4x128xf32> to vector<4x4x128xbf16>
      %c1_125 = arith.constant 1 : index
      %c0_126 = arith.constant 0 : index
      %c0_127 = arith.constant 0 : index
      %c0_128 = arith.constant 0 : index
      %c128_129 = arith.constant 128 : index
      %147 = vector.load %arg7[%c1_125, %c0_126, %c0_127, %c0_128, %c128_129] : memref<2x4x2x4x256xbf16, #tpu.memory_space<vmem>>, vector<1x4x1x4x128xbf16>
      %148 = vector.shape_cast %147 : vector<1x4x1x4x128xbf16> to vector<4x4x128xbf16>
      %149 = vector.shape_cast %146 : vector<4x4x128xbf16> to vector<1x4x1x4x128xbf16>
      tpu.vector_store %arg7[%c1_125, %c0_126, %c0_127, %c0_128, %c128_129], %149 {strides = array<i32>} : memref<2x4x2x4x256xbf16, #tpu.memory_space<vmem>>, vector<1x4x1x4x128xbf16>,
      %c1_130 = arith.constant 1 : index
      %c0_131 = arith.constant 0 : index
      %c256_132 = arith.constant 256 : index
      %150 = vector.load %arg10[%c1_130, %c0_131, %c256_132] : memref<5x5x512xf32, #tpu.memory_space<vmem>>, vector<4x4x128xf32>
      %151 = vector.broadcast %41 : vector<1x1x128xf32> to vector<4x4x128xf32>
      %152 = arith.mulf %150, %151 : vector<4x4x128xf32>
      %153 = vector.broadcast %43 : vector<1x1x128xf32> to vector<4x4x128xf32>
      %154 = arith.addf %152, %153 : vector<4x4x128xf32>
      %cst_133 = arith.constant 0.000000e+00 : f32
      %155 = vector.broadcast %cst_133 : f32 to vector<4x4x128xf32>
      %156 = arith.maximumf %154, %155 : vector<4x4x128xf32>
      %157 = arith.truncf %156 : vector<4x4x128xf32> to vector<4x4x128xbf16>
      %c1_134 = arith.constant 1 : index
      %c0_135 = arith.constant 0 : index
      %c1_136 = arith.constant 1 : index
      %c0_137 = arith.constant 0 : index
      %c0_138 = arith.constant 0 : index
      %158 = vector.load %arg7[%c1_134, %c0_135, %c1_136, %c0_137, %c0_138] : memref<2x4x2x4x256xbf16, #tpu.memory_space<vmem>>, vector<1x4x1x4x128xbf16>
      %159 = vector.shape_cast %158 : vector<1x4x1x4x128xbf16> to vector<4x4x128xbf16>
      %160 = vector.shape_cast %157 : vector<4x4x128xbf16> to vector<1x4x1x4x128xbf16>
      tpu.vector_store %arg7[%c1_134, %c0_135, %c1_136, %c0_137, %c0_138], %160 {strides = array<i32>} : memref<2x4x2x4x256xbf16, #tpu.memory_space<vmem>>, vector<1x4x1x4x128xbf16>,
      %c1_139 = arith.constant 1 : index
      %c1_140 = arith.constant 1 : index
      %c384_141 = arith.constant 384 : index
      %161 = vector.load %arg10[%c1_139, %c1_140, %c384_141] : memref<5x5x512xf32, #tpu.memory_space<vmem>>, vector<4x4x128xf32>
      %162 = vector.broadcast %41 : vector<1x1x128xf32> to vector<4x4x128xf32>
      %163 = arith.mulf %161, %162 : vector<4x4x128xf32>
      %164 = vector.broadcast %43 : vector<1x1x128xf32> to vector<4x4x128xf32>
      %165 = arith.addf %163, %164 : vector<4x4x128xf32>
      %cst_142 = arith.constant 0.000000e+00 : f32
      %166 = vector.broadcast %cst_142 : f32 to vector<4x4x128xf32>
      %167 = arith.maximumf %165, %166 : vector<4x4x128xf32>
      %168 = arith.truncf %167 : vector<4x4x128xf32> to vector<4x4x128xbf16>
      %c1_143 = arith.constant 1 : index
      %c0_144 = arith.constant 0 : index
      %c1_145 = arith.constant 1 : index
      %c0_146 = arith.constant 0 : index
      %c128_147 = arith.constant 128 : index
      %169 = vector.load %arg7[%c1_143, %c0_144, %c1_145, %c0_146, %c128_147] : memref<2x4x2x4x256xbf16, #tpu.memory_space<vmem>>, vector<1x4x1x4x128xbf16>
      %170 = vector.shape_cast %169 : vector<1x4x1x4x128xbf16> to vector<4x4x128xbf16>
      %171 = vector.shape_cast %168 : vector<4x4x128xbf16> to vector<1x4x1x4x128xbf16>
      tpu.vector_store %arg7[%c1_143, %c0_144, %c1_145, %c0_146, %c128_147], %171 {strides = array<i32>} : memref<2x4x2x4x256xbf16, #tpu.memory_space<vmem>>, vector<1x4x1x4x128xbf16>,
    } else {
    }
    return
  }
  func.func @transform_0(%arg0: i32, %arg1: i32) -> (i32, i32, i32) {
    %c0_i32 = arith.constant 0 : i32
    %c0_i32_0 = arith.constant 0 : i32
    return %arg0, %c0_i32, %arg1 : i32, i32, i32
  }
  func.func @transform_1(%arg0: i32, %arg1: i32) -> (i32, i32) {
    %c0_i32 = arith.constant 0 : i32
    %c0_i32_0 = arith.constant 0 : i32
    return %arg1, %c0_i32 : i32, i32
  }
  func.func @transform_2(%arg0: i32, %arg1: i32) -> (i32, i32) {
    %c0_i32 = arith.constant 0 : i32
    %c0_i32_0 = arith.constant 0 : i32
    %c0_i32_1 = arith.constant 0 : i32
    return %c0_i32, %c0_i32_0 : i32, i32
  }
  func.func @transform_3(%arg0: i32, %arg1: i32) -> (i32, i32) {
    %c0_i32 = arith.constant 0 : i32
    %c0_i32_0 = arith.constant 0 : i32
    %c0_i32_1 = arith.constant 0 : i32
    return %c0_i32, %c0_i32_0 : i32, i32
  }
  func.func @transform_4(%arg0: i32, %arg1: i32) -> (i32, i32) {
    %c0_i32 = arith.constant 0 : i32
    %c0_i32_0 = arith.constant 0 : i32
    return %c0_i32, %arg1 : i32, i32
  }
  func.func @transform_5(%arg0: i32, %arg1: i32) -> (i32, i32, i32, i32, i32) {
    %c0_i32 = arith.constant 0 : i32
    %c0_i32_0 = arith.constant 0 : i32
    %c0_i32_1 = arith.constant 0 : i32
    %c0_i32_2 = arith.constant 0 : i32
    %c0_i32_3 = arith.constant 0 : i32
    return %arg0, %c0_i32, %c0_i32_0, %c0_i32_1, %c0_i32_2 : i32, i32, i32, i32, i32
  }
  func.func @transform_6(%arg0: i32, %arg1: i32) -> (i32, i32, i32) {
    %c0_i32 = arith.constant 0 : i32
    %c0_i32_0 = arith.constant 0 : i32
    %c0_i32_1 = arith.constant 0 : i32
    return %arg0, %c0_i32, %c0_i32_0 : i32, i32, i32
  }
}

</mosaic_0001>

<bundles_post_ra>
// kernel: tpu_custom_call.1
= control target key start
LH: loop header
LB: loop body
LE: loop exit
PB: predicated region body
PF: predicated region fallthrough
CT: control target
= control target key end

     0   :  { %12 = vsyncpa [#allocation5], 0  ;;  %s5292_s0 = inlined_call_operand.hbm [shape: bf16[2,16,256], index: 0, kind: input, shape index: {}]   ;;  %s5293_s1 = inlined_call_operand.hbm [shape: bf16[256,2048], index: 1, kind: input, shape index: {}]   ;;  %s5294_s2 = inlined_call_operand.vmem [shape: f32[1,128], index: 2, kind: input, shape index: {}]   ;;  %s5295_s3 = inlined_call_operand.vmem [shape: f32[1,128], index: 3, kind: input, shape index: {}]   ;;  %s5296_s4 = inlined_call_operand.vmem [shape: f32[1,256], index: 4, kind: input, shape index: {}]   ;;  %s5297_s5 = inlined_call_operand.hbm [shape: bf16[2,4,2,4,256], index: 5, kind: output, shape index: {0}]   ;;  %s5298_s6 = inlined_call_operand.vmem [shape: f32[2,1,1], index: 6, kind: output, shape index: {1}]  }
   0x1   :  { %14 = vsyncpa [#allocation5 + $0x1], 0 }
   0x2   :  { %15 = vsyncpa [#allocation8], 0 }
   0x3   :  { %17 = vsyncpa [#allocation8 + $0x1], 0 }
   0x4   :  { %18 = vsyncpa [#allocation6], 0  ;;  %s4016_s21 = smov 0   ;;  %s4018_s22 = smov 0  }
   0x5   :  { %s4020_s23 = smov 0   ;;  %s4022_s24 = smov 0  }
   0x6   :  { %s4024_s25 = smov 0   ;;  %s4026_s26 = smov 0  }
   0x7 LB: > { %s5299_s27 = sadd.s32 4294967295, %s3967_s26   ;;  %s33_s28 = sadd.s32 1, %s3963_s25  ;;  %s3967_s26 = sphi %s4026_s26, %s24_s26   ;;  %s3963_s25 = sphi %s4024_s25, %s5368_s25   ;;  %s3959_s24 = sphi %s4022_s24, %s5367_s24   ;;  %s3955_s23 = sphi %s4020_s23, %s5366_s23   ;;  %s3951_s22 = sphi %s4018_s22, %s5365_s22   ;;  %s3947_s21 = sphi %s4016_s21, %s5364_s21  }
   0x8   : > { %p34_p0 = scmp.ge.s32.totalorder %s33_s28, 2  ;;  %s45_s29 = sadd.s32 1, %s3955_s23 }
   0x9   : > { %p52_p1 = scmp.ne.s32.totalorder %s3955_s23, %s3951_s22  ;;  %p53_p2 = scmp.eq.s32.totalorder %s3967_s26, 0 }
   0xa   : > { %s5370_s28 = smov (%p34_p0, %s33_s28), 0  ;;  %p58_p4 = scmp.ne.s32.totalorder %s3951_s22, %s3947_s21 }
   0xb   : > { %p4052_p3 = por %p53_p2, %p52_p1  ;;  %s41_s7 = ssub.s32 %s3963_s25, %s5370_s28 }
   0xc   : > { %p59_p5 = scmp.eq.s32.totalorder %s5299_s27, 0  ;;  %p43_p6 = scmp.eq.s32.totalorder %s41_s7, 0 }
   0xd   : > { %p3652_p8 = scmp.lt.s32.totalorder %s3967_s26, 2  ;;  %s4070_s10 = sand.u32 1, %s3955_s23  }
   0xe   : > { %p4061_p7 = por %p59_p5, %p58_p4  ;;  %s3417_s11 = sshll.u32 %s3963_s25, 6 }
   0xf   : > { %s4067_s9 = scalar_select %p43_p6, %s3955_s23, %s45_s29  }
  0x10   : > { %s5317_s8 = scalar_select %p4061_p7, 1, 0 }
  0x11   : > { %s3416_s12 = sshll.u32 %s4070_s10, 4  ;;  %s4077_s15 = scalar_lea.hbm %s5292_s0, %s3417_s11 }
  0x12   : > { %s238_s16 = scalar_lea.vmem [#allocation4], %s3416_s12  ;;  %p4081_p9 = pnand %p3652_p8, %p4052_p3 }
  0x13   : > { %s247_s17 = sshll.u32 %s238_s16, 4  ;;  %s235_s19 = scalar_lea.sflag [#allocation5], %s4070_s10  ;;  %s4085_s17 = int_to_ptr.vmem [resolvable:$true] %s247_s17 }
  0x14   : > { %s3823_s20 = scalar_lea.hbm %s4077_s15, 256  ;;  %p3825_p12 = pneg %p4081_p9 }
  0x15   : > { %p3824_p11 = scmp.ne.s32.totalorder %s4077_s15, %s3823_s20  ;;  %s3828_s30 = scalar_lea.hbm %s5292_s0, 512 }
  0x16   : > { %p3829_p1 = scmp.lt.u32.totalorder %s4077_s15, %s5292_s0  ;;  %p3830_p2 = scmp.lt.u32.totalorder %s3828_s30, %s3823_s20 }
  0x17   : > { %p3826_p13 = pnand %p3825_p12, %p3824_p11  ;;  %p3832_p4 = scmp.lt.u32.totalorder %s3823_s20, %s4077_s15 }
  0x18   : > { %p3831_p3 = por %p3830_p2, %p3829_p1 }
  0x19   : > { %p3827_p0 = pneg %p3826_p13 }
  0x1a   : > { %p3833_p5 = por %p3832_p4, %p3831_p3 }
  0x1c   : > { %p3834_p6 = pnand %p3833_p5, %p3827_p0 }
  0x1e   : > { %3837 = shalt.err (!%p3834_p6)
}
  0x1f   : > { %s3838_s12 = scalar_lea.vmem %s4085_s17, 256  ;;  %s3969_s13 = smov [#allocation4]  }
  0x20   : > { %p3839_p8 = scmp.ne.s32.totalorder %s4085_s17, %s3838_s12  ;;  %s3843_s14 = sshll.u32 %s3969_s13, 4  ;;  %s3844_s14 = int_to_ptr.vmem [resolvable:$false] %s3843_s14 }
  0x21   : > { %s3845_s16 = scalar_lea.vmem %s3844_s14, 512  ;;  %p3846_p10 = scmp.lt.s32.totalorder %s4085_s17, %s3844_s14 }
  0x22   : > { %p3841_p11 = pnand %p3839_p8, %p3825_p12  ;;  %p3847_p1 = scmp.lt.s32.totalorder %s3845_s16, %s3838_s12 }
  0x24   : > { %p3842_p13 = pneg %p3841_p11  ;;  %p3848_p2 = por %p3847_p1, %p3846_p10 }
  0x26   : > { %p3849_p3 = pnand %p3848_p2, %p3842_p13 }
  0x28   : > { %3852 = shalt.err (!%p3849_p3)
}
  0x29   : > { %s3970_s20 = smov 128   ;;  %s3971_s21 = smov 64  }
  0x2a   : > { %s3972_s29 = smov 4   ;;  %p283_p10 = scmp.lt.s32.totalorder %s3967_s26, 3 }
  0x2b   : > { %3648 = dma.hbm_to_vmem [thread:$0]  (!%p4081_p9), %s4077_s15, 256, %s4085_s17, %s235_s19, %s3970_s20, %s3971_s21, %s3972_s29  }
  0x2c   : > { %s3418_s30 = sshll.u32 %s4070_s10, 10  ;;  %s3632_s7 = sshll.u32 %s3963_s25, 14 }
  0x2d   : > { %p5319_p0 = scmp.ge.s32.totalorder %s3967_s26, 1  ;;  %s4129_s14 = scalar_lea.hbm %s5293_s1, %s3632_s7 }
  0x2e   : > { %s261_s16 = scalar_lea.vmem [#allocation7], %s3418_s30  ;;  %s258_s15 = scalar_lea.sflag [#allocation8], %s4070_s10 }
  0x2f   : > { %p4122_p4 = pnand %p5319_p0, %p283_p10  ;;  %s269_s27 = sshll.u32 %s261_s16, 4  ;;  %s4131_s27 = int_to_ptr.vmem [resolvable:$true] %s269_s27 }
  0x30   : > { %s3853_s17 = scalar_lea.hbm %s4129_s14, 16384  ;;  %s3858_s29 = scalar_lea.hbm %s5293_s1, 32768 }
  0x31   : > { %p3854_p5 = scmp.ne.s32.totalorder %s4129_s14, %s3853_s17  ;;  %p3859_p11 = scmp.lt.u32.totalorder %s4129_s14, %s5293_s1 }
  0x32   : > { %p3860_p13 = scmp.lt.u32.totalorder %s3858_s29, %s3853_s17  ;;  %p3862_p2 = scmp.lt.u32.totalorder %s3853_s17, %s4129_s14 }
  0x33   : > { %p3856_p6 = pnand %p3854_p5, %p3825_p12 }
  0x34   : > { %p3861_p1 = por %p3860_p13, %p3859_p11 }
  0x35   : > { %p3857_p8 = pneg %p3856_p6 }
  0x36   : > { %p3863_p3 = por %p3862_p2, %p3861_p1 }
  0x38   : > { %p3864_p10 = pnand %p3863_p3, %p3857_p8 }
  0x3a   : > { %3867 = shalt.err (!%p3864_p10)
}
  0x3b   : > { %s3868_s30 = scalar_lea.vmem %s4131_s27, 16384  ;;  %s3973_s13 = smov [#allocation7]  }
  0x3c   : > { %p3869_p0 = scmp.ne.s32.totalorder %s4131_s27, %s3868_s30  ;;  %s3873_s16 = sshll.u32 %s3973_s13, 4  ;;  %s3874_s16 = int_to_ptr.vmem [resolvable:$false] %s3873_s16 }
  0x3d   : > { %s3875_s19 = scalar_lea.vmem %s3874_s16, 32768  ;;  %p3876_p7 = scmp.lt.s32.totalorder %s4131_s27, %s3874_s16 }
  0x3e   : > { %p3871_p5 = pnand %p3869_p0, %p3825_p12  ;;  %p3877_p11 = scmp.lt.s32.totalorder %s3875_s19, %s3868_s30 }
  0x40   : > { %p3872_p6 = pneg %p3871_p5  ;;  %p3878_p13 = por %p3877_p11, %p3876_p7 }
  0x42   : > { %p3879_p1 = pnand %p3878_p13, %p3872_p6 }
  0x44   : > { %3882 = shalt.err (!%p3879_p1)
}
  0x45   : > { %s3974_s17 = smov 1024   ;;  %287 = sbr.rel (%p4122_p4) target bundleno = 695 (0x2b7), region = 40 }
  0x46   : > { %3651 = dma.hbm_to_vmem [thread:$0]  (!%p4081_p9), %s4129_s14, 16384, %s4131_s27, %s258_s15, %s3974_s17, %s3974_s17, %s3971_s21  }
  0x4c   : > { %s289_s20 = sand.u32 1, %s3951_s22   ;;  %p5321_p7 = scmp.ne.s32.totalorder %s5317_s8, 0 }
  0x4d   : > { %s3423_s29 = sshll.u32 %s289_s20, 4  ;;  %s290_s7 = scalar_lea.sflag [#allocation5], %s289_s20 }
  0x4e   : > { %s4163_s12 = scalar_lea.vmem [#allocation4], %s3423_s29 }
  0x4f   : > { %3934 = dma.done.wait (%p5321_p7), %s290_s7, 256  }
  0x50   : > { %3936 = vsyncadd (%p5321_p7), %s290_s7, 4294967040  ;;  %s3424_s10 = sshll.u32 %s289_s20, 10  ;;  %s299_s18 = scalar_lea.sflag [#allocation8], %s289_s20 }
  0x51   : > { %s4169_s30 = scalar_lea.vmem [#allocation7], %s3424_s10 }
  0x52   : > { %3938 = dma.done.wait (%p5321_p7), %s299_s18, 16384  }
  0x53   : > { %3940 = vsyncadd (%p5321_p7), %s299_s18, 4294950912  ;;  %v3975_v0 = vmov 0   ;;  %v354_v1 = vld [vmem:[%s4169_s30] sm:$0xff]  ;;  %v355_v3 = vld [vmem:[%s4169_s30 + $0x8] sm:$0xff]  ;;  %p340_p9 = scmp.lt.s32.totalorder %s3959_s24, 1  ;;  %p3556_p12 = scmp.ne.s32.totalorder %s3959_s24, 0 }
  0x54   : > { %1166 = vmatprep.mubr.bf16.mxu0 %v3975_v0  ;;  %1219 = vmatprep.mubr.bf16.mxu1 %v3975_v0  ;;  %v362_v2 = vld [vmem:[%s4169_s30 + $0x40] sm:$0xff]  ;;  %v363_v5 = vld [vmem:[%s4169_s30 + $0x48] sm:$0xff]  ;;  %v356_v63 = vld [vmem:[%s4169_s30 + $0x10] sm:$0xff]  ;;  %vm1663_vm0 = vcmask (!%p3556_p12), 0  }
  0x55   : > { %v3428_v4 = vcombine.high %v354_v1, %v362_v2  ;;  %v3427_v6 = vcombine.low %v354_v1, %v362_v2  ;;  %v370_v7 = vld [vmem:[%s4169_s30 + $0x80] sm:$0xff]  ;;  %v3430_v9 = vcombine.high %v355_v3, %v363_v5  ;;  %v3429_v10 = vcombine.low %v355_v3, %v363_v5  ;;  %v371_v12 = vld [vmem:[%s4169_s30 + $0x88] sm:$0xff]  ;;  %v364_v1 = vld [vmem:[%s4169_s30 + $0x50] sm:$0xff]  ;;  %s4233_s27 = scalar_select %p340_p9, %s3959_s24, 1 }
  0x56   : > { %v378_v8 = vld [vmem:[%s4169_s30 + $0xc0] sm:$0xff]  ;;  %v379_v13 = vld [vmem:[%s4169_s30 + $0xc8] sm:$0xff]  ;;  %v357_v2 = vld [vmem:[%s4169_s30 + $0x18] sm:$0xff] }
  0x57   : > { %v3444_v11 = vcombine.high %v370_v7, %v378_v8  ;;  %v386_v14 = vld [vmem:[%s4169_s30 + $0x100] sm:$0xff]  ;;  %1134 = vmatprep.subr.bf16.mxu0 %v3428_v4  ;;  %v3446_v15 = vcombine.high %v371_v12, %v379_v13  ;;  %v387_v17 = vld [vmem:[%s4169_s30 + $0x108] sm:$0xff]  ;;  %1187 = vmatprep.subr.bf16.mxu1 %v3430_v9  ;;  %v3443_v19 = vcombine.low %v370_v7, %v378_v8  ;;  %v365_v3 = vld [vmem:[%s4169_s30 + $0x58] sm:$0xff]  ;;  %s342_s11 = scalar_lea.vmem %s5296_s4, %s4233_s27 }
  0x58   : > { %v394_v16 = vld [vmem:[%s4169_s30 + $0x140] sm:$0xff]  ;;  %v395_v18 = vld [vmem:[%s4169_s30 + $0x148] sm:$0xff]  ;;  %1135 = vmatpush1.bf16.msra.mxu0 %v3427_v6  ;;  %1188 = vmatpush1.bf16.msra.mxu1 %v3429_v10  ;;  %v3445_v20 = vcombine.low %v371_v12, %v379_v13  ;;  %v3432_v7 = vcombine.high %v356_v63, %v364_v1  ;;  %v3434_v8 = vcombine.high %v357_v2, %v365_v3  ;;  %v372_v9 = vld [vmem:[%s4169_s30 + $0x90] sm:$0xff] }
  0x59   : > { %1136 = vmatprep.subr.bf16.mxu0 %v3444_v11  ;;  %v3460_v21 = vcombine.high %v386_v14, %v394_v16  ;;  %1189 = vmatprep.subr.bf16.mxu1 %v3446_v15  ;;  %v3462_v22 = vcombine.high %v387_v17, %v395_v18  ;;  %v402_v23 = vld [vmem:[%s4169_s30 + $0x180] sm:$0xff]  ;;  %v403_v25 = vld [vmem:[%s4169_s30 + $0x188] sm:$0xff]  ;;  %v3459_v27 = vcombine.low %v386_v14, %v394_v16  ;;  %v380_v10 = vld [vmem:[%s4169_s30 + $0xd0] sm:$0xff] }
  0x5a   : > { %v410_v24 = vld [vmem:[%s4169_s30 + $0x1c0] sm:$0xff]  ;;  %v411_v26 = vld [vmem:[%s4169_s30 + $0x1c8] sm:$0xff]  ;;  %v3461_v28 = vcombine.low %v387_v17, %v395_v18  ;;  %v373_v11 = vld [vmem:[%s4169_s30 + $0x98] sm:$0xff]  ;;  %v3431_v13 = vcombine.low %v356_v63, %v364_v1  ;;  %v3433_v14 = vcombine.low %v357_v2, %v365_v3  ;;  %v3448_v15 = vcombine.high %v372_v9, %v380_v10 }
  0x5b   : > { %v3476_v29 = vcombine.high %v402_v23, %v410_v24  ;;  %v3478_v30 = vcombine.high %v403_v25, %v411_v26  ;;  %v418_v31 = vld [vmem:[%s4169_s30 + $0x200] sm:$0xff]  ;;  %v419_v33 = vld [vmem:[%s4169_s30 + $0x208] sm:$0xff]  ;;  %v3475_v35 = vcombine.low %v402_v23, %v410_v24  ;;  %v3477_v36 = vcombine.low %v403_v25, %v411_v26  ;;  %v381_v12 = vld [vmem:[%s4169_s30 + $0xd8] sm:$0xff] }
  0x5c   : > { %1137 = vmatpush1.bf16.msra.mxu0 %v3443_v19  ;;  %1190 = vmatpush1.bf16.msra.mxu1 %v3445_v20  ;;  %v426_v32 = vld [vmem:[%s4169_s30 + $0x240] sm:$0xff]  ;;  %v427_v34 = vld [vmem:[%s4169_s30 + $0x248] sm:$0xff]  ;;  %v3450_v16 = vcombine.high %v373_v11, %v381_v12  ;;  %v388_v17 = vld [vmem:[%s4169_s30 + $0x110] sm:$0xff]  ;;  %v3449_v23 = vcombine.low %v373_v11, %v381_v12 }
  0x5d   : > { %1138 = vmatprep.subr.bf16.mxu0 %v3460_v21  ;;  %1191 = vmatprep.subr.bf16.mxu1 %v3462_v22  ;;  %v3492_v37 = vcombine.high %v418_v31, %v426_v32  ;;  %v3494_v38 = vcombine.high %v419_v33, %v427_v34  ;;  %v434_v39 = vld [vmem:[%s4169_s30 + $0x280] sm:$0xff]  ;;  %v435_v41 = vld [vmem:[%s4169_s30 + $0x288] sm:$0xff]  ;;  %v3491_v43 = vcombine.low %v418_v31, %v426_v32  ;;  %v396_v18 = vld [vmem:[%s4169_s30 + $0x150] sm:$0xff] }
  0x5e   : > { %v442_v40 = vld [vmem:[%s4169_s30 + $0x2c0] sm:$0xff]  ;;  %v443_v42 = vld [vmem:[%s4169_s30 + $0x2c8] sm:$0xff]  ;;  %v3493_v44 = vcombine.low %v419_v33, %v427_v34  ;;  %v389_v19 = vld [vmem:[%s4169_s30 + $0x118] sm:$0xff]  ;;  %v3447_v21 = vcombine.low %v372_v9, %v380_v10  ;;  %v3464_v24 = vcombine.high %v388_v17, %v396_v18 }
  0x5f   : > { %v3508_v45 = vcombine.high %v434_v39, %v442_v40  ;;  %v3510_v46 = vcombine.high %v435_v41, %v443_v42  ;;  %v450_v47 = vld [vmem:[%s4169_s30 + $0x300] sm:$0xff]  ;;  %v451_v49 = vld [vmem:[%s4169_s30 + $0x308] sm:$0xff]  ;;  %v3507_v51 = vcombine.low %v434_v39, %v442_v40  ;;  %v3509_v52 = vcombine.low %v435_v41, %v443_v42  ;;  %v397_v20 = vld [vmem:[%s4169_s30 + $0x158] sm:$0xff] }
  0x60   : > { %1139 = vmatpush1.bf16.msra.mxu0 %v3459_v27  ;;  %1192 = vmatpush1.bf16.msra.mxu1 %v3461_v28  ;;  %v458_v48 = vld [vmem:[%s4169_s30 + $0x340] sm:$0xff]  ;;  %v459_v50 = vld [vmem:[%s4169_s30 + $0x348] sm:$0xff]  ;;  %v3466_v25 = vcombine.high %v389_v19, %v397_v20  ;;  %v404_v26 = vld [vmem:[%s4169_s30 + $0x190] sm:$0xff]  ;;  %v3465_v32 = vcombine.low %v389_v19, %v397_v20 }
  0x61   : > { %1140 = vmatprep.subr.bf16.mxu0 %v3476_v29  ;;  %1193 = vmatprep.subr.bf16.mxu1 %v3478_v30  ;;  %v3524_v53 = vcombine.high %v450_v47, %v458_v48  ;;  %v3526_v54 = vcombine.high %v451_v49, %v459_v50  ;;  %v466_v55 = vld [vmem:[%s4169_s30 + $0x380] sm:$0xff]  ;;  %v467_v57 = vld [vmem:[%s4169_s30 + $0x388] sm:$0xff]  ;;  %v3523_v59 = vcombine.low %v450_v47, %v458_v48  ;;  %v412_v27 = vld [vmem:[%s4169_s30 + $0x1d0] sm:$0xff] }
  0x62   : > { %v474_v56 = vld [vmem:[%s4169_s30 + $0x3c0] sm:$0xff]  ;;  %v475_v58 = vld [vmem:[%s4169_s30 + $0x3c8] sm:$0xff]  ;;  %v3525_v60 = vcombine.low %v451_v49, %v459_v50  ;;  %v405_v28 = vld [vmem:[%s4169_s30 + $0x198] sm:$0xff]  ;;  %v3463_v30 = vcombine.low %v388_v17, %v396_v18  ;;  %v3480_v33 = vcombine.high %v404_v26, %v412_v27 }
  0x63   : > { %v3540_v61 = vcombine.high %v466_v55, %v474_v56  ;;  %v3542_v62 = vcombine.high %v467_v57, %v475_v58  ;;  %v3539_v4 = vcombine.low %v466_v55, %v474_v56  ;;  %v4214_v5 = vld [vmem:[%s4163_s12] sm:$0xff]   ;;  %v3541_v6 = vcombine.low %v467_v57, %v475_v58  ;;  %v4228_v22 = vld [vmem:[%s4163_s12 + $0x8] sm:$0xff]  }
  0x64   : > { %1141 = vmatpush1.bf16.msra.mxu0 %v3475_v35  ;;  %1194 = vmatpush1.bf16.msra.mxu1 %v3477_v36  ;;  %v413_v29 = vld [vmem:[%s4169_s30 + $0x1d8] sm:$0xff]  ;;  %v1558_v31 = vunpack.c.l.bf16 %v4214_v5  ;;  %v1559_v34 = vunpack.c.h.bf16 %v4214_v5  ;;  %v420_v36 = vld [vmem:[%s4169_s30 + $0x210] sm:$0xff]  ;;  %v1581_v39 = vunpack.c.h.bf16 %v4228_v22  ;;  %v3555_v42 = vld [vmem:[%s342_s11] ss:$0 sm:$0xff] }
  0x65   : > { %1142 = vmatprep.subr.bf16.mxu0 %v3492_v37  ;;  %1195 = vmatprep.subr.bf16.mxu1 %v3494_v38  ;;  %v3482_v35 = vcombine.high %v405_v28, %v413_v29  ;;  %v428_v37 = vld [vmem:[%s4169_s30 + $0x250] sm:$0xff]  ;;  %v1580_v38 = vunpack.c.l.bf16 %v4228_v22  ;;  %v421_v40 = vld [vmem:[%s4169_s30 + $0x218] sm:$0xff]  ;;  %v359_v17 = vld [vmem:[%s4169_s30 + $0x28] sm:$0xff] }
  0x66   : > { %v429_v41 = vld [vmem:[%s4169_s30 + $0x258] sm:$0xff]  ;;  %v1568_v47 = vmul.f32 %v3555_v42, %v1559_v34  ;;  %v436_v49 = vld [vmem:[%s4169_s30 + $0x290] sm:$0xff]  ;;  %v3495_v56 = vcombine.low %v420_v36, %v428_v37  ;;  %v367_v18 = vld [vmem:[%s4169_s30 + $0x68] sm:$0xff] }
  0x67   : > { %v3498_v48 = vcombine.high %v421_v40, %v429_v41  ;;  %v444_v50 = vld [vmem:[%s4169_s30 + $0x2d0] sm:$0xff]  ;;  %v3497_v57 = vcombine.low %v421_v40, %v429_v41  ;;  %v453_v63 = vld [vmem:[%s4169_s30 + $0x318] sm:$0xff]  ;;  %v391_v34 = vld [vmem:[%s4169_s30 + $0x128] sm:$0xff] }
  0x68   : > { %1143 = vmatpush1.bf16.msra.mxu0 %v3491_v43  ;;  %1196 = vmatpush1.bf16.msra.mxu1 %v3493_v44  ;;  %v3479_v43 = vcombine.low %v404_v26, %v412_v27  ;;  %v1567_v44 = vmul.f32 %v3555_v42, %v1558_v31  ;;  %v3512_v58 = vcombine.high %v436_v49, %v444_v50  ;;  %v461_v1 = vld [vmem:[%s4169_s30 + $0x358] sm:$0xff]  ;;  %v375_v26 = vld [vmem:[%s4169_s30 + $0xa8] sm:$0xff]  ;;  %v406_v40 = vld [vmem:[%s4169_s30 + $0x1a0] sm:$0xff] }
  0x69   : > { %1144 = vmatprep.subr.bf16.mxu0 %v3508_v45  ;;  %1197 = vmatprep.subr.bf16.mxu1 %v3510_v46  ;;  %v3481_v45 = vcombine.low %v405_v28, %v413_v29  ;;  %v3496_v46 = vcombine.high %v420_v36, %v428_v37  ;;  %v3511_v2 = vcombine.low %v436_v49, %v444_v50  ;;  %v469_v9 = vld [vmem:[%s4169_s30 + $0x398] sm:$0xff]  ;;  %v383_v27 = vld [vmem:[%s4169_s30 + $0xe8] sm:$0xff]  ;;  %v414_v41 = vld [vmem:[%s4169_s30 + $0x1e0] sm:$0xff] }
  0x6a   : > { %v1569_v55 = vadd.f32 %v1568_v47, %v1567_v44  ;;  %v477_v10 = vld [vmem:[%s4169_s30 + $0x3d8] sm:$0xff]  ;;  %v3529_v12 = vcombine.low %v453_v63, %v461_v1  ;;  %v3437_v29 = vcombine.low %v359_v17, %v367_v18  ;;  %v3454_v31 = vcombine.high %v375_v26, %v383_v27  ;;  %v430_v49 = vld [vmem:[%s4169_s30 + $0x260] sm:$0xff]  ;;  %v423_v50 = vld [vmem:[%s4169_s30 + $0x228] sm:$0xff] }
  0x6b   : > { %v3545_v20 = vcombine.low %v469_v9, %v477_v10  ;;  %v3453_v37 = vcombine.low %v375_v26, %v383_v27  ;;  %v376_v27 = vld [vmem:[%s4169_s30 + $0xb0] sm:$0xff] }
  0x6c   : > { %1145 = vmatpush1.bf16.msra.mxu0 %v3507_v51  ;;  %1198 = vmatpush1.bf16.msra.mxu1 %v3509_v52  ;;  %v1582_v51 = vmul.f32 %v3555_v42, %v1580_v38  ;;  %v1583_v52 = vmul.f32 %v3555_v42, %v1581_v39  ;;  %v407_v42 = vld [vmem:[%s4169_s30 + $0x1a8] sm:$0xff] }
  0x6d   : > { %1146 = vmatprep.subr.bf16.mxu0 %v3524_v53  ;;  %1199 = vmatprep.subr.bf16.mxu1 %v3526_v54  ;;  %v437_v53 = vld [vmem:[%s4169_s30 + $0x298] sm:$0xff] }
  0x6e   : > { %v445_v54 = vld [vmem:[%s4169_s30 + $0x2d8] sm:$0xff]  ;;  %1570 = vadd.xlane.f32.xlu0 %v1569_v55 }
  0x6f   : > { %v3513_v3 = vcombine.low %v437_v53, %v445_v54 }
  0x70   : > { %1147 = vmatpush1.bf16.msra.mxu0 %v3523_v59  ;;  %1200 = vmatpush1.bf16.msra.mxu1 %v3525_v60  ;;  %v3514_v59 = vcombine.high %v437_v53, %v445_v54  ;;  %v452_v60 = vld [vmem:[%s4169_s30 + $0x310] sm:$0xff] }
  0x71   : > { %1148 = vmatprep.subr.bf16.mxu0 %v3540_v61  ;;  %1201 = vmatprep.subr.bf16.mxu1 %v3542_v62  ;;  %v460_v61 = vld [vmem:[%s4169_s30 + $0x350] sm:$0xff]  ;;  %v1584_v62 = vadd.f32 %v1583_v52, %v1582_v51  ;;  %v431_v51 = vld [vmem:[%s4169_s30 + $0x268] sm:$0xff]  ;;  %v3483_v52 = vcombine.low %v406_v40, %v414_v41 }
  0x72   : > { %v3527_v11 = vcombine.low %v452_v60, %v460_v61  ;;  %v3502_v55 = vcombine.high %v423_v50, %v431_v51 }
  0x73   : > { %1585 = vadd.xlane.f32.xlu0 %v1584_v62 }
  0x74   : > { %1149 = vmatpush1.bf16.msra.mxu0 %v3539_v4  ;;  %1202 = vmatpush1.bf16.msra.mxu1 %v3541_v6  ;;  %v3528_v4 = vcombine.high %v452_v60, %v460_v61  ;;  %v3530_v6 = vcombine.high %v453_v63, %v461_v1  ;;  %v3501_v61 = vcombine.low %v423_v50, %v431_v51  ;;  %v454_v1 = vld [vmem:[%s4169_s30 + $0x320] sm:$0xff]  ;;  %v424_v51 = vld [vmem:[%s4169_s30 + $0x230] sm:$0xff] }
  0x75   : > { %1240 = vmatprep.subr.bf16.mxu0 %v3432_v7  ;;  %1293 = vmatprep.subr.bf16.mxu1 %v3434_v8  ;;  %v468_v7 = vld [vmem:[%s4169_s30 + $0x390] sm:$0xff] }
  0x76   : > { %v476_v8 = vld [vmem:[%s4169_s30 + $0x3d0] sm:$0xff] }
  0x77   : > { %1167 = vmatmul.mubr.bf16.vlgmr.msra.gmra.mrb[0].mxu0 %v4214_v5  ;;  %1220 = vmatmul.mubr.bf16.vlgmr.msra.gmra.mrb[0].mxu1 %v4214_v5  ;;  %v3543_v19 = vcombine.low %v468_v7, %v476_v8 }
  0x78   : > { %1241 = vmatpush1.bf16.msra.mxu0 %v3431_v13  ;;  %1294 = vmatpush1.bf16.msra.mxu1 %v3433_v14  ;;  %v3544_v13 = vcombine.high %v468_v7, %v476_v8  ;;  %v3546_v14 = vcombine.high %v469_v9, %v477_v10  ;;  %v470_v10 = vld [vmem:[%s4169_s30 + $0x3a0] sm:$0xff] }
  0x79   : > { %1242 = vmatprep.subr.bf16.mxu0 %v3448_v15  ;;  %1295 = vmatprep.subr.bf16.mxu1 %v3450_v16  ;;  %v358_v15 = vld [vmem:[%s4169_s30 + $0x20] sm:$0xff] }
  0x7a   : > { %1176 = vmatprep.mubr.bf16.mxu0 %v3975_v0  ;;  %1229 = vmatprep.mubr.bf16.mxu1 %v3975_v0  ;;  %v366_v16 = vld [vmem:[%s4169_s30 + $0x60] sm:$0xff] }
  0x7b   : > { %v3435_v28 = vcombine.low %v358_v15, %v366_v16 }
  0x7c   : > { %1243 = vmatpush1.bf16.msra.mxu0 %v3447_v21  ;;  %1296 = vmatpush1.bf16.msra.mxu1 %v3449_v23  ;;  %v3436_v21 = vcombine.high %v358_v15, %v366_v16  ;;  %v3438_v23 = vcombine.high %v359_v17, %v367_v18  ;;  %v360_v18 = vld [vmem:[%s4169_s30 + $0x30] sm:$0xff] }
  0x7d   : > { %1244 = vmatprep.subr.bf16.mxu0 %v3464_v24  ;;  %1297 = vmatprep.subr.bf16.mxu1 %v3466_v25  ;;  %v374_v24 = vld [vmem:[%s4169_s30 + $0xa0] sm:$0xff] }
  0x7e   : > { %v382_v25 = vld [vmem:[%s4169_s30 + $0xe0] sm:$0xff] }
  0x7f   : > { %1177 = vmatmul.mubr.bf16.gmra.mrb[4].mxu0 %v4228_v22  ;;  %1230 = vmatmul.mubr.bf16.gmra.mrb[4].mxu1 %v4228_v22  ;;  %v3451_v36 = vcombine.low %v374_v24, %v382_v25 }
  0x80   : > { %1245 = vmatpush1.bf16.msra.mxu0 %v3463_v30  ;;  %1298 = vmatpush1.bf16.msra.mxu1 %v3465_v32  ;;  %v3452_v30 = vcombine.high %v374_v24, %v382_v25  ;;  %v390_v32 = vld [vmem:[%s4169_s30 + $0x120] sm:$0xff] }
  0x81   : > { %1246 = vmatprep.subr.bf16.mxu0 %v3480_v33  ;;  %1299 = vmatprep.subr.bf16.mxu1 %v3482_v35  ;;  %v398_v33 = vld [vmem:[%s4169_s30 + $0x160] sm:$0xff]  ;;  %v399_v35 = vld [vmem:[%s4169_s30 + $0x168] sm:$0xff] }
  0x82   : > { %1272 = vmatprep.mubr.bf16.mxu0 %v3975_v0  ;;  %1325 = vmatprep.mubr.bf16.mxu1 %v3975_v0  ;;  %v3468_v38 = vcombine.high %v390_v32, %v398_v33  ;;  %v3470_v39 = vcombine.high %v391_v34, %v399_v35  ;;  %v3467_v44 = vcombine.low %v390_v32, %v398_v33 }
  0x84   : > { %1247 = vmatpush1.bf16.msra.mxu0 %v3479_v43  ;;  %1300 = vmatpush1.bf16.msra.mxu1 %v3481_v45  ;;  %v415_v43 = vld [vmem:[%s4169_s30 + $0x1e8] sm:$0xff]  ;;  %v3469_v45 = vcombine.low %v391_v34, %v399_v35  ;;  %v392_v35 = vld [vmem:[%s4169_s30 + $0x130] sm:$0xff] }
  0x85   : > { %1248 = vmatprep.subr.bf16.mxu0 %v3496_v46  ;;  %1301 = vmatprep.subr.bf16.mxu1 %v3498_v48  ;;  %v3484_v46 = vcombine.high %v406_v40, %v414_v41  ;;  %v3486_v47 = vcombine.high %v407_v42, %v415_v43  ;;  %v422_v48 = vld [vmem:[%s4169_s30 + $0x220] sm:$0xff]  ;;  %v3485_v53 = vcombine.low %v407_v42, %v415_v43  ;;  %v408_v43 = vld [vmem:[%s4169_s30 + $0x1b0] sm:$0xff] }
  0x86   : > { %v3500_v54 = vcombine.high %v422_v48, %v430_v49  ;;  %v3499_v60 = vcombine.low %v422_v48, %v430_v49 }
  0x88   : > { %1249 = vmatpush1.bf16.msra.mxu0 %v3495_v56  ;;  %1302 = vmatpush1.bf16.msra.mxu1 %v3497_v57  ;;  %v438_v56 = vld [vmem:[%s4169_s30 + $0x2a0] sm:$0xff] }
  0x89   : > { %1250 = vmatprep.subr.bf16.mxu0 %v3512_v58  ;;  %1303 = vmatprep.subr.bf16.mxu1 %v3514_v59  ;;  %v446_v57 = vld [vmem:[%s4169_s30 + $0x2e0] sm:$0xff]  ;;  %v439_v58 = vld [vmem:[%s4169_s30 + $0x2a8] sm:$0xff] }
  0x8a   : > { %v447_v59 = vld [vmem:[%s4169_s30 + $0x2e8] sm:$0xff]  ;;  %v3516_v62 = vcombine.high %v438_v56, %v446_v57 }
  0x8b   : > { %v3518_v63 = vcombine.high %v439_v58, %v447_v59  ;;  %v3517_v7 = vcombine.low %v439_v58, %v447_v59  ;;  %v440_v59 = vld [vmem:[%s4169_s30 + $0x2b0] sm:$0xff] }
  0x8c   : > { %1251 = vmatpush1.bf16.msra.mxu0 %v3511_v2  ;;  %1304 = vmatpush1.bf16.msra.mxu1 %v3513_v3  ;;  %v462_v2 = vld [vmem:[%s4169_s30 + $0x360] sm:$0xff]  ;;  %v455_v3 = vld [vmem:[%s4169_s30 + $0x328] sm:$0xff] }
  0x8d   : > { %1252 = vmatprep.subr.bf16.mxu0 %v3528_v4  ;;  %1305 = vmatprep.subr.bf16.mxu1 %v3530_v6  ;;  %v463_v4 = vld [vmem:[%s4169_s30 + $0x368] sm:$0xff]  ;;  %v3515_v6 = vcombine.low %v438_v56, %v446_v57  ;;  %v3532_v8 = vcombine.high %v454_v1, %v462_v2 }
  0x8e   : > { %v3534_v9 = vcombine.high %v455_v3, %v463_v4  ;;  %v3533_v15 = vcombine.low %v455_v3, %v463_v4  ;;  %v456_v4 = vld [vmem:[%s4169_s30 + $0x330] sm:$0xff] }
  0x90   : > { %1253 = vmatpush1.bf16.msra.mxu0 %v3527_v11  ;;  %1306 = vmatpush1.bf16.msra.mxu1 %v3529_v12  ;;  %v478_v11 = vld [vmem:[%s4169_s30 + $0x3e0] sm:$0xff]  ;;  %v471_v12 = vld [vmem:[%s4169_s30 + $0x3a8] sm:$0xff] }
  0x91   : > { %1254 = vmatprep.subr.bf16.mxu0 %v3544_v13  ;;  %1307 = vmatprep.subr.bf16.mxu1 %v3546_v14  ;;  %v479_v13 = vld [vmem:[%s4169_s30 + $0x3e8] sm:$0xff]  ;;  %v3531_v14 = vcombine.low %v454_v1, %v462_v2  ;;  %v3548_v16 = vcombine.high %v470_v10, %v478_v11 }
  0x92   : > { %v3550_v17 = vcombine.high %v471_v12, %v479_v13  ;;  %v3549_v24 = vcombine.low %v471_v12, %v479_v13  ;;  %v472_v13 = vld [vmem:[%s4169_s30 + $0x3b0] sm:$0xff] }
  0x94   : > { %1255 = vmatpush1.bf16.msra.mxu0 %v3543_v19  ;;  %1308 = vmatpush1.bf16.msra.mxu1 %v3545_v20  ;;  %v368_v19 = vld [vmem:[%s4169_s30 + $0x70] sm:$0xff]  ;;  %v361_v20 = vld [vmem:[%s4169_s30 + $0x38] sm:$0xff] }
  0x95   : > { %1346 = vmatprep.subr.bf16.mxu0 %v3436_v21  ;;  %1399 = vmatprep.subr.bf16.mxu1 %v3438_v23  ;;  %v369_v21 = vld [vmem:[%s4169_s30 + $0x78] sm:$0xff]  ;;  %v3547_v23 = vcombine.low %v470_v10, %v478_v11  ;;  %v3440_v25 = vcombine.high %v360_v18, %v368_v19 }
  0x96   : > { %v3442_v26 = vcombine.high %v361_v20, %v369_v21  ;;  %v3441_v32 = vcombine.low %v361_v20, %v369_v21 }
  0x97   : > { %1273 = vmatmul.mubr.bf16.vlgmr.msra.gmra.mrb[8].mxu0 %v4214_v5  ;;  %1326 = vmatmul.mubr.bf16.vlgmr.msra.gmra.mrb[8].mxu1 %v4214_v5 }
  0x98   : > { %1347 = vmatpush1.bf16.msra.mxu0 %v3435_v28  ;;  %1400 = vmatpush1.bf16.msra.mxu1 %v3437_v29  ;;  %v384_v28 = vld [vmem:[%s4169_s30 + $0xf0] sm:$0xff]  ;;  %v377_v29 = vld [vmem:[%s4169_s30 + $0xb8] sm:$0xff] }
  0x99   : > { %1348 = vmatprep.subr.bf16.mxu0 %v3452_v30  ;;  %1401 = vmatprep.subr.bf16.mxu1 %v3454_v31  ;;  %v385_v30 = vld [vmem:[%s4169_s30 + $0xf8] sm:$0xff]  ;;  %v3439_v31 = vcombine.low %v360_v18, %v368_v19  ;;  %v3456_v33 = vcombine.high %v376_v27, %v384_v28 }
  0x9a   : > { %1282 = vmatprep.mubr.bf16.mxu0 %v3975_v0  ;;  %1335 = vmatprep.mubr.bf16.mxu1 %v3975_v0  ;;  %v3458_v34 = vcombine.high %v377_v29, %v385_v30  ;;  %v3457_v40 = vcombine.low %v377_v29, %v385_v30 }
  0x9c   : > { %1349 = vmatpush1.bf16.msra.mxu0 %v3451_v36  ;;  %1402 = vmatpush1.bf16.msra.mxu1 %v3453_v37  ;;  %v400_v36 = vld [vmem:[%s4169_s30 + $0x170] sm:$0xff]  ;;  %v393_v37 = vld [vmem:[%s4169_s30 + $0x138] sm:$0xff] }
  0x9d   : > { %1350 = vmatprep.subr.bf16.mxu0 %v3468_v38  ;;  %1403 = vmatprep.subr.bf16.mxu1 %v3470_v39  ;;  %v401_v38 = vld [vmem:[%s4169_s30 + $0x178] sm:$0xff]  ;;  %v3455_v39 = vcombine.low %v376_v27, %v384_v28  ;;  %v3472_v41 = vcombine.high %v392_v35, %v400_v36 }
  0x9e   : > { %v3474_v42 = vcombine.high %v393_v37, %v401_v38  ;;  %v3473_v48 = vcombine.low %v393_v37, %v401_v38 }
  0x9f   : > { %1283 = vmatmul.mubr.bf16.gmra.mrb[12].mxu0 %v4228_v22  ;;  %1336 = vmatmul.mubr.bf16.gmra.mrb[12].mxu1 %v4228_v22 }
  0xa0   : > { %1351 = vmatpush1.bf16.msra.mxu0 %v3467_v44  ;;  %1404 = vmatpush1.bf16.msra.mxu1 %v3469_v45  ;;  %v416_v44 = vld [vmem:[%s4169_s30 + $0x1f0] sm:$0xff]  ;;  %v409_v45 = vld [vmem:[%s4169_s30 + $0x1b8] sm:$0xff] }
  0xa1   : > { %1352 = vmatprep.subr.bf16.mxu0 %v3484_v46  ;;  %1405 = vmatprep.subr.bf16.mxu1 %v3486_v47  ;;  %v417_v46 = vld [vmem:[%s4169_s30 + $0x1f8] sm:$0xff]  ;;  %v3471_v47 = vcombine.low %v392_v35, %v400_v36  ;;  %v3488_v49 = vcombine.high %v408_v43, %v416_v44 }
  0xa2   : > { %1378 = vmatprep.mubr.bf16.mxu0 %v3975_v0  ;;  %1431 = vmatprep.mubr.bf16.mxu1 %v3975_v0  ;;  %v3490_v50 = vcombine.high %v409_v45, %v417_v46  ;;  %v3489_v56 = vcombine.low %v409_v45, %v417_v46 }
  0xa4   : > { %1353 = vmatpush1.bf16.msra.mxu0 %v3483_v52  ;;  %1406 = vmatpush1.bf16.msra.mxu1 %v3485_v53  ;;  %v432_v52 = vld [vmem:[%s4169_s30 + $0x270] sm:$0xff]  ;;  %v425_v53 = vld [vmem:[%s4169_s30 + $0x238] sm:$0xff] }
  0xa5   : > { %1354 = vmatprep.subr.bf16.mxu0 %v3500_v54  ;;  %1407 = vmatprep.subr.bf16.mxu1 %v3502_v55  ;;  %v433_v54 = vld [vmem:[%s4169_s30 + $0x278] sm:$0xff]  ;;  %v3487_v55 = vcombine.low %v408_v43, %v416_v44  ;;  %v3504_v57 = vcombine.high %v424_v51, %v432_v52 }
  0xa6   : > { %v3506_v58 = vcombine.high %v425_v53, %v433_v54  ;;  %v3505_v1 = vcombine.low %v425_v53, %v433_v54 }
  0xa8   : > { %1355 = vmatpush1.bf16.msra.mxu0 %v3499_v60  ;;  %1408 = vmatpush1.bf16.msra.mxu1 %v3501_v61  ;;  %v448_v60 = vld [vmem:[%s4169_s30 + $0x2f0] sm:$0xff]  ;;  %v441_v61 = vld [vmem:[%s4169_s30 + $0x2b8] sm:$0xff] }
  0xa9   : > { %1356 = vmatprep.subr.bf16.mxu0 %v3516_v62  ;;  %1409 = vmatprep.subr.bf16.mxu1 %v3518_v63  ;;  %v449_v62 = vld [vmem:[%s4169_s30 + $0x2f8] sm:$0xff]  ;;  %v3503_v63 = vcombine.low %v424_v51, %v432_v52  ;;  %v3520_v2 = vcombine.high %v440_v59, %v448_v60 }
  0xaa   : > { %v3522_v3 = vcombine.high %v441_v61, %v449_v62  ;;  %v3521_v10 = vcombine.low %v441_v61, %v449_v62 }
  0xac   : > { %1357 = vmatpush1.bf16.msra.mxu0 %v3515_v6  ;;  %1410 = vmatpush1.bf16.msra.mxu1 %v3517_v7  ;;  %v464_v6 = vld [vmem:[%s4169_s30 + $0x370] sm:$0xff]  ;;  %v457_v7 = vld [vmem:[%s4169_s30 + $0x338] sm:$0xff] }
  0xad   : > { %1358 = vmatprep.subr.bf16.mxu0 %v3532_v8  ;;  %1411 = vmatprep.subr.bf16.mxu1 %v3534_v9  ;;  %v465_v8 = vld [vmem:[%s4169_s30 + $0x378] sm:$0xff]  ;;  %v3519_v9 = vcombine.low %v440_v59, %v448_v60  ;;  %v3536_v11 = vcombine.high %v456_v4, %v464_v6 }
  0xae   : > { %v3538_v12 = vcombine.high %v457_v7, %v465_v8  ;;  %v3537_v18 = vcombine.low %v457_v7, %v465_v8 }
  0xb0   : > { %1359 = vmatpush1.bf16.msra.mxu0 %v3531_v14  ;;  %1412 = vmatpush1.bf16.msra.mxu1 %v3533_v15  ;;  %v480_v14 = vld [vmem:[%s4169_s30 + $0x3f0] sm:$0xff]  ;;  %v473_v15 = vld [vmem:[%s4169_s30 + $0x3b8] sm:$0xff] }
  0xb1   : > { %1360 = vmatprep.subr.bf16.mxu0 %v3548_v16  ;;  %1413 = vmatprep.subr.bf16.mxu1 %v3550_v17  ;;  %v481_v16 = vld [vmem:[%s4169_s30 + $0x3f8] sm:$0xff]  ;;  %v3535_v17 = vcombine.low %v456_v4, %v464_v6  ;;  %v3552_v19 = vcombine.high %v472_v13, %v480_v14  ;;  %v3551_v21 = vcombine.low %v472_v13, %v480_v14 }
  0xb2   : > { %v3554_v20 = vcombine.high %v473_v15, %v481_v16 }
  0xb4   : > { %1361 = vmatpush1.bf16.msra.mxu0 %v3547_v23  ;;  %1414 = vmatpush1.bf16.msra.mxu1 %v3549_v24  ;;  %v3553_v23 = vcombine.low %v473_v15, %v481_v16 }
  0xb5   : > { %1452 = vmatprep.subr.bf16.mxu0 %v3440_v25  ;;  %1505 = vmatprep.subr.bf16.mxu1 %v3442_v26 }
  0xb7   : > { %1379 = vmatmul.mubr.bf16.vlgmr.msra.gmra.mrb[16].mxu0 %v4214_v5  ;;  %1432 = vmatmul.mubr.bf16.vlgmr.msra.gmra.mrb[16].mxu1 %v4214_v5 }
  0xb8   : > { %1453 = vmatpush1.bf16.msra.mxu0 %v3439_v31  ;;  %1506 = vmatpush1.bf16.msra.mxu1 %v3441_v32 }
  0xb9   : > { %1454 = vmatprep.subr.bf16.mxu0 %v3456_v33  ;;  %1507 = vmatprep.subr.bf16.mxu1 %v3458_v34 }
  0xba   : > { %1388 = vmatprep.mubr.bf16.mxu0 %v3975_v0  ;;  %1441 = vmatprep.mubr.bf16.mxu1 %v3975_v0 }
  0xbc   : > { %1455 = vmatpush1.bf16.msra.mxu0 %v3455_v39  ;;  %1508 = vmatpush1.bf16.msra.mxu1 %v3457_v40 }
  0xbd   : > { %1456 = vmatprep.subr.bf16.mxu0 %v3472_v41  ;;  %1509 = vmatprep.subr.bf16.mxu1 %v3474_v42 }
  0xbf   : > { %1389 = vmatmul.mubr.bf16.gmra.mrb[20].mxu0 %v4228_v22  ;;  %1442 = vmatmul.mubr.bf16.gmra.mrb[20].mxu1 %v4228_v22 }
  0xc0   : > { %1457 = vmatpush1.bf16.msra.mxu0 %v3471_v47  ;;  %1510 = vmatpush1.bf16.msra.mxu1 %v3473_v48 }
  0xc1   : > { %1458 = vmatprep.subr.bf16.mxu0 %v3488_v49  ;;  %1511 = vmatprep.subr.bf16.mxu1 %v3490_v50 }
  0xc2   : > { %1484 = vmatprep.mubr.bf16.mxu0 %v3975_v0  ;;  %1537 = vmatprep.mubr.bf16.mxu1 %v3975_v0 }
  0xc4   : > { %1459 = vmatpush1.bf16.msra.mxu0 %v3487_v55  ;;  %1512 = vmatpush1.bf16.msra.mxu1 %v3489_v56 }
  0xc5   : > { %1460 = vmatprep.subr.bf16.mxu0 %v3504_v57  ;;  %1513 = vmatprep.subr.bf16.mxu1 %v3506_v58 }
  0xc8   : > { %1461 = vmatpush1.bf16.msra.mxu0 %v3503_v63  ;;  %1514 = vmatpush1.bf16.msra.mxu1 %v3505_v1 }
  0xc9   : > { %1462 = vmatprep.subr.bf16.mxu0 %v3520_v2  ;;  %1515 = vmatprep.subr.bf16.mxu1 %v3522_v3 }
  0xcc   : > { %1463 = vmatpush1.bf16.msra.mxu0 %v3519_v9  ;;  %1516 = vmatpush1.bf16.msra.mxu1 %v3521_v10 }
  0xcd   : > { %1464 = vmatprep.subr.bf16.mxu0 %v3536_v11  ;;  %1517 = vmatprep.subr.bf16.mxu1 %v3538_v12 }
  0xd0   : > { %1465 = vmatpush1.bf16.msra.mxu0 %v3535_v17  ;;  %1518 = vmatpush1.bf16.msra.mxu1 %v3537_v18 }
  0xd1   : > { %1466 = vmatprep.subr.bf16.mxu0 %v3552_v19  ;;  %1519 = vmatprep.subr.bf16.mxu1 %v3554_v20 }
  0xd4   : > { %1467 = vmatpush1.bf16.msra.mxu0 %v3551_v21  ;;  %1520 = vmatpush1.bf16.msra.mxu1 %v3553_v23 }
  0xd7   : > { %1485 = vmatmul.mubr.bf16.vlgmr.msra.gmra.mrb[24].mxu0 %v4214_v5  ;;  %1538 = vmatmul.mubr.bf16.vlgmr.msra.gmra.mrb[24].mxu1 %v4214_v5 }
  0xd8   : > { %1494 = vmatprep.mubr.bf16.mxu0 %v3975_v0  ;;  %1547 = vmatprep.mubr.bf16.mxu1 %v3975_v0 }
  0xdf   : > { %1495 = vmatmul.mubr.bf16.gmra.mrb[28].mxu0 %v4228_v22  ;;  %1548 = vmatmul.mubr.bf16.gmra.mrb[28].mxu1 %v4228_v22 }
  0xfb   : > { %v1571_v24 = vpop.xlane.xlu0 %1570 }
  0xfc   : > { %v1572_v25 = vrot.slane %v1571_v24, 4 }
  0xfe   : > { %v1573_v26 = vadd.f32 %v1572_v25, %v1571_v24 }
 0x100   : > { %v1586_v27 = vpop.xlane.xlu0 %1585  ;;  %v1574_v28 = vrot.slane %v1573_v26, 2 }
 0x101   : > { %v1587_v29 = vrot.slane %v1586_v27, 4 }
 0x102   : > { %v1575_v31 = vadd.f32 %v1574_v28, %v1573_v26 }
 0x103   : > { %v1588_v30 = vadd.f32 %v1587_v29, %v1586_v27 }
 0x104   : > { %v1576_v33 = vrot.slane %v1575_v31, 1 }
 0x105   : > { %v1589_v32 = vrot.slane %v1588_v30, 2 }
 0x106   : > { %v1577_v5 = vadd.f32 %v1576_v33, %v1575_v31 }
 0x107   : > { %v1590_v34 = vadd.f32 %v1589_v32, %v1588_v30 }
 0x108   : > { %3633 = vpush %v1577_v5 }
 0x109   : > { %v1591_v35 = vrot.slane %v1590_v34, 1 }
 0x10b   : > { %v1592_v36 = vadd.f32 %v1591_v35, %v1590_v34 }
 0x10d   : > { %3635 = vpush %v1592_v36 }
 0x139   : > { %s4371_s14 = spop %3633 }
 0x13e   : > { %s4388_s15 = spop %3635 }
 0x14a   : > { %v4355_v0 = vpop.f32.mrb[0].mxu0  ;;  %v4357_v37 = vpop.f32.mrb[0].mxu1 }
 0x14b   : > { %v4359_v22 = vpop.f32.mrb[1].mxu0  ;;  %v4361_v38 = vpop.f32.mrb[1].mxu1  ;;  %1599 = vst [vmem:[#allocation2] sm:$0xff] (!%p3556_p12), %v4355_v0  ;;  %1601 = vst [vmem:[#allocation2 + $0x10] sm:$0xff] (!%p3556_p12), %v4357_v37 }
 0x14c   : > { %v4363_v39 = vpop.f32.mrb[2].mxu0  ;;  %v4365_v40 = vpop.f32.mrb[2].mxu1  ;;  %1600 = vst [vmem:[#allocation2 + $0x8] sm:$0xff] (!%p3556_p12), %v4359_v22  ;;  %1602 = vst [vmem:[#allocation2 + $0x18] sm:$0xff] (!%p3556_p12), %v4361_v38 }
 0x14d   : > { %v4367_v41 = vpop.f32.mrb[3].mxu0  ;;  %v4369_v42 = vpop.f32.mrb[3].mxu1  ;;  %1615 = vst [vmem:[#allocation2 + $0x80] sm:$0xff] (!%p3556_p12), %v4363_v39  ;;  %1617 = vst [vmem:[#allocation2 + $0x90] sm:$0xff] (!%p3556_p12), %v4365_v40 }
 0x14e   : > { %1616 = vst [vmem:[#allocation2 + $0x88] sm:$0xff] (!%p3556_p12), %v4367_v41  ;;  %1618 = vst [vmem:[#allocation2 + $0x98] sm:$0xff] (!%p3556_p12), %v4369_v42 }
 0x152   : > { %v4373_v43 = vpop.f32.mrb[4].mxu0  ;;  %v4376_v45 = vpop.f32.mrb[4].mxu1 }
 0x153   : > { %v4378_v46 = vpop.f32.mrb[5].mxu0  ;;  %v4380_v47 = vpop.f32.mrb[5].mxu1  ;;  %1631 = vst [vmem:[#allocation2 + $0x100] sm:$0xff] (!%p3556_p12), %v4373_v43  ;;  %1633 = vst [vmem:[#allocation2 + $0x110] sm:$0xff] (!%p3556_p12), %v4376_v45 }
 0x154   : > { %v4382_v48 = vpop.f32.mrb[6].mxu0  ;;  %v4384_v49 = vpop.f32.mrb[6].mxu1  ;;  %1632 = vst [vmem:[#allocation2 + $0x108] sm:$0xff] (!%p3556_p12), %v4378_v46  ;;  %1634 = vst [vmem:[#allocation2 + $0x118] sm:$0xff] (!%p3556_p12), %v4380_v47 }
 0x155   : > { %5322 = vst [vmem:[#allocation13_spill] sm:$0xff] %v4384_v49  ;;  %v4386_v50 = vpop.f32.mrb[7].mxu0  ;;  %v4390_v51 = vpop.f32.mrb[7].mxu1  ;;  %1647 = vst [vmem:[#allocation2 + $0x180] sm:$0xff] (!%p3556_p12), %v4382_v48 }
 0x156   : > { %5323 = vst [vmem:[#allocation14_spill] sm:$0xff] %v4386_v50  ;;  %5324 = vst [vmem:[#allocation15_spill] sm:$0xff] %v4390_v51 }
 0x157   : > { %1648 = vst [vmem:[#allocation2 + $0x188] sm:$0xff] (!%p3556_p12), %v4386_v50  ;;  %1649 = vst [vmem:[#allocation2 + $0x190] sm:$0xff] (!%p3556_p12), %v4384_v49 }
 0x158   : > { %1650 = vst [vmem:[#allocation2 + $0x198] sm:$0xff] (!%p3556_p12), %v4390_v51 }
 0x16a   : > { %v4393_v53 = vpop.f32.mrb[8].mxu0  ;;  %v4395_v54 = vpop.f32.mrb[8].mxu1 }
 0x16b   : > { %v4397_v55 = vpop.f32.mrb[9].mxu0  ;;  %v4399_v56 = vpop.f32.mrb[9].mxu1  ;;  %1603 = vst [vmem:[#allocation2 + $0x20] sm:$0xff] (!%p3556_p12), %v4393_v53  ;;  %1605 = vst [vmem:[#allocation2 + $0x30] sm:$0xff] (!%p3556_p12), %v4395_v54 }
 0x16c   : > { %v4401_v57 = vpop.f32.mrb[10].mxu0  ;;  %v4403_v58 = vpop.f32.mrb[10].mxu1  ;;  %1604 = vst [vmem:[#allocation2 + $0x28] sm:$0xff] (!%p3556_p12), %v4397_v55  ;;  %1606 = vst [vmem:[#allocation2 + $0x38] sm:$0xff] (!%p3556_p12), %v4399_v56 }
 0x16d   : > { %v4405_v59 = vpop.f32.mrb[11].mxu0  ;;  %v4407_v60 = vpop.f32.mrb[11].mxu1  ;;  %1619 = vst [vmem:[#allocation2 + $0xa0] sm:$0xff] (!%p3556_p12), %v4401_v57  ;;  %1621 = vst [vmem:[#allocation2 + $0xb0] sm:$0xff] (!%p3556_p12), %v4403_v58 }
 0x16e   : > { %1620 = vst [vmem:[#allocation2 + $0xa8] sm:$0xff] (!%p3556_p12), %v4405_v59  ;;  %1622 = vst [vmem:[#allocation2 + $0xb8] sm:$0xff] (!%p3556_p12), %v4407_v60 }
 0x172   : > { %v4409_v61 = vpop.f32.mrb[12].mxu0  ;;  %v4411_v62 = vpop.f32.mrb[12].mxu1 }
 0x173   : > { %v4413_v63 = vpop.f32.mrb[13].mxu0  ;;  %v4415_v1 = vpop.f32.mrb[13].mxu1  ;;  %1635 = vst [vmem:[#allocation2 + $0x120] sm:$0xff] (!%p3556_p12), %v4409_v61  ;;  %1637 = vst [vmem:[#allocation2 + $0x130] sm:$0xff] (!%p3556_p12), %v4411_v62 }
 0x174   : > { %v4417_v2 = vpop.f32.mrb[14].mxu0  ;;  %v4419_v3 = vpop.f32.mrb[14].mxu1  ;;  %1636 = vst [vmem:[#allocation2 + $0x128] sm:$0xff] (!%p3556_p12), %v4413_v63  ;;  %1638 = vst [vmem:[#allocation2 + $0x138] sm:$0xff] (!%p3556_p12), %v4415_v1 }
 0x175   : > { %5325 = vst [vmem:[#allocation16_spill] sm:$0xff] %v4417_v2  ;;  %5326 = vst [vmem:[#allocation17_spill] sm:$0xff] %v4419_v3  ;;  %v4421_v4 = vpop.f32.mrb[15].mxu0  ;;  %v4423_v6 = vpop.f32.mrb[15].mxu1 }
 0x176   : > { %5327 = vst [vmem:[#allocation18_spill] sm:$0xff] %v4421_v4  ;;  %5328 = vst [vmem:[#allocation19_spill] sm:$0xff] %v4423_v6 }
 0x177   : > { %1651 = vst [vmem:[#allocation2 + $0x1a0] sm:$0xff] (!%p3556_p12), %v4417_v2  ;;  %1652 = vst [vmem:[#allocation2 + $0x1a8] sm:$0xff] (!%p3556_p12), %v4421_v4 }
 0x178   : > { %1653 = vst [vmem:[#allocation2 + $0x1b0] sm:$0xff] (!%p3556_p12), %v4419_v3  ;;  %1654 = vst [vmem:[#allocation2 + $0x1b8] sm:$0xff] (!%p3556_p12), %v4423_v6  ;;  %v5337_v3 = vstv (!%p3556_p12), %s4371_s14 }
 0x179   : > { %1664 = vst.msk [vmem:[%s5298_s6] sm:$0x1] (!%p3556_p12), %vm1663_vm0, %v5337_v3 }
 0x18a   : > { %v4425_v7 = vpop.f32.mrb[16].mxu0  ;;  %v4427_v8 = vpop.f32.mrb[16].mxu1 }
 0x18b   : > { %v4429_v9 = vpop.f32.mrb[17].mxu0  ;;  %v4431_v10 = vpop.f32.mrb[17].mxu1  ;;  %1607 = vst [vmem:[#allocation2 + $0x40] sm:$0xff] (!%p3556_p12), %v4425_v7  ;;  %1609 = vst [vmem:[#allocation2 + $0x50] sm:$0xff] (!%p3556_p12), %v4427_v8 }
 0x18c   : > { %v4433_v11 = vpop.f32.mrb[18].mxu0  ;;  %v4435_v12 = vpop.f32.mrb[18].mxu1  ;;  %1608 = vst [vmem:[#allocation2 + $0x48] sm:$0xff] (!%p3556_p12), %v4429_v9  ;;  %1610 = vst [vmem:[#allocation2 + $0x58] sm:$0xff] (!%p3556_p12), %v4431_v10 }
 0x18d   : > { %v4437_v13 = vpop.f32.mrb[19].mxu0  ;;  %v4439_v14 = vpop.f32.mrb[19].mxu1  ;;  %1623 = vst [vmem:[#allocation2 + $0xc0] sm:$0xff] (!%p3556_p12), %v4433_v11  ;;  %1625 = vst [vmem:[#allocation2 + $0xd0] sm:$0xff] (!%p3556_p12), %v4435_v12 }
 0x18e   : > { %1624 = vst [vmem:[#allocation2 + $0xc8] sm:$0xff] (!%p3556_p12), %v4437_v13  ;;  %1626 = vst [vmem:[#allocation2 + $0xd8] sm:$0xff] (!%p3556_p12), %v4439_v14 }
 0x192   : > { %v4441_v15 = vpop.f32.mrb[20].mxu0  ;;  %v4443_v16 = vpop.f32.mrb[20].mxu1 }
 0x193   : > { %v4445_v17 = vpop.f32.mrb[21].mxu0  ;;  %v4447_v18 = vpop.f32.mrb[21].mxu1  ;;  %1639 = vst [vmem:[#allocation2 + $0x140] sm:$0xff] (!%p3556_p12), %v4441_v15  ;;  %1641 = vst [vmem:[#allocation2 + $0x150] sm:$0xff] (!%p3556_p12), %v4443_v16 }
 0x194   : > { %v4449_v19 = vpop.f32.mrb[22].mxu0  ;;  %v4451_v20 = vpop.f32.mrb[22].mxu1  ;;  %1640 = vst [vmem:[#allocation2 + $0x148] sm:$0xff] (!%p3556_p12), %v4445_v17  ;;  %1642 = vst [vmem:[#allocation2 + $0x158] sm:$0xff] (!%p3556_p12), %v4447_v18 }
 0x195   : > { %5329 = vst [vmem:[#allocation20_spill] sm:$0xff] %v4449_v19  ;;  %5330 = vst [vmem:[#allocation21_spill] sm:$0xff] %v4451_v20  ;;  %v4453_v21 = vpop.f32.mrb[23].mxu0  ;;  %v4455_v23 = vpop.f32.mrb[23].mxu1 }
 0x196   : > { %5331 = vst [vmem:[#allocation22_spill] sm:$0xff] %v4453_v21  ;;  %5332 = vst [vmem:[#allocation23_spill] sm:$0xff] %v4455_v23 }
 0x197   : > { %1655 = vst [vmem:[#allocation2 + $0x1c0] sm:$0xff] (!%p3556_p12), %v4449_v19  ;;  %1656 = vst [vmem:[#allocation2 + $0x1c8] sm:$0xff] (!%p3556_p12), %v4453_v21  ;;  %v5338_v19 = vstv (!%p3556_p12), %s4388_s15 }
 0x198   : > { %1657 = vst [vmem:[#allocation2 + $0x1d0] sm:$0xff] (!%p3556_p12), %v4451_v20  ;;  %1658 = vst [vmem:[#allocation2 + $0x1d8] sm:$0xff] (!%p3556_p12), %v4455_v23 }
 0x199   : > { %1665 = vst.msk [vmem:[%s5298_s6 + $0x1] sm:$0x1] (!%p3556_p12), %vm1663_vm0, %v5338_v19 }
 0x1aa   : > { %v4457_v24 = vpop.f32.mrb[24].mxu0  ;;  %v4459_v25 = vpop.f32.mrb[24].mxu1 }
 0x1ab   : > { %v4461_v26 = vpop.f32.mrb[25].mxu0  ;;  %v4463_v27 = vpop.f32.mrb[25].mxu1  ;;  %1611 = vst [vmem:[#allocation2 + $0x60] sm:$0xff] (!%p3556_p12), %v4457_v24  ;;  %1613 = vst [vmem:[#allocation2 + $0x70] sm:$0xff] (!%p3556_p12), %v4459_v25 }
 0x1ac   : > { %v4465_v28 = vpop.f32.mrb[26].mxu0  ;;  %v4467_v29 = vpop.f32.mrb[26].mxu1  ;;  %1612 = vst [vmem:[#allocation2 + $0x68] sm:$0xff] (!%p3556_p12), %v4461_v26  ;;  %1614 = vst [vmem:[#allocation2 + $0x78] sm:$0xff] (!%p3556_p12), %v4463_v27 }
 0x1ad   : > { %v4469_v30 = vpop.f32.mrb[27].mxu0  ;;  %v4471_v31 = vpop.f32.mrb[27].mxu1  ;;  %1627 = vst [vmem:[#allocation2 + $0xe0] sm:$0xff] (!%p3556_p12), %v4465_v28  ;;  %1629 = vst [vmem:[#allocation2 + $0xf0] sm:$0xff] (!%p3556_p12), %v4467_v29 }
 0x1ae   : > { %1628 = vst [vmem:[#allocation2 + $0xe8] sm:$0xff] (!%p3556_p12), %v4469_v30  ;;  %1630 = vst [vmem:[#allocation2 + $0xf8] sm:$0xff] (!%p3556_p12), %v4471_v31 }
 0x1b0   : > { %1598 = sbr.rel (%p3556_p12) target bundleno = 441 (0x1b9), region = 52 }
 0x1b2   : > { %v4473_v32 = vpop.f32.mrb[28].mxu0  ;;  %v4475_v33 = vpop.f32.mrb[28].mxu1 }
 0x1b3   : > { %v4477_v34 = vpop.f32.mrb[29].mxu0  ;;  %v4479_v5 = vpop.f32.mrb[29].mxu1  ;;  %1643 = vst [vmem:[#allocation2 + $0x160] sm:$0xff] (!%p3556_p12), %v4473_v32  ;;  %1645 = vst [vmem:[#allocation2 + $0x170] sm:$0xff] (!%p3556_p12), %v4475_v33 }
 0x1b4   : > { %v4481_v35 = vpop.f32.mrb[30].mxu0  ;;  %v4483_v36 = vpop.f32.mrb[30].mxu1  ;;  %1644 = vst [vmem:[#allocation2 + $0x168] sm:$0xff] (!%p3556_p12), %v4477_v34  ;;  %1646 = vst [vmem:[#allocation2 + $0x178] sm:$0xff] (!%p3556_p12), %v4479_v5 }
 0x1b5   : > { %5333 = vst [vmem:[#allocation24_spill] sm:$0xff] %v4481_v35  ;;  %5334 = vst [vmem:[#allocation25_spill] sm:$0xff] %v4483_v36  ;;  %v4485_v52 = vpop.f32.mrb[31].mxu0  ;;  %v4487_v44 = vpop.f32.mrb[31].mxu1 }
 0x1b6   : > { %5335 = vst [vmem:[#allocation26_spill] sm:$0xff] %v4485_v52  ;;  %5336 = vst [vmem:[#allocation27_spill] sm:$0xff] %v4487_v44 }
 0x1b7   : > { %1659 = vst [vmem:[#allocation2 + $0x1e0] sm:$0xff] %v4481_v35  ;;  %1660 = vst [vmem:[#allocation2 + $0x1e8] sm:$0xff] %v4485_v52 }
 0x1b8   : > { %1661 = vst [vmem:[#allocation2 + $0x1f0] sm:$0xff] %v4483_v36  ;;  %1662 = vst [vmem:[#allocation2 + $0x1f8] sm:$0xff] %v4487_v44 }
 0x1b9 PF: > { %p3557_p4 = scmp.le.s32.totalorder %s3959_s24, 0 }
 0x1ba   : > { %v1670_v52 = vld [vmem:[#allocation2] sm:$0xff] (!%p3557_p4)  ;;  %v1671_v35 = vld [vmem:[#allocation2 + $0x8] sm:$0xff] (!%p3557_p4)  ;;  %v1672_v36 = vld [vmem:[#allocation2 + $0x10] sm:$0xff] (!%p3557_p4)  ;;  %vm1866_vm1 = vcmask (!%p3557_p4), 0  }
 0x1bb   : > { %1669 = sbr.rel (%p3557_p4) target bundleno = 482 (0x1e2), region = 56  ;;  %v1734_v44 = vadd.f32 (!%p3557_p4), %v1670_v52, %v4355_v0  ;;  %v1735_v23 = vadd.f32 (!%p3557_p4), %v1671_v35, %v4359_v22  ;;  %v1736_v20 = vadd.f32 (!%p3557_p4), %v1672_v36, %v4357_v37  ;;  %v1673_v21 = vld [vmem:[#allocation2 + $0x18] sm:$0xff] (!%p3557_p4)  ;;  %v1674_v3 = vld [vmem:[#allocation2 + $0x20] sm:$0xff] (!%p3557_p4)  ;;  %v1675_v6 = vld [vmem:[#allocation2 + $0x28] sm:$0xff] (!%p3557_p4) }
 0x1bc   : > { %v1737_v4 = vadd.f32 (!%p3557_p4), %v1673_v21, %v4361_v38  ;;  %v1738_v19 = vadd.f32 (!%p3557_p4), %v1674_v3, %v4393_v53  ;;  %v1739_v2 = vadd.f32 (!%p3557_p4), %v1675_v6, %v4397_v55  ;;  %v1676_v51 = vld [vmem:[#allocation2 + $0x30] sm:$0xff] (!%p3557_p4)  ;;  %v1677_v49 = vld [vmem:[#allocation2 + $0x38] sm:$0xff] (!%p3557_p4)  ;;  %v1678_v50 = vld [vmem:[#allocation2 + $0x40] sm:$0xff] (!%p3557_p4) }
 0x1bd   : > { %1798 = vst [vmem:[#allocation2] sm:$0xff] (!%p3557_p4), %v1734_v44  ;;  %1799 = vst [vmem:[#allocation2 + $0x8] sm:$0xff] (!%p3557_p4), %v1735_v23  ;;  %v1740_v0 = vadd.f32 (!%p3557_p4), %v1676_v51, %v4395_v54  ;;  %v1741_v22 = vadd.f32 (!%p3557_p4), %v1677_v49, %v4399_v56  ;;  %v1742_v37 = vadd.f32 (!%p3557_p4), %v1678_v50, %v4425_v7  ;;  %v1679_v52 = vld [vmem:[#allocation2 + $0x48] sm:$0xff] (!%p3557_p4)  ;;  %v1680_v35 = vld [vmem:[#allocation2 + $0x50] sm:$0xff] (!%p3557_p4) }
 0x1be   : > { %1800 = vst [vmem:[#allocation2 + $0x10] sm:$0xff] (!%p3557_p4), %v1736_v20  ;;  %v1681_v36 = vld [vmem:[#allocation2 + $0x58] sm:$0xff] (!%p3557_p4)  ;;  %1801 = vst [vmem:[#allocation2 + $0x18] sm:$0xff] (!%p3557_p4), %v1737_v4  ;;  %v1743_v38 = vadd.f32 (!%p3557_p4), %v1679_v52, %v4429_v9  ;;  %v1744_v53 = vadd.f32 (!%p3557_p4), %v1680_v35, %v4427_v8  ;;  %v1682_v55 = vld [vmem:[#allocation2 + $0x60] sm:$0xff] (!%p3557_p4) }
 0x1bf   : > { %1802 = vst [vmem:[#allocation2 + $0x20] sm:$0xff] (!%p3557_p4), %v1738_v19  ;;  %1803 = vst [vmem:[#allocation2 + $0x28] sm:$0xff] (!%p3557_p4), %v1739_v2  ;;  %v1745_v44 = vadd.f32 (!%p3557_p4), %v1681_v36, %v4431_v10  ;;  %v1683_v6 = vld [vmem:[#allocation2 + $0x68] sm:$0xff] (!%p3557_p4)  ;;  %v1684_v20 = vld [vmem:[#allocation2 + $0x70] sm:$0xff] (!%p3557_p4)  ;;  %v1746_v49 = vadd.f32 (!%p3557_p4), %v1682_v55, %v4457_v24 }
 0x1c0   : > { %1804 = vst [vmem:[#allocation2 + $0x30] sm:$0xff] (!%p3557_p4), %v1740_v0  ;;  %1805 = vst [vmem:[#allocation2 + $0x38] sm:$0xff] (!%p3557_p4), %v1741_v22  ;;  %v1747_v50 = vadd.f32 (!%p3557_p4), %v1683_v6, %v4461_v26  ;;  %v1748_v51 = vadd.f32 (!%p3557_p4), %v1684_v20, %v4459_v25  ;;  %v1685_v54 = vld [vmem:[#allocation2 + $0x78] sm:$0xff] (!%p3557_p4)  ;;  %v1686_v56 = vld [vmem:[#allocation2 + $0x80] sm:$0xff] (!%p3557_p4) }
 0x1c1   : > { %1806 = vst [vmem:[#allocation2 + $0x40] sm:$0xff] (!%p3557_p4), %v1742_v37  ;;  %v1687_v2 = vld [vmem:[#allocation2 + $0x88] sm:$0xff] (!%p3557_p4)  ;;  %1807 = vst [vmem:[#allocation2 + $0x48] sm:$0xff] (!%p3557_p4), %v1743_v38  ;;  %v1749_v4 = vadd.f32 (!%p3557_p4), %v1685_v54, %v4463_v27  ;;  %v1750_v7 = vadd.f32 (!%p3557_p4), %v1686_v56, %v4363_v39  ;;  %v1688_v9 = vld [vmem:[#allocation2 + $0x90] sm:$0xff] (!%p3557_p4) }
 0x1c2   : > { %1808 = vst [vmem:[#allocation2 + $0x50] sm:$0xff] %v1744_v53  ;;  %1809 = vst [vmem:[#allocation2 + $0x58] sm:$0xff] %v1745_v44  ;;  %v1751_v8 = vadd.f32 %v1687_v2, %v4367_v41  ;;  %v1689_v10 = vld [vmem:[#allocation2 + $0x98] sm:$0xff]  ;;  %v1690_v21 = vld [vmem:[#allocation2 + $0xa0] sm:$0xff]  ;;  %v1752_v23 = vadd.f32 %v1688_v9, %v4365_v40 }
 0x1c3   : > { %1810 = vst [vmem:[#allocation2 + $0x60] sm:$0xff] %v1746_v49  ;;  %1811 = vst [vmem:[#allocation2 + $0x68] sm:$0xff] %v1747_v50  ;;  %v1753_v24 = vadd.f32 %v1689_v10, %v4369_v42  ;;  %v1754_v25 = vadd.f32 %v1690_v21, %v4401_v57  ;;  %v1691_v26 = vld [vmem:[#allocation2 + $0xa8] sm:$0xff]  ;;  %v1692_v3 = vld [vmem:[#allocation2 + $0xb0] sm:$0xff] }
 0x1c4   : > { %1812 = vst [vmem:[#allocation2 + $0x70] sm:$0xff] %v1748_v51  ;;  %v1693_v19 = vld [vmem:[#allocation2 + $0xb8] sm:$0xff]  ;;  %1813 = vst [vmem:[#allocation2 + $0x78] sm:$0xff] %v1749_v4  ;;  %v1755_v39 = vadd.f32 %v1691_v26, %v4405_v59  ;;  %v1756_v41 = vadd.f32 %v1692_v3, %v4403_v58  ;;  %v1694_v0 = vld [vmem:[#allocation2 + $0xc0] sm:$0xff] }
 0x1c5   : > { %1814 = vst [vmem:[#allocation2 + $0x80] sm:$0xff] %v1750_v7  ;;  %1815 = vst [vmem:[#allocation2 + $0x88] sm:$0xff] %v1751_v8  ;;  %v1757_v27 = vadd.f32 %v1693_v19, %v4407_v60  ;;  %v1695_v22 = vld [vmem:[#allocation2 + $0xc8] sm:$0xff]  ;;  %v1696_v37 = vld [vmem:[#allocation2 + $0xd0] sm:$0xff]  ;;  %v1758_v40 = vadd.f32 %v1694_v0, %v4433_v11 }
 0x1c6   : > { %1816 = vst [vmem:[#allocation2 + $0x90] sm:$0xff] %v1752_v23  ;;  %1817 = vst [vmem:[#allocation2 + $0x98] sm:$0xff] %v1753_v24  ;;  %v1759_v42 = vadd.f32 %v1695_v22, %v4437_v13  ;;  %v1760_v57 = vadd.f32 %v1696_v37, %v4435_v12  ;;  %v1697_v52 = vld [vmem:[#allocation2 + $0xd8] sm:$0xff]  ;;  %v1698_v35 = vld [vmem:[#allocation2 + $0xe0] sm:$0xff] }
 0x1c7   : > { %1818 = vst [vmem:[#allocation2 + $0xa0] sm:$0xff] %v1754_v25  ;;  %v1699_v36 = vld [vmem:[#allocation2 + $0xe8] sm:$0xff]  ;;  %1819 = vst [vmem:[#allocation2 + $0xa8] sm:$0xff] %v1755_v39  ;;  %v1761_v58 = vadd.f32 %v1697_v52, %v4439_v14  ;;  %v1762_v59 = vadd.f32 %v1698_v35, %v4465_v28  ;;  %v1700_v38 = vld [vmem:[#allocation2 + $0xf0] sm:$0xff] }
 0x1c8   : > { %1820 = vst [vmem:[#allocation2 + $0xb0] sm:$0xff] %v1756_v41  ;;  %1821 = vst [vmem:[#allocation2 + $0xb8] sm:$0xff] %v1757_v27  ;;  %v1763_v60 = vadd.f32 %v1699_v36, %v4469_v30  ;;  %v1701_v53 = vld [vmem:[#allocation2 + $0xf8] sm:$0xff]  ;;  %v1702_v44 = vld [vmem:[#allocation2 + $0x100] sm:$0xff]  ;;  %v1764_v11 = vadd.f32 %v1700_v38, %v4467_v29 }
 0x1c9   : > { %1822 = vst [vmem:[#allocation2 + $0xc0] sm:$0xff] %v1758_v40  ;;  %1823 = vst [vmem:[#allocation2 + $0xc8] sm:$0xff] %v1759_v42  ;;  %v1765_v12 = vadd.f32 %v1701_v53, %v4471_v31  ;;  %v1766_v13 = vadd.f32 %v1702_v44, %v4373_v43  ;;  %v1703_v55 = vld [vmem:[#allocation2 + $0x108] sm:$0xff]  ;;  %v1704_v6 = vld [vmem:[#allocation2 + $0x110] sm:$0xff] }
 0x1ca   : > { %1824 = vst [vmem:[#allocation2 + $0xd0] sm:$0xff] %v1760_v57  ;;  %v1705_v20 = vld [vmem:[#allocation2 + $0x118] sm:$0xff]  ;;  %1825 = vst [vmem:[#allocation2 + $0xd8] sm:$0xff] %v1761_v58  ;;  %v1767_v14 = vadd.f32 %v1703_v55, %v4378_v46  ;;  %v1768_v28 = vadd.f32 %v1704_v6, %v4376_v45  ;;  %v1706_v49 = vld [vmem:[#allocation2 + $0x120] sm:$0xff] }
 0x1cb   : > { %1826 = vst [vmem:[#allocation2 + $0xe0] sm:$0xff] %v1762_v59  ;;  %1827 = vst [vmem:[#allocation2 + $0xe8] sm:$0xff] %v1763_v60  ;;  %v1769_v30 = vadd.f32 %v1705_v20, %v4380_v47  ;;  %v1707_v50 = vld [vmem:[#allocation2 + $0x128] sm:$0xff]  ;;  %v1708_v51 = vld [vmem:[#allocation2 + $0x130] sm:$0xff]  ;;  %v1770_v43 = vadd.f32 %v1706_v49, %v4409_v61 }
 0x1cc   : > { %1828 = vst [vmem:[#allocation2 + $0xf0] sm:$0xff] %v1764_v11  ;;  %1829 = vst [vmem:[#allocation2 + $0xf8] sm:$0xff] %v1765_v12  ;;  %v1771_v29 = vadd.f32 %v1707_v50, %v4413_v63  ;;  %v1772_v31 = vadd.f32 %v1708_v51, %v4411_v62  ;;  %v1709_v54 = vld [vmem:[#allocation2 + $0x138] sm:$0xff]  ;;  %v1710_v56 = vld [vmem:[#allocation2 + $0x140] sm:$0xff] }
 0x1cd   : > { %1830 = vst [vmem:[#allocation2 + $0x100] sm:$0xff] %v1766_v13  ;;  %v1711_v2 = vld [vmem:[#allocation2 + $0x148] sm:$0xff]  ;;  %1831 = vst [vmem:[#allocation2 + $0x108] sm:$0xff] %v1767_v14  ;;  %v1773_v45 = vadd.f32 %v1709_v54, %v4415_v1  ;;  %v1774_v46 = vadd.f32 %v1710_v56, %v4441_v15  ;;  %v1712_v4 = vld [vmem:[#allocation2 + $0x150] sm:$0xff] }
 0x1ce   : > { %1832 = vst [vmem:[#allocation2 + $0x110] sm:$0xff] %v1768_v28  ;;  %1833 = vst [vmem:[#allocation2 + $0x118] sm:$0xff] %v1769_v30  ;;  %v1775_v47 = vadd.f32 %v1711_v2, %v4445_v17  ;;  %v1713_v7 = vld [vmem:[#allocation2 + $0x158] sm:$0xff]  ;;  %v1714_v8 = vld [vmem:[#allocation2 + $0x160] sm:$0xff]  ;;  %v1776_v61 = vadd.f32 %v1712_v4, %v4443_v16 }
 0x1cf   : > { %1834 = vst [vmem:[#allocation2 + $0x120] sm:$0xff] %v1770_v43  ;;  %1835 = vst [vmem:[#allocation2 + $0x128] sm:$0xff] %v1771_v29  ;;  %v1777_v62 = vadd.f32 %v1713_v7, %v4447_v18  ;;  %v1778_v63 = vadd.f32 %v1714_v8, %v4473_v32  ;;  %v1715_v9 = vld [vmem:[#allocation2 + $0x168] sm:$0xff]  ;;  %v1716_v10 = vld [vmem:[#allocation2 + $0x170] sm:$0xff] }
 0x1d0   : > { %1836 = vst [vmem:[#allocation2 + $0x130] sm:$0xff] %v1772_v31  ;;  %v1717_v21 = vld [vmem:[#allocation2 + $0x178] sm:$0xff]  ;;  %1837 = vst [vmem:[#allocation2 + $0x138] sm:$0xff] %v1773_v45  ;;  %v1779_v1 = vadd.f32 %v1715_v9, %v4477_v34  ;;  %v1780_v15 = vadd.f32 %v1716_v10, %v4475_v33  ;;  %v1718_v23 = vld [vmem:[#allocation2 + $0x180] sm:$0xff]  ;;  %v5354_v45 = vstv %s4371_s14 }
 0x1d1   : > { %1838 = vst [vmem:[#allocation2 + $0x140] sm:$0xff] %v1774_v46  ;;  %1839 = vst [vmem:[#allocation2 + $0x148] sm:$0xff] %v1775_v47  ;;  %v1781_v17 = vadd.f32 %v1717_v21, %v4479_v5  ;;  %v1719_v24 = vld [vmem:[#allocation2 + $0x188] sm:$0xff]  ;;  %v1720_v25 = vld [vmem:[#allocation2 + $0x190] sm:$0xff]  ;;  %v1782_v16 = vadd.f32 %v1718_v23, %v4382_v48  ;;  %v5355_v47 = vstv %s4388_s15 }
 0x1d2   : > { %1840 = vst [vmem:[#allocation2 + $0x150] sm:$0xff] %v1776_v61  ;;  %1841 = vst [vmem:[#allocation2 + $0x158] sm:$0xff] %v1777_v62  ;;  %v5339_v18 = vld [vmem:[#allocation14_spill] sm:$0xff]  ;;  %v5340_v26 = vld [vmem:[#allocation13_spill] sm:$0xff] }
 0x1d3   : > { %1842 = vst [vmem:[#allocation2 + $0x160] sm:$0xff] %v1778_v63  ;;  %v1783_v32 = vadd.f32 %v1719_v24, %v5339_v18  ;;  %v1784_v3 = vadd.f32 %v1720_v25, %v5340_v26  ;;  %v1721_v19 = vld [vmem:[#allocation2 + $0x198] sm:$0xff]  ;;  %v1722_v39 = vld [vmem:[#allocation2 + $0x1a0] sm:$0xff]  ;;  %v1723_v41 = vld [vmem:[#allocation2 + $0x1a8] sm:$0xff] }
 0x1d4   : > { %1843 = vst [vmem:[#allocation2 + $0x168] sm:$0xff] %v1779_v1  ;;  %1844 = vst [vmem:[#allocation2 + $0x170] sm:$0xff] %v1780_v15  ;;  %v5341_v33 = vld [vmem:[#allocation15_spill] sm:$0xff]  ;;  %v5342_v5 = vld [vmem:[#allocation16_spill] sm:$0xff] }
 0x1d5   : > { %1845 = vst [vmem:[#allocation2 + $0x178] sm:$0xff] %v1781_v17  ;;  %v1785_v34 = vadd.f32 %v1721_v19, %v5341_v33  ;;  %v1786_v27 = vadd.f32 %v1722_v39, %v5342_v5  ;;  %v5343_v0 = vld [vmem:[#allocation18_spill] sm:$0xff]  ;;  %v1724_v37 = vld [vmem:[#allocation2 + $0x1b0] sm:$0xff]  ;;  %v1725_v40 = vld [vmem:[#allocation2 + $0x1b8] sm:$0xff] }
 0x1d6   : > { %v1787_v22 = vadd.f32 %v1723_v41, %v5343_v0  ;;  %v1726_v42 = vld [vmem:[#allocation2 + $0x1c0] sm:$0xff]  ;;  %1846 = vst [vmem:[#allocation2 + $0x180] sm:$0xff] %v1782_v16  ;;  %1847 = vst [vmem:[#allocation2 + $0x188] sm:$0xff] %v1783_v32  ;;  %v5345_v52 = vld [vmem:[#allocation19_spill] sm:$0xff] }
 0x1d7   : > { %1848 = vst [vmem:[#allocation2 + $0x190] sm:$0xff] %v1784_v3  ;;  %v5344_v48 = vld [vmem:[#allocation17_spill] sm:$0xff]  ;;  %v1789_v35 = vadd.f32 %v1725_v40, %v5345_v52  ;;  %v5346_v36 = vld [vmem:[#allocation20_spill] sm:$0xff]  ;;  %v1727_v59 = vld [vmem:[#allocation2 + $0x1c8] sm:$0xff] }
 0x1d8   : > { %v1788_v57 = vadd.f32 %v1724_v37, %v5344_v48  ;;  %v1790_v58 = vadd.f32 %v1726_v42, %v5346_v36  ;;  %v1728_v60 = vld [vmem:[#allocation2 + $0x1d0] sm:$0xff]  ;;  %v1729_v38 = vld [vmem:[#allocation2 + $0x1d8] sm:$0xff]  ;;  %1849 = vst [vmem:[#allocation2 + $0x198] sm:$0xff] %v1785_v34  ;;  %1850 = vst [vmem:[#allocation2 + $0x1a0] sm:$0xff] %v1786_v27 }
 0x1d9   : > { %1851 = vst [vmem:[#allocation2 + $0x1a8] sm:$0xff] %v1787_v22  ;;  %v5347_v53 = vld [vmem:[#allocation22_spill] sm:$0xff]  ;;  %v5348_v11 = vld [vmem:[#allocation21_spill] sm:$0xff]  ;;  %v5349_v13 = vld [vmem:[#allocation23_spill] sm:$0xff] }
 0x1da   : > { %v1791_v44 = vadd.f32 %v1727_v59, %v5347_v53  ;;  %v1792_v12 = vadd.f32 %v1728_v60, %v5348_v11  ;;  %v1793_v55 = vadd.f32 %v1729_v38, %v5349_v13  ;;  %v1730_v6 = vld [vmem:[#allocation2 + $0x1e0] sm:$0xff]  ;;  %v1731_v20 = vld [vmem:[#allocation2 + $0x1e8] sm:$0xff]  ;;  %v1732_v14 = vld [vmem:[#allocation2 + $0x1f0] sm:$0xff]  ;;  %1852 = vst [vmem:[#allocation2 + $0x1b0] sm:$0xff] %v1788_v57 }
 0x1db   : > { %1853 = vst [vmem:[#allocation2 + $0x1b8] sm:$0xff] %v1789_v35  ;;  %1854 = vst [vmem:[#allocation2 + $0x1c0] sm:$0xff] %v1790_v58  ;;  %v5350_v28 = vld [vmem:[#allocation24_spill] sm:$0xff]  ;;  %v5351_v49 = vld [vmem:[#allocation26_spill] sm:$0xff] }
 0x1dc   : > { %v1794_v30 = vadd.f32 %v1730_v6, %v5350_v28  ;;  %v1795_v50 = vadd.f32 %v1731_v20, %v5351_v49  ;;  %v5352_v51 = vld [vmem:[#allocation25_spill] sm:$0xff]  ;;  %v1733_v29 = vld [vmem:[#allocation2 + $0x1f8] sm:$0xff]  ;;  %1855 = vst [vmem:[#allocation2 + $0x1c8] sm:$0xff] %v1791_v44  ;;  %1856 = vst [vmem:[#allocation2 + $0x1d0] sm:$0xff] %v1792_v12 }
 0x1dd   : > { %v1796_v43 = vadd.f32 %v1732_v14, %v5352_v51  ;;  %v1862_v31 = vld [vmem:[%s5298_s6] sm:$0x1]  ;;  %v1863_v54 = vld [vmem:[%s5298_s6 + $0x1] sm:$0x1]  ;;  %1857 = vst [vmem:[#allocation2 + $0x1d8] sm:$0xff] %v1793_v55  ;;  %v5353_v56 = vld [vmem:[#allocation27_spill] sm:$0xff] }
 0x1de   : > { %v1797_v2 = vadd.f32 %v1733_v29, %v5353_v56  ;;  %v1864_v46 = vadd.f32 %v1862_v31, %v5354_v45  ;;  %v1865_v4 = vadd.f32 %v1863_v54, %v5355_v47  ;;  %1858 = vst [vmem:[#allocation2 + $0x1e0] sm:$0xff] %v1794_v30  ;;  %1859 = vst [vmem:[#allocation2 + $0x1e8] sm:$0xff] %v1795_v50 }
 0x1df   : > { %1860 = vst [vmem:[#allocation2 + $0x1f0] sm:$0xff] %v1796_v43 }
 0x1e0   : > { %1861 = vst [vmem:[#allocation2 + $0x1f8] sm:$0xff] %v1797_v2  ;;  %1867 = vst.msk [vmem:[%s5298_s6] sm:$0x1] %vm1866_vm1, %v1864_v46 }
 0x1e1   : > { %1868 = vst.msk [vmem:[%s5298_s6 + $0x1] sm:$0x1] %vm1866_vm1, %v1865_v4 }
 0x1e2 PF: > { %p3558_p8 = scmp.ne.s32.totalorder %s3959_s24, 1 }
 0x1e3   : > { %v2024_v7 = vlaneseq (!%p3558_p8)  ;;  %v3976_v63 = vmov (!%p3558_p8), 1983009808   ;;  %v3977_v10 = vmov (!%p3558_p8), 0.0   ;;  %v1889_v17 = vld [vmem:[#allocation2 + $0x80] sm:$0xff] (!%p3558_p8)  ;;  %v1890_v23 = vld [vmem:[#allocation2 + $0x88] sm:$0xff] (!%p3558_p8)  ;;  %v1891_v32 = vld [vmem:[#allocation2 + $0x90] sm:$0xff] (!%p3558_p8) }
 0x1e4   : > { %1872 = sbr.rel (%p3558_p8) target bundleno = 669 (0x29d), region = 60  ;;  %v1873_v8 = vld [vmem:[#allocation2] sm:$0xff] (!%p3558_p8)  ;;  %v4646_v61 = vld [vmem:[#allocation2 + $0x8] sm:$0xff] (!%p3558_p8)  ;;  %v4650_v9 = vunpack.c.l.s4 (!%p3558_p8), %v3976_v63  ;;  %2020 = vst [vmem:[#allocation3 + $0x80] sm:$0x1f] (!%p3558_p8), %v3977_v10  ;;  %v1892_v26 = vld [vmem:[#allocation2 + $0x98] sm:$0xff] (!%p3558_p8)  ;;  %v1987_v39 = vcombine.low (!%p3558_p8), %v1889_v17, %v1890_v23  ;;  %v3563_v41 = vcombine.low (!%p3558_p8), %v1890_v23, %v1890_v23  ;;  %v1988_v22 = vcombine.high (!%p3558_p8), %v1889_v17, %v1890_v23 }
 0x1e5   : > { %v4648_v62 = vld [vmem:[#allocation2 + $0x10] sm:$0xff] (!%p3558_p8)  ;;  %2021 = vst [vmem:[#allocation3 + $0x88] sm:$0x1f] (!%p3558_p8), %v3977_v10  ;;  %2022 = vst [vmem:[#allocation3 + $0x90] sm:$0x1f] (!%p3558_p8), %v3977_v10  ;;  %v1972_v21 = vcombine.high (!%p3558_p8), %v1873_v8, %v4646_v61  ;;  %v3561_v1 = vcombine.high (!%p3558_p8), %v4646_v61, %v4646_v61  ;;  %v4659_v15 = vld [vmem:[#allocation2 + $0x18] sm:$0xff] (!%p3558_p8)  ;;  %v1971_v24 = vcombine.low (!%p3558_p8), %v1873_v8, %v4646_v61 }
 0x1e6   : > { %2023 = vst [vmem:[#allocation3 + $0x98] sm:$0x1f] (!%p3558_p8), %v3977_v10  ;;  %vm4662_vm2 = vcmp.lt.s32.totalorder (!%p3558_p8), %v2024_v7, 512  ;;  %v1974_v16 = vcombine.high (!%p3558_p8), %v4648_v62, %v4659_v15  ;;  %v3562_v18 = vcombine.high (!%p3558_p8), %v4659_v15, %v4659_v15  ;;  %v4670_v3 = vld [vmem:[#allocation2 + $0x20] sm:$0xff] (!%p3558_p8)  ;;  %v4675_v19 = vshrl.u32 (!%p3558_p8), %v2024_v7, 7  ;;  %v4689_v34 = vld [vmem:[#allocation2 + $0x28] sm:$0xff] (!%p3558_p8) }
 0x1e7   : > { %2032 = vst.msk [vmem:[#allocation3 + $0x24] ss:$8 sm:$0xf] (!%p3558_p8), %vm4662_vm2, %v3977_v10  ;;  %2029 = vst.msk [vmem:[#allocation3 + $0x4] ss:$8 sm:$0xf] (!%p3558_p8), %vm4662_vm2, %v3977_v10  ;;  %v1989_v33 = vcombine.low (!%p3558_p8), %v1891_v32, %v1892_v26  ;;  %v3564_v0 = vcombine.low (!%p3558_p8), %v1892_v26, %v1892_v26  ;;  %v3565_v37 = vcombine.high (!%p3558_p8), %v1890_v23, %v1890_v23  ;;  %v2378_v52 = vunpack.c.0.s8 (!%p3558_p8), %v4650_v9 }
 0x1e8   : > { %2035 = vst.msk [vmem:[#allocation3 + $0x44] ss:$8 sm:$0xf] (!%p3558_p8), %vm4662_vm2, %v3977_v10  ;;  %2038 = vst.msk [vmem:[#allocation3 + $0x64] ss:$8 sm:$0xf] (!%p3558_p8), %vm4662_vm2, %v3977_v10  ;;  %v1990_v40 = vcombine.high (!%p3558_p8), %v1891_v32, %v1892_v26  ;;  %v3566_v35 = vcombine.high (!%p3558_p8), %v1892_v26, %v1892_v26  ;;  %v1976_v36 = vcombine.high (!%p3558_p8), %v4670_v3, %v4689_v34 }
 0x1e9   : > { %2041 = vst.msk [vmem:[#allocation3 + $0x84] ss:$8 sm:$0xf] (!%p3558_p8), %vm4662_vm2, %v3977_v10  ;;  %2063 = vst [vmem:[#allocation3 + $0x20] sm:$0xf] (!%p3558_p8), %v1972_v21  ;;  %v4691_v5 = vld [vmem:[#allocation2 + $0x30] sm:$0xff] (!%p3558_p8)  ;;  %v3569_v58 = vcombine.high (!%p3558_p8), %v4689_v34, %v4689_v34 }
 0x1ea   : > { %2064 = vst [vmem:[#allocation3 + $0x28] sm:$0xf] (!%p3558_p8), %v3561_v1  ;;  %v4693_v27 = vld [vmem:[#allocation2 + $0x38] sm:$0xff] (!%p3558_p8)  ;;  %2059 = vst [vmem:[#allocation3] sm:$0xf] (!%p3558_p8), %v1971_v24  ;;  %v1893_v42 = vld [vmem:[#allocation2 + $0xa0] sm:$0xff] (!%p3558_p8) }
 0x1eb   : > { %2065 = vst [vmem:[#allocation3 + $0x30] sm:$0xf] %v1974_v16  ;;  %2066 = vst [vmem:[#allocation3 + $0x38] sm:$0xf] %v3562_v18  ;;  %v1894_v48 = vld [vmem:[#allocation2 + $0xa8] sm:$0xff]  ;;  %v4695_v57 = vld [vmem:[#allocation2 + $0xb0] sm:$0xff]  ;;  %v1978_v60 = vcombine.high %v4691_v5, %v4693_v27  ;;  %v3570_v38 = vcombine.high %v4693_v27, %v4693_v27 }
 0x1ec   : > { %2067 = vst [vmem:[#allocation3 + $0x40] sm:$0xf] %v1987_v39  ;;  %2068 = vst [vmem:[#allocation3 + $0x48] sm:$0xf] %v3563_v41  ;;  %v4702_v59 = vld [vmem:[#allocation2 + $0xb8] sm:$0xff]  ;;  %v1991_v53 = vcombine.low %v1893_v42, %v1894_v48  ;;  %v3571_v44 = vcombine.low %v1894_v48, %v1894_v48  ;;  %v2103_v11 = vrot.slane %v1976_v36, 7  ;;  %v1992_v43 = vcombine.high %v1893_v42, %v1894_v48 }
 0x1ed   : > { %2069 = vst [vmem:[#allocation3 + $0x50] sm:$0xf] %v1989_v33  ;;  %2070 = vst [vmem:[#allocation3 + $0x58] sm:$0xf] %v3564_v0  ;;  %v2104_v12 = vrot.slane %v3569_v58, 7  ;;  %v1993_v13 = vcombine.low %v4695_v57, %v4702_v59  ;;  %v3572_v55 = vcombine.low %v4702_v59, %v4702_v59  ;;  %v4712_v6 = vld [vmem:[#allocation2 + $0x40] sm:$0xff]  ;;  %v3573_v29 = vcombine.high %v1894_v48, %v1894_v48 }
 0x1ee   : > { %2071 = vst [vmem:[#allocation3 + $0x60] sm:$0xf] %v1988_v22  ;;  %2072 = vst [vmem:[#allocation3 + $0x68] sm:$0xf] %v3565_v37  ;;  %v4714_v20 = vld [vmem:[#allocation2 + $0x48] sm:$0xff]  ;;  %v2105_v14 = vrot.slane %v1978_v60, 7  ;;  %v1994_v45 = vcombine.high %v4695_v57, %v4702_v59  ;;  %v3574_v46 = vcombine.high %v4702_v59, %v4702_v59 }
 0x1ef   : > { %2073 = vst [vmem:[#allocation3 + $0x70] sm:$0xf] %v1990_v40  ;;  %2074 = vst [vmem:[#allocation3 + $0x78] sm:$0xf] %v3566_v35  ;;  %v2106_v28 = vrot.slane %v3570_v38, 7  ;;  %v2107_v30 = vrot.slane %v1991_v53, 7  ;;  %v1979_v47 = vcombine.low %v4712_v6, %v4714_v20  ;;  %v3575_v4 = vcombine.low %v4714_v20, %v4714_v20 }
 0x1f0   : > { %v2108_v49 = vrot.slane %v3571_v44, 7  ;;  %v2109_v50 = vrot.slane %v1993_v13, 7  ;;  %v2110_v51 = vrot.slane %v3572_v55, 7  ;;  %v4716_v31 = vld [vmem:[#allocation2 + $0x50] sm:$0xff]  ;;  %v4718_v54 = vld [vmem:[#allocation2 + $0x58] sm:$0xff]  ;;  %v2111_v1 = vrot.slane %v1992_v43, 7 }
 0x1f1   : > { %v2079_v56 = vld [vmem:[#allocation3 + $0x20] sm:$0x1e]  ;;  %v2080_v2 = vld [vmem:[#allocation3 + $0x28] sm:$0x1e]  ;;  %v2112_v17 = vrot.slane %v3573_v29, 7  ;;  %v4732_v16 = vld [vmem:[#allocation2 + $0xd0] sm:$0xff]  ;;  %v1981_v0 = vcombine.low %v4716_v31, %v4718_v54  ;;  %v3576_v22 = vcombine.low %v4718_v54, %v4718_v54  ;;  %v1980_v36 = vcombine.high %v4712_v6, %v4714_v20 }
 0x1f2   : > { %v2135_v7 = vadd.f32 %v2103_v11, %v2079_v56  ;;  %v2136_v8 = vadd.f32 %v2104_v12, %v2080_v2  ;;  %v2081_v63 = vld [vmem:[#allocation3 + $0x30] sm:$0x1e]  ;;  %v2082_v21 = vld [vmem:[#allocation3 + $0x38] sm:$0x1e]  ;;  %v4728_v23 = vld [vmem:[#allocation2 + $0xc0] sm:$0xff]  ;;  %v2113_v53 = vrot.slane %v1994_v45, 7  ;;  %v3577_v12 = vcombine.high %v4714_v20, %v4714_v20 }
 0x1f3   : > { %v4730_v24 = vld [vmem:[#allocation2 + $0xc8] sm:$0xff]  ;;  %v4734_v18 = vld [vmem:[#allocation2 + $0xd8] sm:$0xff]  ;;  %v2137_v32 = vadd.f32 %v2105_v14, %v2081_v63  ;;  %v2138_v26 = vadd.f32 %v2106_v28, %v2082_v21  ;;  %v2083_v39 = vld [vmem:[#allocation3 + $0x40] sm:$0x1e]  ;;  %v2114_v11 = vrot.slane %v3574_v46, 7  ;;  %v1982_v13 = vcombine.high %v4716_v31, %v4718_v54 }
 0x1f4   : > { %v2084_v41 = vld [vmem:[#allocation3 + $0x48] sm:$0x1e]  ;;  %v2085_v33 = vld [vmem:[#allocation3 + $0x50] sm:$0x1e]  ;;  %2151 = vst [vmem:[#allocation3 + $0x20] sm:$0x1e] %v2135_v7  ;;  %v2139_v37 = vadd.f32 %v2107_v30, %v2083_v39  ;;  %v3578_v55 = vcombine.high %v4718_v54, %v4718_v54  ;;  %v1997_v43 = vcombine.low %v4732_v16, %v4734_v18  ;;  %v3580_v46 = vcombine.low %v4734_v18, %v4734_v18 }
 0x1f5   : > { %2152 = vst [vmem:[#allocation3 + $0x28] sm:$0x1e] %v2136_v8  ;;  %v2140_v40 = vadd.f32 %v2108_v49, %v2084_v41  ;;  %v2141_v42 = vadd.f32 %v2109_v50, %v2085_v33  ;;  %v2086_v48 = vld [vmem:[#allocation3 + $0x58] sm:$0x1e]  ;;  %v2087_v57 = vld [vmem:[#allocation3 + $0x60] sm:$0x1e]  ;;  %v1995_v50 = vcombine.low %v4728_v23, %v4730_v24  ;;  %v3582_v7 = vcombine.high %v4734_v18, %v4734_v18 }
 0x1f6   : > { %v2088_v35 = vld [vmem:[#allocation3 + $0x68] sm:$0x1e]  ;;  %2153 = vst [vmem:[#allocation3 + $0x30] sm:$0x1e] %v2137_v32  ;;  %2154 = vst [vmem:[#allocation3 + $0x38] sm:$0x1e] %v2138_v26  ;;  %v2142_v58 = vadd.f32 %v2110_v51, %v2086_v48  ;;  %v2143_v59 = vadd.f32 %v2111_v1, %v2087_v57  ;;  %v3579_v51 = vcombine.low %v4730_v24, %v4730_v24 }
 0x1f7   : > { %v2144_v60 = vadd.f32 %v2112_v17, %v2088_v35  ;;  %v2089_v38 = vld [vmem:[#allocation3 + $0x70] sm:$0x1e]  ;;  %v2090_v44 = vld [vmem:[#allocation3 + $0x78] sm:$0x1e]  ;;  %2155 = vst [vmem:[#allocation3 + $0x40] sm:$0x1e] %v2139_v37  ;;  %v1998_v8 = vcombine.high %v4732_v16, %v4734_v18  ;;  %v1996_v1 = vcombine.high %v4728_v23, %v4730_v24  ;;  %v3581_v17 = vcombine.high %v4730_v24, %v4730_v24 }
 0x1f8   : > { %2156 = vst [vmem:[#allocation3 + $0x48] sm:$0x1e] %v2140_v40  ;;  %2157 = vst [vmem:[#allocation3 + $0x50] sm:$0x1e] %v2141_v42  ;;  %v2179_v14 = vld [vmem:[#allocation3 + $0x98] sm:$0xf]  ;;  %v2145_v49 = vadd.f32 %v2113_v53, %v2089_v38  ;;  %v2146_v45 = vadd.f32 %v2114_v11, %v2090_v44 }
 0x1f9   : > { %v4748_v28 = vld [vmem:[#allocation2 + $0x60] sm:$0xff]  ;;  %v4750_v30 = vld [vmem:[#allocation2 + $0x68] sm:$0xff]  ;;  %2158 = vst [vmem:[#allocation3 + $0x58] sm:$0x1e] %v2142_v58  ;;  %2159 = vst [vmem:[#allocation3 + $0x60] sm:$0x1e] %v2143_v59  ;;  %v2211_v39 = vadd.f32 %v3582_v7, %v2179_v14 }
 0x1fa   : > { %2160 = vst [vmem:[#allocation3 + $0x68] sm:$0x1e] %v2144_v60  ;;  %v2178_v29 = vld [vmem:[#allocation3 + $0x90] sm:$0xf]  ;;  %v4760_v2 = vld [vmem:[#allocation2 + $0x78] sm:$0xff]  ;;  %v1983_v32 = vcombine.low %v4748_v28, %v4750_v30  ;;  %v3583_v26 = vcombine.low %v4750_v30, %v4750_v30  ;;  %v4784_v35 = vld [vmem:[#allocation2 + $0xe0] sm:$0xff] }
 0x1fb   : > { %v4758_v56 = vld [vmem:[#allocation2 + $0x70] sm:$0xff]  ;;  %v2176_v63 = vld [vmem:[#allocation3 + $0x80] sm:$0xf]  ;;  %v2177_v21 = vld [vmem:[#allocation3 + $0x88] sm:$0xf]  ;;  %v2210_v41 = vadd.f32 %v2178_v29, %v1998_v8  ;;  %v3584_v37 = vcombine.low %v4760_v2, %v4760_v2  ;;  %v1984_v8 = vcombine.high %v4748_v28, %v4750_v30 }
 0x1fc   : > { %2161 = vst [vmem:[#allocation3 + $0x70] sm:$0x1e] %v2145_v49  ;;  %2162 = vst [vmem:[#allocation3 + $0x78] sm:$0x1e] %v2146_v45  ;;  %v1985_v33 = vcombine.low %v4758_v56, %v4760_v2  ;;  %v2164_v40 = vld [vmem:[#allocation3 + $0x20] sm:$0xf]  ;;  %v2208_v42 = vadd.f32 %v2176_v63, %v1996_v1  ;;  %v2209_v48 = vadd.f32 %v3581_v17, %v2177_v21 }
 0x1fd   : > { %v2165_v23 = vld [vmem:[#allocation3 + $0x28] sm:$0xf]  ;;  %v4780_v24 = vrot.slane %v1983_v32, 7  ;;  %v4782_v57 = vrot.slane %v3583_v26, 7  ;;  %v2196_v59 = vadd.f32 %v2164_v40, %v1979_v47  ;;  %v2166_v38 = vld [vmem:[#allocation3 + $0x30] sm:$0xf]  ;;  %v3585_v63 = vcombine.high %v4750_v30, %v4750_v30 }
 0x1fe   : > { %v4786_v58 = vld [vmem:[#allocation2 + $0xe8] sm:$0xff]  ;;  %v2197_v60 = vadd.f32 %v3575_v4, %v2165_v23  ;;  %v2167_v53 = vld [vmem:[#allocation3 + $0x38] sm:$0xf]  ;;  %2227 = vst [vmem:[#allocation3 + $0x98] sm:$0xf] %v2211_v39  ;;  %v4794_v44 = vrot.slane %v1985_v33, 7  ;;  %v2198_v47 = vadd.f32 %v2166_v38, %v1981_v0  ;;  %v1986_v32 = vcombine.high %v4758_v56, %v4760_v2 }
 0x1ff   : > { %2226 = vst [vmem:[#allocation3 + $0x90] sm:$0xf] %v2210_v41  ;;  %v4796_v11 = vrot.slane %v3584_v37, 7  ;;  %v4798_v14 = vld [vmem:[#allocation2 + $0xf0] sm:$0xff]  ;;  %v4800_v49 = vld [vmem:[#allocation2 + $0xf8] sm:$0xff]  ;;  %v2199_v4 = vadd.f32 %v3576_v22, %v2167_v53  ;;  %v2256_v39 = vrot.slane %v1984_v8, 7 }
 0x200   : > { %v2168_v29 = vld [vmem:[#allocation3 + $0x40] sm:$0xf]  ;;  %v2169_v45 = vld [vmem:[#allocation3 + $0x48] sm:$0xf]  ;;  %v2170_v7 = vld [vmem:[#allocation3 + $0x50] sm:$0xf]  ;;  %v3588_v33 = vcombine.low %v4800_v49, %v4800_v49  ;;  %v3590_v18 = vcombine.high %v4800_v49, %v4800_v49 }
 0x201   : > { %2224 = vst [vmem:[#allocation3 + $0x80] sm:$0xf] %v2208_v42  ;;  %2225 = vst [vmem:[#allocation3 + $0x88] sm:$0xf] %v2209_v48  ;;  %v2200_v31 = vadd.f32 %v2168_v29, %v1980_v36  ;;  %v2201_v0 = vadd.f32 %v3577_v12, %v2169_v45  ;;  %v2202_v21 = vadd.f32 %v2170_v7, %v1982_v13  ;;  %v2171_v22 = vld [vmem:[#allocation3 + $0x58] sm:$0xf] }
 0x202   : > { %2212 = vst [vmem:[#allocation3 + $0x20] sm:$0xf] %v2196_v59  ;;  %2213 = vst [vmem:[#allocation3 + $0x28] sm:$0xf] %v2197_v60  ;;  %v2172_v1 = vld [vmem:[#allocation3 + $0x60] sm:$0xf]  ;;  %v2203_v28 = vadd.f32 %v3578_v55, %v2171_v22  ;;  %v3586_v12 = vcombine.high %v4760_v2, %v4760_v2  ;;  %v1999_v13 = vcombine.low %v4784_v35, %v4786_v58 }
 0x203   : > { %v2173_v17 = vld [vmem:[#allocation3 + $0x68] sm:$0xf]  ;;  %2214 = vst [vmem:[#allocation3 + $0x30] sm:$0xf] %v2198_v47  ;;  %2215 = vst [vmem:[#allocation3 + $0x38] sm:$0xf] %v2199_v4  ;;  %v2204_v30 = vadd.f32 %v2172_v1, %v1995_v50  ;;  %v2001_v2 = vcombine.low %v4798_v14, %v4800_v49  ;;  %v3559_v42 = vcombine.low %v4646_v61, %v4646_v61 }
 0x204   : > { %v2205_v26 = vadd.f32 %v3579_v51, %v2173_v17  ;;  %v4820_v41 = vld [vmem:[#allocation2 + $0x100] sm:$0xff]  ;;  %2216 = vst [vmem:[#allocation3 + $0x40] sm:$0xf] %v2200_v31  ;;  %2217 = vst [vmem:[#allocation3 + $0x48] sm:$0xf] %v2201_v0  ;;  %v2257_v20 = vrot.slane %v3585_v63, 7  ;;  %v3587_v51 = vcombine.low %v4786_v58, %v4786_v58 }
 0x205   : > { %2218 = vst [vmem:[#allocation3 + $0x50] sm:$0xf] %v2202_v21  ;;  %v2174_v6 = vld [vmem:[#allocation3 + $0x70] sm:$0xf]  ;;  %v2258_v36 = vrot.slane %v1986_v32, 7  ;;  %v4826_v56 = vld [vmem:[#allocation2 + $0x108] sm:$0xff] }
 0x206   : > { %v4828_v54 = vld [vmem:[#allocation2 + $0x110] sm:$0xff]  ;;  %2219 = vst [vmem:[#allocation3 + $0x58] sm:$0xf] %v2203_v28  ;;  %2220 = vst [vmem:[#allocation3 + $0x60] sm:$0xf] %v2204_v30  ;;  %v2206_v55 = vadd.f32 %v2174_v6, %v1997_v43  ;;  %v4839_v37 = vld [vmem:[#allocation2 + $0x118] sm:$0xff]  ;;  %v2657_v61 = vcombine.high %v4820_v41, %v4826_v56  ;;  %v3595_v4 = vcombine.high %v4826_v56, %v4826_v56 }
 0x207   : > { %2221 = vst [vmem:[#allocation3 + $0x68] sm:$0xf] %v2205_v26  ;;  %v2175_v50 = vld [vmem:[#allocation3 + $0x78] sm:$0xf]  ;;  %v4841_v40 = vld [vmem:[#allocation2 + $0x180] sm:$0xff]  ;;  %v2259_v16 = vrot.slane %v3586_v12, 7  ;;  %v2659_v29 = vcombine.high %v4828_v54, %v4839_v37  ;;  %v3596_v45 = vcombine.high %v4839_v37, %v4839_v37 }
 0x208   : > { %v2207_v23 = vadd.f32 %v3580_v46, %v2175_v50  ;;  %v2260_v43 = vrot.slane %v1999_v13, 7  ;;  %v4848_v48 = vld [vmem:[#allocation2 + $0x188] sm:$0xff]  ;;  %v4850_v59 = vld [vmem:[#allocation2 + $0x190] sm:$0xff]  ;;  %v4852_v60 = vld [vmem:[#allocation2 + $0x198] sm:$0xff]  ;;  %2222 = vst [vmem:[#allocation3 + $0x70] sm:$0xf] %v2206_v55 }
 0x209   : > { %v2261_v38 = vrot.slane %v3587_v51, 7  ;;  %v2262_v53 = vrot.slane %v2001_v2, 7  ;;  %v4854_v47 = vrot.slane %v3588_v33, 7  ;;  %2060 = vst [vmem:[#allocation3 + $0x8] sm:$0xf] %v3559_v42  ;;  %v2267_v63 = vrot.slane %v3590_v18, 7 }
 0x20a   : > { %2223 = vst [vmem:[#allocation3 + $0x78] sm:$0xf] %v2207_v23  ;;  %v2243_v46 = vld [vmem:[#allocation3 + $0x98] sm:$0x1e]  ;;  %v2228_v7 = vld [vmem:[#allocation3 + $0x20] sm:$0x1e]  ;;  %v2672_v31 = vcombine.low %v4841_v40, %v4848_v48  ;;  %v3597_v0 = vcombine.low %v4848_v48, %v4848_v48  ;;  %v2674_v21 = vcombine.low %v4850_v59, %v4852_v60  ;;  %v3598_v28 = vcombine.low %v4852_v60, %v4852_v60 }
 0x20b   : > { %v2229_v8 = vld [vmem:[#allocation3 + $0x28] sm:$0x1e]  ;;  %v2284_v22 = vadd.f32 %v4780_v24, %v2228_v7  ;;  %v2230_v17 = vld [vmem:[#allocation3 + $0x30] sm:$0x1e]  ;;  %v2231_v32 = vld [vmem:[#allocation3 + $0x38] sm:$0x1e]  ;;  %v2673_v30 = vcombine.high %v4841_v40, %v4848_v48  ;;  %v2299_v50 = vadd.f32 %v2267_v63, %v2243_v46  ;;  %v3599_v24 = vcombine.high %v4848_v48, %v4848_v48 }
 0x20c   : > { %v2285_v1 = vadd.f32 %v4782_v57, %v2229_v8  ;;  %v2286_v26 = vadd.f32 %v4794_v44, %v2230_v17  ;;  %v2287_v6 = vadd.f32 %v4796_v11, %v2231_v32  ;;  %v2232_v12 = vld [vmem:[#allocation3 + $0x40] sm:$0x1e]  ;;  %v2233_v13 = vld [vmem:[#allocation3 + $0x48] sm:$0x1e]  ;;  %v2234_v55 = vld [vmem:[#allocation3 + $0x50] sm:$0x1e]  ;;  %v2675_v44 = vcombine.high %v4850_v59, %v4852_v60 }
 0x20d   : > { %2300 = vst [vmem:[#allocation3 + $0x20] sm:$0x1e] %v2284_v22  ;;  %v2288_v57 = vadd.f32 %v2256_v39, %v2232_v12  ;;  %v2289_v51 = vadd.f32 %v2257_v20, %v2233_v13  ;;  %v2290_v2 = vadd.f32 %v2258_v36, %v2234_v55  ;;  %v2235_v33 = vld [vmem:[#allocation3 + $0x58] sm:$0x1e]  ;;  %v2236_v23 = vld [vmem:[#allocation3 + $0x60] sm:$0x1e]  ;;  %v3600_v46 = vcombine.high %v4852_v60, %v4852_v60 }
 0x20e   : > { %2301 = vst [vmem:[#allocation3 + $0x28] sm:$0x1e] %v2285_v1  ;;  %v2237_v42 = vld [vmem:[#allocation3 + $0x68] sm:$0x1e]  ;;  %2302 = vst [vmem:[#allocation3 + $0x30] sm:$0x1e] %v2286_v26  ;;  %v2291_v11 = vadd.f32 %v2259_v16, %v2235_v33  ;;  %v2292_v18 = vadd.f32 %v2260_v43, %v2236_v23  ;;  %v2002_v36 = vcombine.high %v4798_v14, %v4800_v49 }
 0x20f   : > { %2303 = vst [vmem:[#allocation3 + $0x38] sm:$0x1e] %v2287_v6  ;;  %v2293_v7 = vadd.f32 %v2261_v38, %v2237_v42  ;;  %2315 = vst [vmem:[#allocation3 + $0x98] sm:$0x1e] %v2299_v50  ;;  %v4886_v8 = vld [vmem:[#allocation2 + $0x120] sm:$0xff]  ;;  %v4888_v39 = vld [vmem:[#allocation2 + $0x128] sm:$0xff]  ;;  %v1973_v16 = vcombine.low %v4648_v62, %v4659_v15  ;;  %v3560_v43 = vcombine.low %v4659_v15, %v4659_v15 }
 0x210   : > { %2304 = vst [vmem:[#allocation3 + $0x40] sm:$0x1e] %v2288_v57  ;;  %2305 = vst [vmem:[#allocation3 + $0x48] sm:$0x1e] %v2289_v51  ;;  %v2238_v20 = vld [vmem:[#allocation3 + $0x70] sm:$0x1e]  ;;  %v2000_v38 = vcombine.high %v4784_v35, %v4786_v58  ;;  %v3589_v62 = vcombine.high %v4786_v58, %v4786_v58  ;;  %v1975_v35 = vcombine.low %v4670_v3, %v4689_v34 }
 0x211   : > { %2306 = vst [vmem:[#allocation3 + $0x50] sm:$0x1e] %v2290_v2  ;;  %v2075_v63 = vld [vmem:[#allocation3] sm:$0x1e]  ;;  %v4898_v22 = vld [vmem:[#allocation2 + $0x130] sm:$0xff]  ;;  %v4900_v1 = vld [vmem:[#allocation2 + $0x138] sm:$0xff]  ;;  %v2294_v17 = vadd.f32 %v2262_v53, %v2238_v20  ;;  %v3567_v26 = vcombine.low %v4689_v34, %v4689_v34  ;;  %v2661_v58 = vcombine.high %v4886_v8, %v4888_v39  ;;  %v3603_v3 = vcombine.high %v4888_v39, %v4888_v39 }
 0x212   : > { %2307 = vst [vmem:[#allocation3 + $0x58] sm:$0x1e] %v2291_v11  ;;  %2308 = vst [vmem:[#allocation3 + $0x60] sm:$0x1e] %v2292_v18  ;;  %v2239_v32 = vld [vmem:[#allocation3 + $0x78] sm:$0x1e]  ;;  %v2663_v11 = vcombine.high %v4898_v22, %v4900_v1 }
 0x213   : > { %2309 = vst [vmem:[#allocation3 + $0x68] sm:$0x1e] %v2293_v7  ;;  %v2242_v14 = vld [vmem:[#allocation3 + $0x90] sm:$0x1e]  ;;  %v2240_v49 = vld [vmem:[#allocation3 + $0x80] sm:$0x1e]  ;;  %v2295_v6 = vadd.f32 %v4854_v47, %v2239_v32 }
 0x214   : > { %v4907_v15 = vld [vmem:[%s5294_s2] ss:$0 sm:$0xff]  ;;  %v2266_v53 = vrot.slane %v2002_v36, 7  ;;  %2061 = vst [vmem:[#allocation3 + $0x10] sm:$0xf] %v1973_v16  ;;  %v2264_v12 = vrot.slane %v2000_v38, 7 }
 0x215   : > { %2062 = vst [vmem:[#allocation3 + $0x18] sm:$0xf] %v3560_v43  ;;  %v2241_v13 = vld [vmem:[#allocation3 + $0x88] sm:$0x1e]  ;;  %2310 = vst [vmem:[#allocation3 + $0x70] sm:$0x1e] %v2294_v17 }
 0x216   : > { %v2076_v55 = vld [vmem:[#allocation3 + $0x8] sm:$0x1e]  ;;  %v2265_v50 = vrot.slane %v3589_v62, 7  ;;  %v2099_v57 = vrot.slane %v1975_v35, 7  ;;  %v2100_v51 = vrot.slane %v3567_v26, 7  ;;  %v4918_v2 = vld [vmem:[#allocation2 + $0x1a0] sm:$0xff]  ;;  %v2298_v47 = vadd.f32 %v2266_v53, %v2242_v14 }
 0x217   : > { %v4920_v34 = vld [vmem:[#allocation2 + $0x1a8] sm:$0xff]  ;;  %2311 = vst [vmem:[#allocation3 + $0x78] sm:$0x1e] %v2295_v6  ;;  %v2296_v33 = vadd.f32 %v2264_v12, %v2240_v49  ;;  %v4925_v23 = vld [vmem:[%s5295_s3] ss:$0 sm:$0xff]  ;;  %v4927_v42 = vrot.slane %v2661_v58, 7 }
 0x218   : > { %v4931_v18 = vld [vmem:[#allocation2 + $0x1b0] sm:$0xff]  ;;  %v4933_v7 = vld [vmem:[#allocation2 + $0x1b8] sm:$0xff]  ;;  %v4935_v20 = vld [vmem:[#allocation3 + $0x28] sm:$0x1e]  ;;  %v2297_v16 = vadd.f32 %v2265_v50, %v2241_v13  ;;  %v2131_v43 = vadd.f32 %v2099_v57, %v2075_v63  ;;  %v2132_v38 = vadd.f32 %v2100_v51, %v2076_v55  ;;  %v4937_v17 = vrot.slane %v3603_v3, 7 }
 0x219   : > { %v2317_v36 = vld [vmem:[#allocation3 + $0x20] sm:$0xf]  ;;  %v4939_v32 = vld [vmem:[#allocation3 + $0x38] sm:$0x1e]  ;;  %2739 = vst [vmem:[#allocation3 + $0x28] sm:$0xf] %v3595_v4  ;;  %v3604_v63 = vcombine.high %v4900_v1, %v4900_v1  ;;  %v2676_v35 = vcombine.low %v4918_v2, %v4920_v34  ;;  %v2678_v12 = vcombine.low %v4931_v18, %v4933_v7  ;;  %v2679_v60 = vcombine.high %v4931_v18, %v4933_v7 }
 0x21a   : > { %2738 = vst [vmem:[#allocation3 + $0x20] sm:$0xf] %v2657_v61  ;;  %v2479_v14 = vld [vmem:[#allocation3 + $0x30] sm:$0xf]  ;;  %2314 = vst [vmem:[#allocation3 + $0x90] sm:$0x1e] %v2298_v47  ;;  %v2327_v49 = vmul.f32 %v4907_v15, %v2317_v36  ;;  %v3605_v61 = vcombine.low %v4920_v34, %v4920_v34 }
 0x21b   : > { %2312 = vst [vmem:[#allocation3 + $0x80] sm:$0x1e] %v2296_v33  ;;  %v4948_v62 = vld [vmem:[#allocation3 + $0x98] sm:$0x1e]  ;;  %v4959_v4 = vld [vmem:[#allocation3 + $0x48] sm:$0x1e]  ;;  %v2483_v53 = vmul.f32 %v4907_v15, %v2479_v14 }
 0x21c   : > { %2710 = vst.msk [vmem:[#allocation3 + $0x24] ss:$8 sm:$0xf] %vm4662_vm2, %v3977_v10  ;;  %2740 = vst [vmem:[#allocation3 + $0x30] sm:$0xf] %v2659_v29  ;;  %v3606_v29 = vcombine.low %v4933_v7, %v4933_v7  ;;  %v2337_v50 = vadd.f32 %v4925_v23, %v2327_v49  ;;  %v2780_v3 = vrot.slane %v2663_v11, 7 }
 0x21d   : > { %2741 = vst [vmem:[#allocation3 + $0x38] sm:$0xf] %v3596_v45  ;;  %v2318_v26 = vld [vmem:[#allocation3 + $0x40] sm:$0xf]  ;;  %v2480_v6 = vld [vmem:[#allocation3 + $0x50] sm:$0xf]  ;;  %v2677_v45 = vcombine.high %v4918_v2, %v4920_v34 }
 0x21e   : > { %2704 = vst [vmem:[#allocation3 + $0x80] sm:$0x1f] %v3977_v10  ;;  %2313 = vst [vmem:[#allocation3 + $0x88] sm:$0x1e] %v2297_v16  ;;  %v4976_v13 = vld [vmem:[#allocation3 + $0x58] sm:$0x1e]  ;;  %v2328_v57 = vmul.f32 %v4907_v15, %v2318_v26  ;;  %v2484_v51 = vmul.f32 %v4907_v15, %v2480_v6 }
 0x21f   : > { %2707 = vst [vmem:[#allocation3 + $0x98] sm:$0x1f] %v3977_v10  ;;  %2147 = vst [vmem:[#allocation3] sm:$0x1e] %v2131_v43  ;;  %v4978_v55 = vld [vmem:[#allocation3 + $0x68] sm:$0x1e] }
 0x220   : > { %2148 = vst [vmem:[#allocation3 + $0x8] sm:$0x1e] %v2132_v38  ;;  %2742 = vst [vmem:[#allocation3 + $0x40] sm:$0xf] %v2672_v31  ;;  %v2319_v58 = vld [vmem:[#allocation3 + $0x60] sm:$0xf]  ;;  %v3607_v31 = vcombine.high %v4920_v34, %v4920_v34  ;;  %v2338_v16 = vadd.f32 %v4925_v23, %v2328_v57  ;;  %v3593_v34 = vcombine.low %v4826_v56, %v4826_v56 }
 0x221   : > { %2743 = vst [vmem:[#allocation3 + $0x48] sm:$0xf] %v3597_v0  ;;  %2744 = vst [vmem:[#allocation3 + $0x50] sm:$0xf] %v2674_v21  ;;  %v2329_v0 = vmul.f32 %v4907_v15, %v2319_v58  ;;  %v2487_v21 = vadd.f32 %v4925_v23, %v2483_v53  ;;  %v2781_v47 = vrot.slane %v3604_v63, 7  ;;  %v2341_v36 = vmax.f32 %v2337_v50, 0.0 }
 0x222   : > { %2705 = vst [vmem:[#allocation3 + $0x88] sm:$0x1f] %v3977_v10  ;;  %2712 = vst.msk [vmem:[#allocation3 + $0x44] ss:$8 sm:$0xf] %vm4662_vm2, %v3977_v10  ;;  %v2782_v43 = vrot.slane %v2676_v35, 7 }
 0x223   : > { %2745 = vst [vmem:[#allocation3 + $0x58] sm:$0xf] %v3598_v28  ;;  %2746 = vst [vmem:[#allocation3 + $0x60] sm:$0xf] %v2673_v30  ;;  %v2481_v33 = vld [vmem:[#allocation3 + $0x70] sm:$0xf]  ;;  %v2488_v28 = vadd.f32 %v4925_v23, %v2484_v51  ;;  %v2339_v40 = vadd.f32 %v4925_v23, %v2329_v0  ;;  %v2345_v11 = vpack.c.bf16 %v2341_v36, %v2341_v36 }
 0x224   : > { %2747 = vst [vmem:[#allocation3 + $0x68] sm:$0xf] %v3599_v24  ;;  %v5011_v38 = vld [vmem:[#allocation3 + $0x78] sm:$0x1e]  ;;  %2748 = vst [vmem:[#allocation3 + $0x70] sm:$0xf] %v2675_v44  ;;  %v2485_v30 = vmul.f32 %v4907_v15, %v2481_v33 }
 0x225   : > { %v2491_v48 = vmax.f32 %v2487_v21, 0.0  ;;  %v2783_v24 = vrot.slane %v3605_v61, 7  ;;  %2714 = vst.msk [vmem:[#allocation3 + $0x64] ss:$8 sm:$0xf] %vm4662_vm2, %v3977_v10  ;;  %v2342_v14 = vmax.f32 %v2338_v16, 0.0 }
 0x226   : > { %2749 = vst [vmem:[#allocation3 + $0x78] sm:$0xf] %v3600_v46  ;;  %v2492_v49 = vmax.f32 %v2488_v28, 0.0  ;;  %v2784_v63 = vrot.slane %v2678_v12, 7  ;;  %v2343_v59 = vmax.f32 %v2339_v40, 0.0  ;;  %v2489_v35 = vadd.f32 %v4925_v23, %v2485_v30  ;;  %v5035_v33 = vld [vmem:[#allocation2 + $0x1d8] sm:$0xff] }
 0x227   : > { %v2495_v44 = vpack.c.bf16 %v2491_v48, %v2491_v48  ;;  %v2482_v26 = vld [vmem:[#allocation3 + $0x90] sm:$0xf]  ;;  %v2785_v6 = vrot.slane %v3606_v29, 7  ;;  %2349 = vst [vmem:[#allocation9 + $0x8] sm:$0x3] %v2345_v11  ;;  %v2346_v61 = vpack.c.bf16 %v2342_v14, %v2342_v14  ;;  %v3608_v46 = vcombine.high %v4933_v7, %v4933_v7 }
 0x228   : > { %v2496_v53 = vpack.c.bf16 %v2492_v49, %v2492_v49  ;;  %2706 = vst [vmem:[#allocation3 + $0x90] sm:$0x1f] %v3977_v10  ;;  %v2754_v58 = vld [vmem:[#allocation3 + $0x20] sm:$0x1e]  ;;  %v2755_v50 = vld [vmem:[#allocation3 + $0x28] sm:$0x1e]  ;;  %v2347_v12 = vpack.c.bf16 %v2343_v59, %v2343_v59  ;;  %v1977_v40 = vcombine.low %v4691_v5, %v4693_v27  ;;  %v3568_v48 = vcombine.low %v4693_v27, %v4693_v27 }
 0x229   : > { %v2756_v57 = vld [vmem:[#allocation3 + $0x30] sm:$0x1e]  ;;  %2500 = vst [vmem:[#allocation9 + $0x4] sm:$0x3] %v2495_v44  ;;  %v2493_v51 = vmax.f32 %v2489_v35, 0.0  ;;  %v2810_v29 = vadd.f32 %v4927_v42, %v2754_v58  ;;  %v2811_v0 = vadd.f32 %v4937_v17, %v2755_v50  ;;  %v2786_v5 = vrot.slane %v2677_v45, 7 }
 0x22a   : > { %2716 = vst.msk [vmem:[#allocation3 + $0x84] ss:$8 sm:$0xf] %vm4662_vm2, %v3977_v10  ;;  %v2757_v21 = vld [vmem:[#allocation3 + $0x38] sm:$0x1e]  ;;  %v2812_v18 = vadd.f32 %v2780_v3, %v2756_v57  ;;  %v2787_v27 = vrot.slane %v3607_v31, 7  ;;  %v2486_v45 = vmul.f32 %v4907_v15, %v2482_v26  ;;  %v3616_v31 = vcombine.high %v5035_v33, %v5035_v33 }
 0x22b   : > { %2350 = vst [vmem:[#allocation9 + $0x10] sm:$0x3] %v2346_v61  ;;  %2501 = vst [vmem:[#allocation9 + $0xc] sm:$0x3] %v2496_v53  ;;  %v2813_v36 = vadd.f32 %v2781_v47, %v2757_v21  ;;  %v2758_v16 = vld [vmem:[#allocation3 + $0x40] sm:$0x1e]  ;;  %v2497_v42 = vpack.c.bf16 %v2493_v51, %v2493_v51 }
 0x22c   : > { %v2759_v7 = vld [vmem:[#allocation3 + $0x48] sm:$0x1e]  ;;  %v2760_v28 = vld [vmem:[#allocation3 + $0x50] sm:$0x1e]  ;;  %2351 = vst [vmem:[#allocation9 + $0x18] sm:$0x3] %v2347_v12  ;;  %v2814_v17 = vadd.f32 %v2782_v43, %v2758_v16  ;;  %v5052_v43 = vsub.s32 %v2378_v52, %v4675_v19  ;;  %v2490_v50 = vadd.f32 %v4925_v23, %v2486_v45  ;;  %v2357_v12 = vmul.f32 %v4907_v15, %v4935_v20 }
 0x22d   : > { %2826 = vst [vmem:[#allocation3 + $0x20] sm:$0x1e] %v2810_v29  ;;  %2827 = vst [vmem:[#allocation3 + $0x28] sm:$0x1e] %v2811_v0  ;;  %v2815_v30 = vadd.f32 %v2783_v24, %v2759_v7  ;;  %v2816_v11 = vadd.f32 %v2784_v63, %v2760_v28  ;;  %v2761_v14 = vld [vmem:[#allocation3 + $0x58] sm:$0x1e]  ;;  %v2508_v16 = vmul.f32 %v4907_v15, %v4939_v32 }
 0x22e   : > { %v5041_v49 = vld [vmem:[#allocation3 + $0x8] sm:$0x1e]  ;;  %2828 = vst [vmem:[#allocation3 + $0x30] sm:$0x1e] %v2812_v18  ;;  %2829 = vst [vmem:[#allocation3 + $0x38] sm:$0x1e] %v2813_v36  ;;  %v2817_v3 = vadd.f32 %v2785_v6, %v2761_v14  ;;  %v2361_v21 = vadd.f32 %v4925_v23, %v2357_v12  ;;  %v2358_v18 = vmul.f32 %v4907_v15, %v4959_v4 }
 0x22f   : > { %v2788_v47 = vrot.slane %v2679_v60, 7  ;;  %v2077_v59 = vld [vmem:[#allocation3 + $0x10] sm:$0x1e]  ;;  %v2853_v44 = vld [vmem:[#allocation3 + $0x98] sm:$0xf]  ;;  %v2789_v6 = vrot.slane %v3608_v46, 7  ;;  %v3614_v60 = vcombine.low %v5035_v33, %v5035_v33  ;;  %v2359_v36 = vmul.f32 %v4907_v15, %v4978_v55 }
 0x230   : > { %2502 = vst [vmem:[#allocation9 + $0x14] sm:$0x3] %v2497_v42  ;;  %2830 = vst [vmem:[#allocation3 + $0x40] sm:$0x1e] %v2814_v17  ;;  %v2762_v24 = vld [vmem:[#allocation3 + $0x60] sm:$0x1e]  ;;  %v2885_v57 = vadd.f32 %v3616_v31, %v2853_v44  ;;  %v2509_v7 = vmul.f32 %v4907_v15, %v4976_v13  ;;  %v2510_v28 = vmul.f32 %v4907_v15, %v5011_v38 }
 0x231   : > { %2831 = vst [vmem:[#allocation3 + $0x48] sm:$0x1e] %v2815_v30  ;;  %2832 = vst [vmem:[#allocation3 + $0x50] sm:$0x1e] %v2816_v11  ;;  %v2763_v63 = vld [vmem:[#allocation3 + $0x68] sm:$0x1e]  ;;  %v2818_v35 = vadd.f32 %v2786_v5, %v2762_v24  ;;  %v2362_v55 = vadd.f32 %v4925_v23, %v2358_v18  ;;  %v2512_v32 = vadd.f32 %v4925_v23, %v2508_v16 }
 0x232   : > { %v2764_v2 = vld [vmem:[#allocation3 + $0x70] sm:$0x1e]  ;;  %2833 = vst [vmem:[#allocation3 + $0x58] sm:$0x1e] %v2817_v3  ;;  %v2819_v9 = vadd.f32 %v2787_v27, %v2763_v63  ;;  %v2765_v52 = vld [vmem:[#allocation3 + $0x78] sm:$0x1e]  ;;  %v2513_v13 = vadd.f32 %v4925_v23, %v2509_v7  ;;  %v2514_v38 = vadd.f32 %v4925_v23, %v2510_v28  ;;  %v2656_v14 = vcombine.low %v4820_v41, %v4826_v56 }
 0x233   : > { %v2820_v19 = vadd.f32 %v2788_v47, %v2764_v2  ;;  %v2078_v61 = vld [vmem:[#allocation3 + $0x18] sm:$0x1e]  ;;  %v2101_v53 = vrot.slane %v1977_v40, 7  ;;  %v2102_v58 = vrot.slane %v3568_v48, 7  ;;  %2735 = vst [vmem:[#allocation3 + $0x8] sm:$0xf] %v3593_v34  ;;  %v2821_v26 = vadd.f32 %v2789_v6, %v2765_v52 }
 0x234   : > { %2834 = vst [vmem:[#allocation3 + $0x60] sm:$0x1e] %v2818_v35  ;;  %2835 = vst [vmem:[#allocation3 + $0x68] sm:$0x1e] %v2819_v9  ;;  %vm2408_vm3 = vsmask.f32 1280  ;;  %v2363_v40 = vadd.f32 %v4925_v23, %v2359_v36  ;;  %v2658_v56 = vcombine.low %v4828_v54, %v4839_v37 }
 0x235   : > { %2836 = vst [vmem:[#allocation3 + $0x70] sm:$0x1e] %v2820_v19  ;;  %v2133_v51 = vadd.f32 %v2101_v53, %v2077_v59  ;;  %v2134_v46 = vadd.f32 %v2102_v58, %v2078_v61  ;;  %v2494_v29 = vmax.f32 %v2490_v50, 0.0  ;;  %2901 = vst [vmem:[#allocation3 + $0x98] sm:$0xf] %v2885_v57  ;;  %v1931_v0 = vld [vmem:[#allocation2 + $0x1d0] sm:$0xff] }
 0x236   : > { %vm2409_vm4 = vsmask.f32 3336  ;;  %2837 = vst [vmem:[#allocation3 + $0x78] sm:$0x1e] %v2821_v26  ;;  %vm2411_vm5 = vsmask.f32 5392  ;;  %v2682_v48 = vcombine.low %v1931_v0, %v5035_v33  ;;  %v2683_v17 = vcombine.high %v1931_v0, %v5035_v33 }
 0x237   : > { %2149 = vst [vmem:[#allocation3 + $0x10] sm:$0x1e] %v2133_v51  ;;  %2150 = vst [vmem:[#allocation3 + $0x18] sm:$0x1e] %v2134_v46  ;;  %v2498_v20 = vpack.c.bf16 %v2494_v29, %v2494_v29  ;;  %v2365_v4 = vmax.f32 %v2361_v21, 0.0  ;;  %v2367_v30 = vmax.f32 %v2363_v40, 0.0 }
 0x238   : > { %2708 = vst.msk [vmem:[#allocation3 + $0x4] ss:$8 sm:$0xf] %vm4662_vm2, %v3977_v10  ;;  %vm2413_vm6 = vsmask.f32 7448  ;;  %v2366_v10 = vmax.f32 %v2362_v55, 0.0  ;;  %vm5092_vm7 = vmor %vm2408_vm3, %vm2409_vm4 }
 0x239   : > { %v2852_v42 = vld [vmem:[#allocation3 + $0x90] sm:$0xf]  ;;  %2503 = vst [vmem:[#allocation9 + $0x1c] sm:$0x3] %v2498_v20  ;;  %v2369_v25 = vpack.c.bf16 %v2365_v4, %v2365_v4  ;;  %v5085_v11 = vld [vmem:[#allocation3] sm:$0xf]  ;;  %v2371_v63 = vpack.c.bf16 %v2367_v30, %v2367_v30  ;;  %vm2412_vm8 = vmor %vm5092_vm7, %vm2411_vm5 }
 0x23a   : > { %v2516_v3 = vmax.f32 %v2512_v32, 0.0  ;;  %v2517_v5 = vmax.f32 %v2513_v13, 0.0  ;;  %v2518_v27 = vmax.f32 %v2514_v38, 0.0  ;;  %v2884_v59 = vadd.f32 %v2852_v42, %v2683_v17  ;;  %2734 = vst [vmem:[#allocation3] sm:$0xf] %v2656_v14  ;;  %vm5109_vm9 = vmor %vm2412_vm8, %vm2413_vm6 }
 0x23b   : > { %v2390_v44 = vrot.slane %v2369_v25, %v5052_v43  ;;  %v2370_v24 = vpack.c.bf16 %v2366_v10, %v2366_v10  ;;  %v2406_v6 = vrot.slane %v2371_v63, %v5052_v43  ;;  %2736 = vst [vmem:[#allocation3 + $0x10] sm:$0xf] %v2658_v56  ;;  %v1914_v56 = vld [vmem:[#allocation2 + $0x148] sm:$0xff]  ;;  %v2326_v33 = vmul.f32 %v4907_v15, %v5085_v11 }
 0x23c   : > { %v2848_v47 = vld [vmem:[#allocation3 + $0x70] sm:$0xf]  ;;  %v2520_v34 = vpack.c.bf16 %v2516_v3, %v2516_v3  ;;  %v2521_v31 = vpack.c.bf16 %v2517_v5, %v2517_v5  ;;  %v2522_v41 = vpack.c.bf16 %v2518_v27, %v2518_v27  ;;  %2900 = vst [vmem:[#allocation3 + $0x90] sm:$0xf] %v2884_v59 }
 0x23d   : > { %v2880_v2 = vadd.f32 %v2848_v47, %v2682_v48  ;;  %v2391_v35 = vcombine.high %v2390_v44, %v2390_v44  ;;  %v2430_v9 = vshrl.u32 %v2390_v44, 16  ;;  %v2433_v19 = vshll.u32 %v2390_v44, 16 }
 0x23e   : > { %v2398_v52 = vrot.slane %v2370_v24, %v5052_v43  ;;  %v2534_v61 = vrot.slane %v2520_v34, %v5052_v43  ;;  %v2542_v53 = vrot.slane %v2521_v31, %v5052_v43  ;;  %v5103_v58 = vrot.slane %v2522_v41, %v5052_v43  ;;  %v1913_v41 = vld [vmem:[#allocation2 + $0x140] sm:$0xff] }
 0x23f   : > { %2896 = vst [vmem:[#allocation3 + $0x70] sm:$0xf] %v2880_v2  ;;  %v2432_v54 = vrot.slane %v2430_v9, 6  ;;  %v2435_v50 = vrot.slane %v2433_v19, 7  ;;  %v2439_v57 = vshll.u32 %v2391_v35, 16  ;;  %v2407_v46 = vcombine.high %v2406_v6, %v2406_v6  ;;  %v1915_v35 = vld [vmem:[#allocation2 + $0x150] sm:$0xff] }
 0x240   : > { %v2399_v26 = vcombine.high %v2398_v52, %v2398_v52  ;;  %v2444_v12 = vshrl.u32 %v2398_v52, 16  ;;  %v2447_v51 = vshll.u32 %v2398_v52, 16  ;;  %v2458_v29 = vshrl.u32 %v2406_v6, 16 }
 0x241   : > { %v2436_v0 = vor.u32 %v2435_v50, %v2432_v54  ;;  %v2441_v21 = vrot.slane %v2439_v57, 7  ;;  %v2461_v36 = vshll.u32 %v2406_v6, 16  ;;  %v2467_v4 = vshll.u32 %v2407_v46, 16 }
 0x242   : > { %v2453_v18 = vshll.u32 %v2399_v26, 16  ;;  %v2446_v16 = vrot.slane %v2444_v12, 6  ;;  %v2449_v7 = vrot.slane %v2447_v51, 7  ;;  %v2460_v28 = vrot.slane %v2458_v29, 6  ;;  %v2839_v12 = vld [vmem:[#allocation3 + $0x28] sm:$0xf] }
 0x243   : > { %v2437_v55 = vrot.slane %v2436_v0, 2  ;;  %v2463_v48 = vrot.slane %v2461_v36, 7  ;;  %v2535_v42 = vcombine.high %v2534_v61, %v2534_v61  ;;  %v2469_v13 = vrot.slane %v2467_v4, 7  ;;  %v1929_v4 = vld [vmem:[#allocation2 + $0x1c0] sm:$0xff] }
 0x244   : > { %v2455_v40 = vrot.slane %v2453_v18, 7  ;;  %v2450_v32 = vor.u32 %v2449_v7, %v2446_v16  ;;  %v2561_v38 = vshrl.u32 %v2534_v61, 16  ;;  %v2564_v17 = vshll.u32 %v2534_v61, 16  ;;  %v2838_v61 = vld [vmem:[#allocation3 + $0x20] sm:$0xf] }
 0x245   : > { %v2442_v25 = vsel %vm5109_vm9, %v2437_v55, %v2441_v21  ;;  %v2464_v10 = vor.u32 %v2463_v48, %v2460_v28  ;;  %v2570_v30 = vshll.u32 %v2535_v42, 16  ;;  %v2543_v14 = vcombine.high %v2542_v53, %v2542_v53  ;;  %v2840_v21 = vld [vmem:[#allocation3 + $0x30] sm:$0xf]  ;;  %v2841_v28 = vld [vmem:[#allocation3 + $0x38] sm:$0xf] }
 0x246   : > { %2476 = vst [vmem:[#allocation9 + $0xa] sm:$0x3] %v2442_v25  ;;  %v2451_v3 = vrot.slane %v2450_v32, 2  ;;  %v2563_v5 = vrot.slane %v2561_v38, 6  ;;  %v2566_v27 = vrot.slane %v2564_v17, 7  ;;  %v2575_v47 = vshrl.u32 %v2542_v53, 16 }
 0x247   : > { %v2465_v59 = vrot.slane %v2464_v10, 2  ;;  %v2572_v44 = vrot.slane %v2570_v30, 7  ;;  %v2578_v24 = vshll.u32 %v2542_v53, 16  ;;  %v2584_v63 = vshll.u32 %v2543_v14, 16  ;;  %v1916_v53 = vld [vmem:[#allocation2 + $0x158] sm:$0xff]  ;;  %v1930_v32 = vld [vmem:[#allocation2 + $0x1c8] sm:$0xff] }
 0x248   : > { %v2456_v2 = vsel %vm5109_vm9, %v2451_v3, %v2455_v40  ;;  %v2567_v45 = vor.u32 %v2566_v27, %v2563_v5  ;;  %v2577_v34 = vrot.slane %v2575_v47, 6  ;;  %v2551_v31 = vcombine.high %v5103_v58, %v5103_v58  ;;  %v2842_v48 = vld [vmem:[#allocation3 + $0x40] sm:$0xf]  ;;  %v2843_v42 = vld [vmem:[#allocation3 + $0x48] sm:$0xf] }
 0x249   : > { %2477 = vst [vmem:[#allocation9 + $0x12] sm:$0x3] %v2456_v2  ;;  %v2470_v9 = vsel %vm5109_vm9, %v2465_v59, %v2469_v13  ;;  %v2580_v19 = vrot.slane %v2578_v24, 7  ;;  %v2586_v52 = vrot.slane %v2584_v63, 7  ;;  %v2589_v6 = vshrl.u32 %v5103_v58, 16 }
 0x24a   : > { %2478 = vst [vmem:[#allocation9 + $0x1a] sm:$0x3] %v2470_v9  ;;  %v2568_v54 = vrot.slane %v2567_v45, 2  ;;  %v2592_v50 = vshll.u32 %v5103_v58, 16  ;;  %v2598_v57 = vshll.u32 %v2551_v31, 16  ;;  %v3594_v26 = vcombine.low %v4839_v37, %v4839_v37 }
 0x24b   : > { %v2581_v51 = vor.u32 %v2580_v19, %v2577_v34  ;;  %v2591_v46 = vrot.slane %v2589_v6, 6  ;;  %v2664_v29 = vcombine.low %v1913_v41, %v1914_v56  ;;  %v3609_v0 = vcombine.low %v1914_v56, %v1914_v56  ;;  %v2844_v10 = vld [vmem:[#allocation3 + $0x50] sm:$0xf]  ;;  %v2845_v30 = vld [vmem:[#allocation3 + $0x58] sm:$0xf] }
 0x24c   : > { %v2573_v18 = vsel %vm5109_vm9, %v2568_v54, %v2572_v44  ;;  %v2594_v36 = vrot.slane %v2592_v50, 7  ;;  %v2600_v16 = vrot.slane %v2598_v57, 7  ;;  %2737 = vst [vmem:[#allocation3 + $0x18] sm:$0xf] %v3594_v26  ;;  %v2666_v7 = vcombine.low %v1915_v35, %v1916_v53  ;;  %v2849_v14 = vld [vmem:[#allocation3 + $0x78] sm:$0xf] }
 0x24d   : > { %2620 = vst [vmem:[#allocation9 + $0x6] sm:$0x3] %v2573_v18  ;;  %v2582_v58 = vrot.slane %v2581_v51, 2  ;;  %v2870_v55 = vadd.f32 %v2838_v61, %v2664_v29  ;;  %v2871_v40 = vadd.f32 %v3609_v0, %v2839_v12  ;;  %v3610_v37 = vcombine.low %v1916_v53, %v1916_v53  ;;  %v2846_v59 = vld [vmem:[#allocation3 + $0x60] sm:$0xf]  ;;  %v1935_v54 = vld [vmem:[#allocation2 + $0x1f0] sm:$0xff] }
 0x24e   : > { %v2595_v13 = vor.u32 %v2594_v36, %v2591_v46  ;;  %v2872_v38 = vadd.f32 %v2840_v21, %v2666_v7  ;;  %v2665_v17 = vcombine.high %v1913_v41, %v1914_v56  ;;  %v3611_v25 = vcombine.high %v1914_v56, %v1914_v56  ;;  %v2847_v45 = vld [vmem:[#allocation3 + $0x68] sm:$0xf]  ;;  %v2850_v9 = vld [vmem:[#allocation3 + $0x80] sm:$0xf] }
 0x24f   : > { %v2587_v3 = vsel %vm5109_vm9, %v2582_v58, %v2586_v52  ;;  %2886 = vst [vmem:[#allocation3 + $0x20] sm:$0xf] %v2870_v55  ;;  %2887 = vst [vmem:[#allocation3 + $0x28] sm:$0xf] %v2871_v40  ;;  %v2873_v5 = vadd.f32 %v3610_v37, %v2841_v28  ;;  %v2667_v27 = vcombine.high %v1915_v35, %v1916_v53  ;;  %v2851_v19 = vld [vmem:[#allocation3 + $0x88] sm:$0xf] }
 0x250   : > { %v3612_v47 = vcombine.high %v1916_v53, %v1916_v53  ;;  %2621 = vst [vmem:[#allocation9 + $0xe] sm:$0x3] %v2587_v3  ;;  %v2596_v44 = vrot.slane %v2595_v13, 2  ;;  %2888 = vst [vmem:[#allocation3 + $0x30] sm:$0xf] %v2872_v38  ;;  %v2874_v24 = vadd.f32 %v2842_v48, %v2665_v17  ;;  %v2875_v63 = vadd.f32 %v3611_v25, %v2843_v42  ;;  %v5132_v35 = vld [vmem:[#allocation2 + $0x1f8] sm:$0xff] }
 0x251   : > { %v2680_v2 = vcombine.low %v1929_v4, %v1930_v32  ;;  %2889 = vst [vmem:[#allocation3 + $0x38] sm:$0xf] %v2873_v5  ;;  %v2876_v34 = vadd.f32 %v2844_v10, %v2667_v27  ;;  %v3613_v41 = vcombine.low %v1930_v32, %v1930_v32  ;;  %v2881_v56 = vadd.f32 %v3614_v60, %v2849_v14  ;;  %v2751_v51 = vld [vmem:[#allocation3 + $0x8] sm:$0x1e]  ;;  %v2750_v36 = vld [vmem:[#allocation3] sm:$0x1e] }
 0x252   : > { %v2877_v31 = vadd.f32 %v3612_v47, %v2845_v30  ;;  %v2601_v52 = vsel %vm5109_vm9, %v2596_v44, %v2600_v16  ;;  %2890 = vst [vmem:[#allocation3 + $0x40] sm:$0xf] %v2874_v24  ;;  %2891 = vst [vmem:[#allocation3 + $0x48] sm:$0xf] %v2875_v63  ;;  %v2681_v61 = vcombine.high %v1929_v4, %v1930_v32  ;;  %v2912_v28 = vld [vmem:[#allocation3 + $0x70] sm:$0x1e] }
 0x253   : > { %v2878_v6 = vadd.f32 %v2846_v59, %v2680_v2  ;;  %v3615_v53 = vcombine.high %v1930_v32, %v1930_v32  ;;  %2622 = vst [vmem:[#allocation9 + $0x16] sm:$0x3] %v2601_v52  ;;  %2892 = vst [vmem:[#allocation3 + $0x50] sm:$0xf] %v2876_v34  ;;  %v2879_v50 = vadd.f32 %v3613_v41, %v2847_v45  ;;  %v2916_v4 = vld [vmem:[#allocation3 + $0x90] sm:$0x1e] }
 0x254   : > { %2893 = vst [vmem:[#allocation3 + $0x58] sm:$0xf] %v2877_v31  ;;  %2897 = vst [vmem:[#allocation3 + $0x78] sm:$0xf] %v2881_v56  ;;  %v2511_v60 = vmul.f32 %v4907_v15, %v4948_v62  ;;  %v3601_v57 = vcombine.low %v4888_v39, %v4888_v39  ;;  %v2882_v26 = vadd.f32 %v2850_v9, %v2681_v61  ;;  %v2917_v62 = vld [vmem:[#allocation3 + $0x98] sm:$0x1e] }
 0x255   : > { %2894 = vst [vmem:[#allocation3 + $0x60] sm:$0xf] %v2878_v6  ;;  %v2883_v12 = vadd.f32 %v3615_v53, %v2851_v19  ;;  %v3622_v46 = vcombine.low %v5132_v35, %v5132_v35  ;;  %v3624_v29 = vcombine.high %v5132_v35, %v5132_v35  ;;  %2895 = vst [vmem:[#allocation3 + $0x68] sm:$0xf] %v2879_v50  ;;  %v1917_v40 = vld [vmem:[#allocation2 + $0x160] sm:$0xff]  ;;  %v1918_v38 = vld [vmem:[#allocation2 + $0x168] sm:$0xff] }
 0x256   : > { %v2336_v0 = vadd.f32 %v4925_v23, %v2326_v33  ;;  %v2515_v11 = vadd.f32 %v4925_v23, %v2511_v60  ;;  %v2775_v21 = vrot.slane %v3601_v57, 7  ;;  %v2686_v18 = vcombine.low %v1935_v54, %v5132_v35  ;;  %2898 = vst [vmem:[#allocation3 + $0x80] sm:$0xf] %v2882_v26  ;;  %v2752_v13 = vld [vmem:[#allocation3 + $0x10] sm:$0x1e]  ;;  %v5156_v3 = vld [vmem:[#allocation2 + $0x178] sm:$0xff] }
 0x257   : > { %2899 = vst [vmem:[#allocation3 + $0x88] sm:$0xf] %v2883_v12  ;;  %v2941_v16 = vrot.slane %v3624_v29, 7  ;;  %v2687_v7 = vcombine.high %v1935_v54, %v5132_v35  ;;  %v2660_v58 = vcombine.low %v4886_v8, %v4888_v39  ;;  %v2662_v55 = vcombine.low %v4898_v22, %v4900_v1  ;;  %v5154_v14 = vld [vmem:[#allocation2 + $0x170] sm:$0xff]  ;;  %v2753_v44 = vld [vmem:[#allocation3 + $0x18] sm:$0x1e] }
 0x258   : > { %v2340_v37 = vmax.f32 %v2336_v0, 0.0  ;;  %v2519_v48 = vmax.f32 %v2515_v11, 0.0  ;;  %v2807_v42 = vadd.f32 %v2775_v21, %v2751_v51  ;;  %v2936_v32 = vrot.slane %v2686_v18, 7  ;;  %v2902_v45 = vld [vmem:[#allocation3 + $0x20] sm:$0x1e]  ;;  %v1934_v29 = vld [vmem:[#allocation2 + $0x1e8] sm:$0xff] }
 0x259   : > { %v2973_v17 = vadd.f32 %v2941_v16, %v2917_v62  ;;  %v2940_v25 = vrot.slane %v2687_v7, 7  ;;  %v2774_v10 = vrot.slane %v2660_v58, 7  ;;  %v2776_v30 = vrot.slane %v2662_v55, 7  ;;  %v2903_v41 = vld [vmem:[#allocation3 + $0x28] sm:$0x1e]  ;;  %v1933_v33 = vld [vmem:[#allocation2 + $0x1e0] sm:$0xff] }
 0x25a   : > { %v2344_v5 = vpack.c.bf16 %v2340_v37, %v2340_v37  ;;  %v2523_v8 = vpack.c.bf16 %v2519_v48, %v2519_v48  ;;  %2823 = vst [vmem:[#allocation3 + $0x8] sm:$0x1e] %v2807_v42  ;;  %v2968_v39 = vadd.f32 %v2936_v32, %v2912_v28  ;;  %v3602_v22 = vcombine.low %v4900_v1, %v4900_v1  ;;  %v2904_v54 = vld [vmem:[#allocation3 + $0x30] sm:$0x1e]  ;;  %v2905_v50 = vld [vmem:[#allocation3 + $0x38] sm:$0x1e] }
 0x25b   : > { %2989 = vst [vmem:[#allocation3 + $0x98] sm:$0x1e] %v2973_v17  ;;  %v2972_v27 = vadd.f32 %v2940_v25, %v2916_v4  ;;  %v2806_v47 = vadd.f32 %v2774_v10, %v2750_v36  ;;  %v2808_v59 = vadd.f32 %v2776_v30, %v2752_v13  ;;  %v2668_v24 = vcombine.low %v1917_v40, %v1918_v38  ;;  %v2906_v51 = vld [vmem:[#allocation3 + $0x40] sm:$0x1e]  ;;  %v2907_v18 = vld [vmem:[#allocation3 + $0x48] sm:$0x1e] }
 0x25c   : > { %2348 = vst [vmem:[#allocation9] sm:$0x3] %v2344_v5  ;;  %v2558_v63 = vrot.slane %v2523_v8, %v5052_v43  ;;  %2984 = vst [vmem:[#allocation3 + $0x70] sm:$0x1e] %v2968_v39  ;;  %v2777_v2 = vrot.slane %v3602_v22, 7  ;;  %v3617_v34 = vcombine.low %v1918_v38, %v1918_v38  ;;  %v2670_v31 = vcombine.low %v5154_v14, %v5156_v3 }
 0x25d   : > { %2988 = vst [vmem:[#allocation3 + $0x90] sm:$0x1e] %v2972_v27  ;;  %2822 = vst [vmem:[#allocation3] sm:$0x1e] %v2806_v47  ;;  %v2926_v1 = vrot.slane %v2668_v24, 7  ;;  %v3618_v56 = vcombine.low %v5156_v3, %v5156_v3  ;;  %v2669_v9 = vcombine.high %v1917_v40, %v1918_v38  ;;  %v3619_v19 = vcombine.high %v1918_v38, %v1918_v38 }
 0x25e   : > { %2824 = vst [vmem:[#allocation3 + $0x10] sm:$0x1e] %v2808_v59  ;;  %v2559_v52 = vcombine.high %v2558_v63, %v2558_v63  ;;  %v2603_v6 = vshrl.u32 %v2558_v63, 16  ;;  %v2606_v61 = vshll.u32 %v2558_v63, 16  ;;  %v2809_v53 = vadd.f32 %v2777_v2, %v2753_v44  ;;  %v2908_v4 = vld [vmem:[#allocation3 + $0x50] sm:$0x1e] }
 0x25f   : > { %v2958_v60 = vadd.f32 %v2926_v1, %v2902_v45  ;;  %v2927_v57 = vrot.slane %v3617_v34, 7  ;;  %v2928_v26 = vrot.slane %v2670_v31, 7  ;;  %v2929_v12 = vrot.slane %v3618_v56, 7  ;;  %v2909_v48 = vld [vmem:[#allocation3 + $0x58] sm:$0x1e] }
 0x260   : > { %v2605_v0 = vrot.slane %v2603_v6, 6  ;;  %v2608_v11 = vrot.slane %v2606_v61, 7  ;;  %v2612_v21 = vshll.u32 %v2559_v52, 16  ;;  %2825 = vst [vmem:[#allocation3 + $0x18] sm:$0x1e] %v2809_v53  ;;  %v2930_v62 = vrot.slane %v2669_v9, 7 }
 0x261   : > { %2974 = vst [vmem:[#allocation3 + $0x20] sm:$0x1e] %v2958_v60  ;;  %v2959_v36 = vadd.f32 %v2927_v57, %v2903_v41  ;;  %v2960_v16 = vadd.f32 %v2928_v26, %v2904_v54  ;;  %v2961_v7 = vadd.f32 %v2929_v12, %v2905_v50  ;;  %v2931_v28 = vrot.slane %v3619_v19, 7  ;;  %v2913_v42 = vld [vmem:[#allocation3 + $0x78] sm:$0x1e] }
 0x262   : > { %v2609_v58 = vor.u32 %v2608_v11, %v2605_v0  ;;  %v2614_v55 = vrot.slane %v2612_v21, 7  ;;  %v2962_v40 = vadd.f32 %v2930_v62, %v2906_v51  ;;  %v2671_v37 = vcombine.high %v5154_v14, %v5156_v3  ;;  %v2910_v17 = vld [vmem:[#allocation3 + $0x60] sm:$0x1e]  ;;  %v2911_v25 = vld [vmem:[#allocation3 + $0x68] sm:$0x1e] }
 0x263   : > { %2975 = vst [vmem:[#allocation3 + $0x28] sm:$0x1e] %v2959_v36  ;;  %2976 = vst [vmem:[#allocation3 + $0x30] sm:$0x1e] %v2960_v16  ;;  %v2963_v32 = vadd.f32 %v2931_v28, %v2907_v18  ;;  %v3620_v13 = vcombine.high %v5156_v3, %v5156_v3  ;;  %v2684_v38 = vcombine.low %v1933_v33, %v1934_v29  ;;  %v2914_v30 = vld [vmem:[#allocation3 + $0x80] sm:$0x1e] }
 0x264   : > { %2977 = vst [vmem:[#allocation3 + $0x38] sm:$0x1e] %v2961_v7  ;;  %v3621_v10 = vcombine.low %v1934_v29, %v1934_v29  ;;  %v2610_v5 = vrot.slane %v2609_v58, 2  ;;  %2978 = vst [vmem:[#allocation3 + $0x40] sm:$0x1e] %v2962_v40  ;;  %v2932_v8 = vrot.slane %v2671_v37, 7  ;;  %v2685_v39 = vcombine.high %v1933_v33, %v1934_v29 }
 0x265   : > { %v2937_v14 = vrot.slane %v3622_v46, 7  ;;  %v2915_v22 = vld [vmem:[#allocation3 + $0x88] sm:$0x1e]  ;;  %v3138_v27 = vld [vmem:[#allocation3 + $0x90] sm:$0xf]  ;;  %v2933_v47 = vrot.slane %v3620_v13, 7  ;;  %v3623_v3 = vcombine.high %v1934_v29, %v1934_v29  ;;  %v2356_v52 = vmul.f32 %v4907_v15, %v5041_v49 }
 0x266   : > { %2979 = vst [vmem:[#allocation3 + $0x48] sm:$0x1e] %v2963_v32  ;;  %v2934_v59 = vrot.slane %v2684_v38, 7  ;;  %v2935_v44 = vrot.slane %v3621_v10, 7  ;;  %v2990_v24 = vld [vmem:[#allocation3] sm:$0xf]  ;;  %v2615_v63 = vsel %vm5109_vm9, %v2610_v5, %v2614_v55  ;;  %v2964_v2 = vadd.f32 %v2932_v8, %v2908_v4 }
 0x267   : > { %v2969_v45 = vadd.f32 %v2937_v14, %v2913_v42  ;;  %v2938_v34 = vrot.slane %v2685_v39, 7  ;;  %v3137_v31 = vld [vmem:[#allocation3 + $0x70] sm:$0xf]  ;;  %v3015_v1 = vld [vmem:[#allocation3 + $0x8] sm:$0x1e]  ;;  %v2965_v35 = vadd.f32 %v2933_v47, %v2909_v48  ;;  %v2939_v56 = vrot.slane %v3623_v3, 7 }
 0x268   : > { %2623 = vst [vmem:[#allocation9 + $0x1e] sm:$0x3] %v2615_v63  ;;  %v2966_v46 = vadd.f32 %v2934_v59, %v2910_v17  ;;  %v2967_v41 = vadd.f32 %v2935_v44, %v2911_v25  ;;  %v3163_v9 = vld [vmem:[#allocation3 + $0x98] sm:$0x1e]  ;;  %2980 = vst [vmem:[#allocation3 + $0x50] sm:$0x1e] %v2964_v2  ;;  %v3142_v6 = vmul.f32 %v4907_v15, %v3138_v27 }
 0x269   : > { %2985 = vst [vmem:[#allocation3 + $0x78] sm:$0x1e] %v2969_v45  ;;  %v2970_v19 = vadd.f32 %v2938_v34, %v2914_v30  ;;  %v2994_v61 = vmul.f32 %v4907_v15, %v2990_v24  ;;  %v2991_v53 = vld [vmem:[#allocation3 + $0x20] sm:$0xf]  ;;  %2981 = vst [vmem:[#allocation3 + $0x58] sm:$0x1e] %v2965_v35  ;;  %v2971_v54 = vadd.f32 %v2939_v56, %v2915_v22 }
 0x26a   : > { %2982 = vst [vmem:[#allocation3 + $0x60] sm:$0x1e] %v2966_v46  ;;  %2983 = vst [vmem:[#allocation3 + $0x68] sm:$0x1e] %v2967_v41  ;;  %v2995_v50 = vmul.f32 %v4907_v15, %v2991_v53  ;;  %v3141_v33 = vmul.f32 %v4907_v15, %v3137_v31  ;;  %v3019_v60 = vmul.f32 %v4907_v15, %v3015_v1  ;;  %v3135_v12 = vld [vmem:[#allocation3 + $0x30] sm:$0xf] }
 0x26b   : > { %2986 = vst [vmem:[#allocation3 + $0x80] sm:$0x1e] %v2970_v19  ;;  %v2360_v57 = vadd.f32 %v4925_v23, %v2356_v52  ;;  %v3146_v49 = vadd.f32 %v4925_v23, %v3142_v6  ;;  %v2998_v26 = vadd.f32 %v4925_v23, %v2994_v61  ;;  %v3167_v51 = vmul.f32 %v4907_v15, %v3163_v9  ;;  %v2992_v0 = vld [vmem:[#allocation3 + $0x40] sm:$0xf]  ;;  %v3016_v32 = vld [vmem:[#allocation3 + $0x28] sm:$0x1e] }
 0x26c   : > { %2987 = vst [vmem:[#allocation3 + $0x88] sm:$0x1e] %v2971_v54  ;;  %v2999_v29 = vadd.f32 %v4925_v23, %v2995_v50  ;;  %v3139_v11 = vmul.f32 %v4907_v15, %v3135_v12  ;;  %v3145_v21 = vadd.f32 %v4925_v23, %v3141_v33  ;;  %v3023_v62 = vadd.f32 %v4925_v23, %v3019_v60  ;;  %v5196_v8 = vld [vmem:[%s5294_s2] ss:$0 sm:$0xff]  ;;  %v3160_v9 = vld [vmem:[#allocation3 + $0x38] sm:$0x1e] }
 0x26d   : > { %v2364_v18 = vmax.f32 %v2360_v57, 0.0  ;;  %v3150_v36 = vmax.f32 %v3146_v49, 0.0  ;;  %v3002_v16 = vmax.f32 %v2998_v26, 0.0  ;;  %v2996_v7 = vmul.f32 %v4907_v15, %v2992_v0  ;;  %v5206_v2 = vld [vmem:[%s5295_s3] ss:$0 sm:$0xff] }
 0x26e   : > { %v3003_v28 = vmax.f32 %v2999_v29, 0.0  ;;  %v3143_v4 = vadd.f32 %v4925_v23, %v3139_v11  ;;  %v3149_v58 = vmax.f32 %v3145_v21, 0.0  ;;  %v3027_v55 = vmax.f32 %v3023_v62, 0.0  ;;  %v3017_v56 = vld [vmem:[#allocation3 + $0x48] sm:$0x1e] }
 0x26f   : > { %v2368_v40 = vpack.c.bf16 %v2364_v18, %v2364_v18  ;;  %v3154_v37 = vpack.c.bf16 %v3150_v36, %v3150_v36  ;;  %v3006_v48 = vpack.c.bf16 %v3002_v16, %v3002_v16  ;;  %v3000_v42 = vadd.f32 %v4925_v23, %v2996_v7  ;;  %v3136_v17 = vld [vmem:[#allocation3 + $0x50] sm:$0xf] }
 0x270   : > { %v3007_v13 = vpack.c.bf16 %v3003_v28, %v3003_v28  ;;  %v3147_v38 = vmax.f32 %v3143_v4, 0.0  ;;  %v3153_v25 = vpack.c.bf16 %v3149_v58, %v3149_v58  ;;  %v3031_v10 = vpack.c.bf16 %v3027_v55, %v3027_v55  ;;  %v3161_v57 = vld [vmem:[#allocation3 + $0x58] sm:$0x1e] }
 0x271   : > { %v2382_v30 = vrot.slane %v2368_v40, %v5052_v43  ;;  %3159 = vst [vmem:[#allocation9 + $0x3c] sm:$0x3] %v3154_v37  ;;  %3011 = vst [vmem:[#allocation9 + $0x20] sm:$0x3] %v3006_v48  ;;  %v3004_v15 = vmax.f32 %v3000_v42, 0.0  ;;  %v3140_v14 = vmul.f32 %v5196_v8, %v3136_v17  ;;  %v3171_v39 = vadd.f32 %v4925_v23, %v3167_v51 }
 0x272   : > { %v2993_v5 = vld [vmem:[#allocation3 + $0x60] sm:$0xf]  ;;  %3012 = vst [vmem:[#allocation9 + $0x28] sm:$0x3] %v3007_v13  ;;  %v3151_v27 = vpack.c.bf16 %v3147_v38, %v3147_v38  ;;  %3158 = vst [vmem:[#allocation9 + $0x34] sm:$0x3] %v3153_v25  ;;  %v3045_v47 = vrot.slane %v3031_v10, %v5052_v43  ;;  %v3020_v59 = vmul.f32 %v5196_v8, %v3016_v32 }
 0x273   : > { %v2997_v22 = vmul.f32 %v5196_v8, %v2993_v5  ;;  %v2383_v44 = vcombine.high %v2382_v30, %v2382_v30  ;;  %v2416_v3 = vshrl.u32 %v2382_v30, 16  ;;  %v2419_v24 = vshll.u32 %v2382_v30, 16  ;;  %v3018_v53 = vld [vmem:[#allocation3 + $0x68] sm:$0x1e] }
 0x274   : > { %v3008_v63 = vpack.c.bf16 %v3004_v15, %v3004_v15  ;;  %3156 = vst [vmem:[#allocation9 + $0x24] sm:$0x3] %v3151_v27  ;;  %v3144_v45 = vadd.f32 %v5206_v2, %v3140_v14  ;;  %v3046_v34 = vcombine.high %v3045_v47, %v3045_v47  ;;  %v3072_v31 = vshrl.u32 %v3045_v47, 16 }
 0x275   : > { %v3001_v23 = vadd.f32 %v5206_v2, %v2997_v22  ;;  %v2418_v1 = vrot.slane %v2416_v3, 6  ;;  %v2421_v35 = vrot.slane %v2419_v24, 7  ;;  %v2425_v46 = vshll.u32 %v2383_v44, 16 }
 0x276   : > { %3013 = vst [vmem:[#allocation9 + $0x30] sm:$0x3] %v3008_v63  ;;  %v3075_v41 = vshll.u32 %v3045_v47, 16  ;;  %v3148_v52 = vmax.f32 %v3144_v45, 0.0  ;;  %v3074_v6 = vrot.slane %v3072_v31, 6  ;;  %v3081_v61 = vshll.u32 %v3046_v34, 16 }
 0x277   : > { %v3005_v19 = vmax.f32 %v3001_v23, 0.0  ;;  %v2422_v54 = vor.u32 %v2421_v35, %v2418_v1  ;;  %v2427_v50 = vrot.slane %v2425_v46, 7  ;;  %v3175_v60 = vmax.f32 %v3171_v39, 0.0 }
 0x278   : > { %v3077_v33 = vrot.slane %v3075_v41, 7  ;;  %v3152_v26 = vpack.c.bf16 %v3148_v52, %v3148_v52  ;;  %v3083_v12 = vrot.slane %v3081_v61, 7  ;;  %v3024_v51 = vadd.f32 %v5206_v2, %v3020_v59 }
 0x279   : > { %v3009_v49 = vpack.c.bf16 %v3005_v19, %v3005_v19  ;;  %v2423_v29 = vrot.slane %v2422_v54, 2  ;;  %v3179_v11 = vpack.c.bf16 %v3175_v60, %v3175_v60  ;;  %v3021_v21 = vmul.f32 %v5196_v8, %v3017_v56 }
 0x27a   : > { %v3078_v0 = vor.u32 %v3077_v33, %v3074_v6  ;;  %3157 = vst [vmem:[#allocation9 + $0x2c] sm:$0x3] %v3152_v26  ;;  %v3028_v62 = vmax.f32 %v3024_v51, 0.0  ;;  %v3022_v18 = vmul.f32 %v5196_v8, %v3018_v53  ;;  %v3164_v36 = vmul.f32 %v5196_v8, %v3160_v9 }
 0x27b   : > { %3014 = vst [vmem:[#allocation9 + $0x38] sm:$0x3] %v3009_v49  ;;  %v3165_v16 = vmul.f32 %v5196_v8, %v3161_v57  ;;  %v2428_v7 = vsel %vm5109_vm9, %v2423_v29, %v2427_v50  ;;  %v3214_v4 = vrot.slane %v3179_v11, %v5052_v43  ;;  %v3025_v58 = vadd.f32 %v5206_v2, %v3021_v21  ;;  %v3162_v29 = vld [vmem:[#allocation3 + $0x78] sm:$0x1e] }
 0x27c   : > { %v3079_v28 = vrot.slane %v3078_v0, 2  ;;  %2475 = vst [vmem:[#allocation9 + $0x2] sm:$0x3] %v2428_v7  ;;  %v3032_v55 = vpack.c.bf16 %v3028_v62, %v3028_v62  ;;  %v3026_v40 = vadd.f32 %v5206_v2, %v3022_v18  ;;  %v3168_v37 = vadd.f32 %v5206_v2, %v3164_v36 }
 0x27d   : > { %v3169_v48 = vadd.f32 %v5206_v2, %v3165_v16  ;;  %v3215_v32 = vcombine.high %v3214_v4, %v3214_v4  ;;  %v3259_v13 = vshrl.u32 %v3214_v4, 16  ;;  %v3262_v38 = vshll.u32 %v3214_v4, 16 }
 0x27e   : > { %v3084_v42 = vsel %vm5109_vm9, %v3079_v28, %v3083_v12  ;;  %v3053_v17 = vrot.slane %v3032_v55, %v5052_v43  ;;  %v3029_v25 = vmax.f32 %v3025_v58, 0.0  ;;  %v3030_v10 = vmax.f32 %v3026_v40, 0.0 }
 0x27f   : > { %3131 = vst [vmem:[#allocation9 + $0x22] sm:$0x3] %v3084_v42  ;;  %v3172_v30 = vmax.f32 %v3168_v37, 0.0  ;;  %v3261_v15 = vrot.slane %v3259_v13, 6  ;;  %v3264_v5 = vrot.slane %v3262_v38, 7  ;;  %v3268_v14 = vshll.u32 %v3215_v32, 16 }
 0x280   : > { %v3173_v39 = vmax.f32 %v3169_v48, 0.0  ;;  %v3054_v22 = vcombine.high %v3053_v17, %v3053_v17  ;;  %v3086_v27 = vshrl.u32 %v3053_v17, 16  ;;  %v3089_v47 = vshll.u32 %v3053_v17, 16 }
 0x281   : > { %v3033_v59 = vpack.c.bf16 %v3029_v25, %v3029_v25  ;;  %v3265_v44 = vor.u32 %v3264_v5, %v3261_v15  ;;  %v3270_v3 = vrot.slane %v3268_v14, 7  ;;  %v3034_v24 = vpack.c.bf16 %v3030_v10, %v3030_v10 }
 0x282   : > { %v3176_v63 = vpack.c.bf16 %v3172_v30, %v3172_v30  ;;  %v3088_v23 = vrot.slane %v3086_v27, 6  ;;  %v3091_v45 = vrot.slane %v3089_v47, 7  ;;  %v3095_v34 = vshll.u32 %v3054_v22, 16 }
 0x283   : > { %v3061_v31 = vrot.slane %v3033_v59, %v5052_v43  ;;  %v3266_v1 = vrot.slane %v3265_v44, 2  ;;  %v3069_v35 = vrot.slane %v3034_v24, %v5052_v43  ;;  %v3177_v41 = vpack.c.bf16 %v3173_v39, %v3173_v39 }
 0x284   : > { %v3190_v46 = vrot.slane %v3176_v63, %v5052_v43  ;;  %v3092_v56 = vor.u32 %v3091_v45, %v3088_v23  ;;  %v3097_v9 = vrot.slane %v3095_v34, 7  ;;  %v3166_v4 = vmul.f32 %v5196_v8, %v3162_v29 }
 0x285   : > { %v3062_v19 = vcombine.high %v3061_v31, %v3061_v31  ;;  %v3100_v52 = vshrl.u32 %v3061_v31, 16  ;;  %v3271_v6 = vsel %vm5109_vm9, %v3266_v1, %v3270_v3  ;;  %v3103_v61 = vshll.u32 %v3061_v31, 16 }
 0x286   : > { %v3070_v53 = vcombine.high %v3069_v35, %v3069_v35  ;;  %v3114_v54 = vshrl.u32 %v3069_v35, 16  ;;  %3279 = vst [vmem:[#allocation9 + $0x3e] sm:$0x3] %v3271_v6  ;;  %v3093_v50 = vrot.slane %v3092_v56, 2  ;;  %v3117_v57 = vshll.u32 %v3069_v35, 16 }
 0x287   : > { %v3102_v33 = vrot.slane %v3100_v52, 6  ;;  %v3109_v60 = vshll.u32 %v3062_v19, 16  ;;  %v3105_v49 = vrot.slane %v3103_v61, 7  ;;  %v3191_v51 = vcombine.high %v3190_v46, %v3190_v46 }
 0x288   : > { %v3116_v26 = vrot.slane %v3114_v54, 6  ;;  %v3123_v12 = vshll.u32 %v3070_v53, 16  ;;  %v3098_v0 = vsel %vm5109_vm9, %v3093_v50, %v3097_v9  ;;  %v3119_v11 = vrot.slane %v3117_v57, 7 }
 0x289   : > { %v3217_v21 = vshrl.u32 %v3190_v46, 16  ;;  %3132 = vst [vmem:[#allocation9 + $0x2a] sm:$0x3] %v3098_v0  ;;  %v3106_v62 = vor.u32 %v3105_v49, %v3102_v33  ;;  %v3111_v18 = vrot.slane %v3109_v60, 7  ;;  %v3220_v36 = vshll.u32 %v3190_v46, 16 }
 0x28a   : > { %v3120_v16 = vor.u32 %v3119_v11, %v3116_v26  ;;  %v3198_v28 = vrot.slane %v3177_v41, %v5052_v43  ;;  %v3125_v55 = vrot.slane %v3123_v12, 7  ;;  %v3226_v37 = vshll.u32 %v3191_v51, 16 }
 0x28b   : > { %v3219_v7 = vrot.slane %v3217_v21, 6  ;;  %v3107_v58 = vrot.slane %v3106_v62, 2  ;;  %v3222_v40 = vrot.slane %v3220_v36, 7  ;;  %v3170_v25 = vadd.f32 %v5206_v2, %v3166_v4 }
 0x28c   : > { %v3121_v48 = vrot.slane %v3120_v16, 2  ;;  %v3199_v42 = vcombine.high %v3198_v28, %v3198_v28  ;;  %v3231_v32 = vshrl.u32 %v3198_v28, 16  ;;  %v3234_v13 = vshll.u32 %v3198_v28, 16 }
 0x28d   : > { %v3112_v38 = vsel %vm5109_vm9, %v3107_v58, %v3111_v18  ;;  %v3223_v17 = vor.u32 %v3222_v40, %v3219_v7  ;;  %v3228_v14 = vrot.slane %v3226_v37, 7  ;;  %v3174_v39 = vmax.f32 %v3170_v25, 0.0 }
 0x28e   : > { %3133 = vst [vmem:[#allocation9 + $0x32] sm:$0x3] %v3112_v38  ;;  %v3126_v10 = vsel %vm5109_vm9, %v3121_v48, %v3125_v55  ;;  %v3233_v30 = vrot.slane %v3231_v32, 6  ;;  %v3236_v8 = vrot.slane %v3234_v13, 7  ;;  %v3240_v15 = vshll.u32 %v3199_v42, 16 }
 0x28f   : > { %3134 = vst [vmem:[#allocation9 + $0x3a] sm:$0x3] %v3126_v10  ;;  %v3224_v5 = vrot.slane %v3223_v17, 2  ;;  %v3178_v47 = vpack.c.bf16 %v3174_v39, %v3174_v39 }
 0x290   : > { %v3237_v22 = vor.u32 %v3236_v8, %v3233_v30  ;;  %v3242_v44 = vrot.slane %v3240_v15, 7 }
 0x291   : > { %v3229_v27 = vsel %vm5109_vm9, %v3224_v5, %v3228_v14  ;;  %v3206_v2 = vrot.slane %v3178_v47, %v5052_v43 }
 0x292   : > { %3276 = vst [vmem:[#allocation9 + $0x26] sm:$0x3] %v3229_v27  ;;  %v3238_v59 = vrot.slane %v3237_v22, 2 }
 0x293   : > { %v3207_v24 = vcombine.high %v3206_v2, %v3206_v2  ;;  %v3245_v63 = vshrl.u32 %v3206_v2, 16  ;;  %v3248_v23 = vshll.u32 %v3206_v2, 16 }
 0x294   : > { %v3243_v3 = vsel %vm5109_vm9, %v3238_v59, %v3242_v44 }
 0x295   : > { %3277 = vst [vmem:[#allocation9 + $0x2e] sm:$0x3] %v3243_v3  ;;  %v3247_v45 = vrot.slane %v3245_v63, 6  ;;  %v3250_v34 = vrot.slane %v3248_v23, 7  ;;  %v3254_v31 = vshll.u32 %v3207_v24, 16 }
 0x297   : > { %v3251_v1 = vor.u32 %v3250_v34, %v3247_v45  ;;  %v3256_v46 = vrot.slane %v3254_v31, 7 }
 0x299   : > { %v3252_v35 = vrot.slane %v3251_v1, 2 }
 0x29b   : > { %v3257_v41 = vsel %vm5109_vm9, %v3252_v35, %v3256_v46 }
 0x29c   : > { %3278 = vst [vmem:[#allocation9 + $0x36] sm:$0x3] %v3257_v41 }
 0x29d PF: > { %s5362_s19 = sadd.s32 4294967295, %s3967_s26   ;;  %s3978_s20 = smov [#allocation9]  }
 0x29e   : > { %p5248_p2 = scmp.eq.s32.totalorder %s5362_s19, 1  ;;  %s3294_s29 = sshll.u32 %s3978_s20, 4  ;;  %s3295_s29 = int_to_ptr.vmem [resolvable:$true] %s3294_s29 }
 0x29f   : > { %s3883_s7 = scalar_lea.vmem %s3295_s29, 1024  ;;  %p3890_p5 = scmp.lt.s32.totalorder %s3295_s29, %s3295_s29 }
 0x2a0   : > { %p3884_p3 = scmp.ne.s32.totalorder %s3295_s29, %s3883_s7  ;;  %p3891_p6 = scmp.lt.s32.totalorder %s3883_s7, %s3883_s7 }
 0x2a2   : > { %p3885_p10 = pnand %p3884_p3, %p5248_p2  ;;  %p3892_p11 = por %p3891_p6, %p3890_p5 }
 0x2a4   : > { %p3886_p0 = pneg %p3885_p10 }
 0x2a6   : > { %p3893_p13 = pnand %p3892_p11, %p3886_p0 }
 0x2a8   : > { %3896 = shalt.err (!%p3893_p13)
}
 0x2a9   : > { %s3897_s18 = scalar_lea.hbm %s5297_s5, 1024 }
 0x2aa   : > { %p3898_p1 = scmp.ne.s32.totalorder %s5297_s5, %s3897_s18  ;;  %p3903_p12 = scmp.lt.u32.totalorder %s3897_s18, %s5297_s5 }
 0x2ac   : > { %p3899_p7 = pnand %p3898_p1, %p5248_p2 }
 0x2ae   : > { %p3900_p9 = pneg %p3899_p7 }
 0x2b0   : > { %p3905_p4 = pnand %p3903_p12, %p3900_p9 }
 0x2b2   : > { %3908 = shalt.err (!%p3905_p4)
}
 0x2b3   : > { %s3979_s21 = smov 64   ;;  %s3980_s11 = smov 4  }
 0x2b4   : > { %3642 = dma.vmem_to_hbm [thread:$0]  (%p5248_p2), %s3295_s29, 1024, %s5297_s5, [#allocation6], %s3979_s21, %s3979_s21, %s3980_s11  }
 0x2b5   : > { %3942 = dma.done.wait (%p5248_p2), [#allocation6], 1024  }
 0x2b6   : > { %3944 = vsyncadd (%p5248_p2), [#allocation6], 4294966272 }
 0x2b7 PF: > { %s24_s26 = sadd.s32 1, %s3967_s26   ;;  %s5364_s21 = smov %s3951_s22 }
 0x2b8   : > { %p21_p8 = scmp.ge.s32.totalorder %s24_s26, 4   ;;  %s5365_s22 = smov %s3955_s23 }
 0x2b9   : > { %s5366_s23 = smov %s4067_s9  ;;  %s5367_s24 = smov %s3963_s25 }
 0x2ba   : > { %s5368_s25 = smov %s5370_s28  ;;  %23 = sbr.rel (!%p21_p8) target bundleno = 7 (0x7), region = 128 }
 0x2c1   :  { %3321 = vsyncpa [#allocation5], 1 }
 0x2c2   :  { %3323 = vsyncpa [#allocation5 + $0x1], 1 }
 0x2c3   :  { %3324 = vsyncpa [#allocation8], 1 }
 0x2c4   :  { %3326 = vsyncpa [#allocation8 + $0x1], 1 }
 0x2c5   :  { %3327 = vsyncpa [#allocation6], 1 }
 0x2c6   :  { %3329 = vsyncpa [#allocation6 + $0x1], 1 }

</bundles_post_ra>
